<compile_context>
chip_gen: v6e
topology: v6e:2x2x1
jax: 0.10.0
libtpu: 0.0.40
codegen_flags: <defaults>
</compile_context>

<pallas_src>
import functools

import jax
import jax.numpy as jnp
from jax.experimental import pallas as pl
from jax.experimental.pallas import tpu as pltpu

VMEM_LIMIT = 32 * 1024 * 1024        # explicit scoped-VMEM budget (fits v5e/v6e/v7x)


def _round_up(c, m=128):
    return ((c + m - 1) // m) * m


def _pick_tm(m, cap=512):
    """Largest multiple-of-8 divisor of m that is <= cap and leaves >= 2 grid
    steps (keeps both v7x TensorCores busy & keeps pipelining alive); falls
    back to a single full block."""
    for d in range(min(cap, m // 2), 7, -1):
        if m % d == 0 and d % 8 == 0:
            return d
    return m


# ----------------------------- Pallas kernels ------------------------------ #

def _conv_tap_kernel(x_ref, w_ref, y_ref, sum_ref, ssq_ref, acc_ref,
                     *, taps, mwide, wq, wo):
    """One batch image per grid step.

    x_ref  : (1, P, HWq, Cin)  f32   flattened padded input plane(s)
    w_ref  : (KK, Cin, Cout)   bf16  per-tap weight matrices
    y_ref  : (1, mwide, Cout)  f32   "wide" conv output (cols >= wo are garbage)
    sum_ref/ssq_ref : (1, 1, Cout) f32  per-image BN partial sums (garbage masked)
    acc_ref: VMEM (mwide, Cout) f32  accumulator
    """
    acc_ref[...] = jnp.zeros_like(acc_ref)
    for t, (p, off) in enumerate(taps):
        a = x_ref[0, p, off:off + mwide, :].astype(jnp.bfloat16)
        acc_ref[...] += jnp.dot(a, w_ref[t], preferred_element_type=jnp.float32)
    acc = acc_ref[...]
    y_ref[0] = acc
    # Fused BN partial statistics over the valid (non-garbage) output columns.
    col = jax.lax.broadcasted_iota(jnp.int32, (mwide, 1), 0) % wq
    valid = (col < wo).astype(jnp.float32)
    accv = acc * valid
    sum_ref[0] = jnp.sum(accv, axis=0, keepdims=True)
    ssq_ref[0] = jnp.sum(acc * accv, axis=0, keepdims=True)


def _bn_relu_kernel(y_ref, s_ref, b_ref, o_ref):
    o_ref[...] = jnp.maximum(y_ref[...] * s_ref[...] + b_ref[...], 0.0)


def _bn_add_relu_kernel(y_ref, r_ref, sy_ref, by_ref, sr_ref, br_ref, o_ref):
    v = (y_ref[...] * sy_ref[...] + by_ref[...]
         + r_ref[...] * sr_ref[...] + br_ref[...])
    o_ref[...] = jnp.maximum(v, 0.0)


# ----------------------------- Pallas wrappers ------------------------------ #

def conv2d_bn_stats(planes, w_packed, taps, ho, wq, wo):
    """Convolution as an in-kernel tap reduction + fused BN statistics.

    planes   : (N, P, HWq, Cin) f32
    w_packed : (KK, Cin, Cout)  bf16
    returns  : y_wide (N, ho*wq, Cout) f32, ysum (N,1,Cout), yssq (N,1,Cout)
    """
    n, p, hwq, cin = planes.shape
    kk, _, cout = w_packed.shape
    mw = ho * wq
    kernel = functools.partial(_conv_tap_kernel, taps=taps, mwide=mw, wq=wq, wo=wo)
    flops = 2 * n * mw * cin * cout * kk
    bytes_accessed = (planes.size * 4 + w_packed.size * 2
                      + n * mw * cout * 4 + 2 * n * cout * 4)
    return pl.pallas_call(
        kernel,
        out_shape=(jax.ShapeDtypeStruct((n, mw, cout), jnp.float32),
                   jax.ShapeDtypeStruct((n, 1, cout), jnp.float32),
                   jax.ShapeDtypeStruct((n, 1, cout), jnp.float32)),
        grid=(n,),
        in_specs=[pl.BlockSpec((1, p, hwq, cin), lambda i: (i, 0, 0, 0)),
                  pl.BlockSpec((kk, cin, cout), lambda i: (0, 0, 0))],
        out_specs=(pl.BlockSpec((1, mw, cout), lambda i: (i, 0, 0)),
                   pl.BlockSpec((1, 1, cout), lambda i: (i, 0, 0)),
                   pl.BlockSpec((1, 1, cout), lambda i: (i, 0, 0))),
        scratch_shapes=[pltpu.VMEM((mw, cout), jnp.float32)],
        compiler_params=pltpu.CompilerParams(
            dimension_semantics=("parallel",),
            vmem_limit_bytes=VMEM_LIMIT),
        cost_estimate=pl.CostEstimate(flops=flops, transcendentals=0,
                                      bytes_accessed=bytes_accessed),
    )(planes, w_packed)


def bn_relu(y, scale, bias):
    """out = relu(y * scale + bias), y:(M, C) with C lane-dense (128)."""
    m, c = y.shape
    tm = _pick_tm(m)
    return pl.pallas_call(
        _bn_relu_kernel,
        out_shape=jax.ShapeDtypeStruct((m, c), jnp.float32),
        grid=(m // tm,),
        in_specs=[pl.BlockSpec((tm, c), lambda i: (i, 0)),
                  pl.BlockSpec((1, c), lambda i: (0, 0)),
                  pl.BlockSpec((1, c), lambda i: (0, 0))],
        out_specs=pl.BlockSpec((tm, c), lambda i: (i, 0)),
        compiler_params=pltpu.CompilerParams(
            dimension_semantics=("parallel",), vmem_limit_bytes=VMEM_LIMIT),
    )(y, scale, bias)


def bn_add_relu(y, res, sy, by, sr, br):
    """out = relu(y*sy + by + res*sr + br) - BN2 + residual BN + add + ReLU."""
    m, c = y.shape
    tm = _pick_tm(m)
    return pl.pallas_call(
        _bn_add_relu_kernel,
        out_shape=jax.ShapeDtypeStruct((m, c), jnp.float32),
        grid=(m // tm,),
        in_specs=[pl.BlockSpec((tm, c), lambda i: (i, 0)),
                  pl.BlockSpec((tm, c), lambda i: (i, 0)),
                  pl.BlockSpec((1, c), lambda i: (0, 0)),
                  pl.BlockSpec((1, c), lambda i: (0, 0)),
                  pl.BlockSpec((1, c), lambda i: (0, 0)),
                  pl.BlockSpec((1, c), lambda i: (0, 0))],
        out_specs=pl.BlockSpec((tm, c), lambda i: (i, 0)),
        compiler_params=pltpu.CompilerParams(
            dimension_semantics=("parallel",), vmem_limit_bytes=VMEM_LIMIT),
    )(y, res, sy, by, sr, br)


# ------------------------------- JAX glue ---------------------------------- #

def _conv_planes(x_nhwc, ksize, stride, ho, wo):
    """Lay the (padded) input out so every conv tap is a contiguous slice of a
    flat per-image plane (no strided / layout-hostile access inside the kernel).

    Returns (planes, taps, wq):
      planes : (N, P, HWq, C) f32
      taps   : list of (plane_index, flat_offset), one per kernel tap
      wq     : width of the "wide" output rows (>= wo; cols >= wo are garbage)
    """
    n, h, w, c = x_nhwc.shape
    if ksize == 1:
        # 1x1 / stride s: subsample, then pad width to wo+2 so the wide layout
        # matches the stride-1 3x3 conv output it will be added to.
        xs = x_nhwc[:, ::stride, ::stride, :][:, :ho, :wo, :]
        wq = wo + 2
        xs = jnp.pad(xs, ((0, 0), (0, 0), (0, wq - wo), (0, 0)))
        return xs.reshape(n, 1, ho * wq, c), [(0, 0)], wq
    assert ksize == 3
    if stride == 1:
        hq, wq = ho + 3, wo + 2          # one extra bottom row absorbs the flat overrun
        xp = jnp.pad(x_nhwc, ((0, 0), (1, hq - 1 - h), (1, wq - 1 - w), (0, 0)))
        taps = [(0, dy * wq + dx) for dy in range(3) for dx in range(3)]
        return xp.reshape(n, 1, hq * wq, c), taps, wq
    # stride 2: four parity planes -> every tap becomes a unit-stride flat slice.
    assert stride == 2
    hq, wq = ho + 2, wo + 1
    hp, wp = 2 * hq, 2 * wq
    xp = jnp.pad(x_nhwc, ((0, 0), (1, hp - 1 - h), (1, wp - 1 - w), (0, 0)))
    planes = jnp.stack([xp[:, py::2, px::2, :] for py in (0, 1) for px in (0, 1)],
                       axis=1)
    taps = [((dy % 2) * 2 + (dx % 2), (dy // 2) * wq + (dx // 2))
            for dy in range(3) for dx in range(3)]
    return planes.reshape(n, 4, hq * wq, c), taps, wq


def _pack_weights(w_oihw, cin_p, cout_p):
    """(Cout, Cin, kh, kw) -> (kh*kw, Cin_pad, Cout_pad) bf16 per-tap matrices."""
    cout, cin, kh, kw = w_oihw.shape
    wm = jnp.transpose(w_oihw, (2, 3, 1, 0)).reshape(kh * kw, cin, cout)
    wm = jnp.pad(wm, ((0, 0), (0, cin_p - cin), (0, cout_p - cout)))
    return wm.astype(jnp.bfloat16)


def _pad_channels(x, cp):
    c = x.shape[-1]
    if c == cp:
        return x
    return jnp.pad(x, ((0, 0),) * (x.ndim - 1) + ((0, cp - c),))


def _bn_scale_bias(ysum, yssq, count, gamma, beta, cp, eps=1e-5):
    """Fold training-mode (biased) batch stats into per-channel scale/bias.
    The statistics come from the f32 partial sums emitted by the conv kernel."""
    mean = jnp.sum(ysum, axis=(0, 1)) / count
    var = jnp.maximum(jnp.sum(yssq, axis=(0, 1)) / count - mean * mean, 0.0)
    g = jnp.pad(gamma.astype(jnp.float32), (0, cp - gamma.shape[0]))
    b = jnp.pad(beta.astype(jnp.float32), (0, cp - beta.shape[0]))
    scale = g * jax.lax.rsqrt(var + eps)
    bias = b - mean * scale
    # TODO(synk): running_mean / running_var updates (training-time buffer side
    # effect) are not emitted; forward output matches PyTorch train-mode BN.
    return scale[None, :], bias[None, :]


def init_basic_block(key, in_ch, out_ch, stride=1, downsample=False):
    ks = jax.random.split(key, 8)
    p = {
        "w1": 0.1 * jax.random.normal(ks[0], (out_ch, in_ch, 3, 3), jnp.float32),
        "g1": 1.0 + 0.1 * jax.random.normal(ks[1], (out_ch,), jnp.float32),
        "b1": 0.1 * jax.random.normal(ks[2], (out_ch,), jnp.float32),
        "w2": 0.1 * jax.random.normal(ks[3], (out_ch, out_ch, 3, 3), jnp.float32),
        "g2": 1.0 + 0.1 * jax.random.normal(ks[4], (out_ch,), jnp.float32),
        "b2": 0.1 * jax.random.normal(ks[5], (out_ch,), jnp.float32),
    }
    if downsample:
        p["wd"] = 0.1 * jax.random.normal(ks[6], (out_ch, in_ch, 1, 1), jnp.float32)
        p["gd"] = jnp.ones((out_ch,), jnp.float32)
        p["bd"] = jnp.zeros((out_ch,), jnp.float32)
    return p


def basic_block_forward(params, x_nchw, stride=1, downsample=False):
    x = jnp.transpose(x_nchw, (0, 2, 3, 1)).astype(jnp.float32)   # NCHW -> NHWC
    n, h, w, cin = x.shape
    cout = params["w1"].shape[0]
    ho = (h + 2 - 3) // stride + 1
    wo = (w + 2 - 3) // stride + 1
    cpi = _round_up(cin)
    cpo = _round_up(cout)
    cnt = n * ho * wo

    x_cp = _pad_channels(x, cpi)           # lane-dense channels (128 multiple)

    # ---- conv1 (+ fused BN1 statistics) -> fused BN1 affine + ReLU ----------
    planes1, taps1, wq1 = _conv_planes(x_cp, 3, stride, ho, wo)
    y1, s1, q1 = conv2d_bn_stats(planes1, _pack_weights(params["w1"], cpi, cpo),
                                 taps1, ho, wq1, wo)
    sc1, bi1 = _bn_scale_bias(s1, q1, cnt, params["g1"], params["b1"], cpo)
    a1w = bn_relu(y1.reshape(n * ho * wq1, cpo), sc1, bi1)
    a1 = a1w.reshape(n, ho, wq1, cpo)[:, :, :wo, :]      # drop wide garbage cols
    # TODO(synk): fold this slice + conv2's spatial padding into the epilogue's
    # output BlockSpec to save one XLA copy of a1.

    # ---- conv2 (+ fused BN2 statistics) -------------------------------------
    planes2, taps2, wq2 = _conv_planes(a1, 3, 1, ho, wo)
    y2, s2, q2 = conv2d_bn_stats(planes2, _pack_weights(params["w2"], cpo, cpo),
                                 taps2, ho, wq2, wo)
    sc2, bi2 = _bn_scale_bias(s2, q2, cnt, params["g2"], params["b2"], cpo)

    # ---- residual branch, laid out to match y2's wide rows ------------------
    if downsample:
        planesd, tapsd, wqd = _conv_planes(x_cp, 1, stride, ho, wo)
        assert wqd == wq2
        yd, sd, qd = conv2d_bn_stats(planesd, _pack_weights(params["wd"], cpi, cpo),
                                     tapsd, ho, wqd, wo)
        scd, bid = _bn_scale_bias(sd, qd, cnt, params["gd"], params["bd"], cpo)
        res = yd.reshape(n * ho * wqd, cpo)
    else:
        assert stride == 1 and cin == cout, "identity path needs stride=1, cin==cout"
        res = jnp.pad(x_cp, ((0, 0), (0, 0), (0, wq2 - w), (0, 0)))
        res = res.reshape(n * h * wq2, cpo)
        scd = jnp.ones((1, cpo), jnp.float32)
        bid = jnp.zeros((1, cpo), jnp.float32)

    # ---- fused BN2 affine + residual BN affine + add + ReLU -----------------
    outw = bn_add_relu(y2.reshape(n * ho * wq2, cpo), res, sc2, bi2, scd, bid)
    out = outw.reshape(n, ho, wq2, cpo)[:, :, :wo, :cout]
    return jnp.transpose(out, (0, 3, 1, 2))               # back to NCHW


# ------------------------- pure-JAX reference check ------------------------ #

def _ref_conv(x, w, stride, pad):
    return jax.lax.conv_general_dilated(
        x, jnp.transpose(w, (2, 3, 1, 0)),
        window_strides=(stride, stride),
        padding=[(pad, pad), (pad, pad)],
        dimension_numbers=("NHWC", "HWIO", "NHWC"))


def _ref_bn(y, gamma, beta, eps=1e-5):
    mean = jnp.mean(y, axis=(0, 1, 2))
    var = jnp.mean(jnp.square(y - mean), axis=(0, 1, 2))
    return (y - mean) * (gamma / jnp.sqrt(var + eps)) + beta


def basic_block_ref(params, x_nchw, stride=1, downsample=False):
    x = jnp.transpose(x_nchw, (0, 2, 3, 1))
    i = x
    h = _ref_conv(x, params["w1"], stride, 1)
    h = jnp.maximum(_ref_bn(h, params["g1"], params["b1"]), 0.0)
    h = _ref_conv(h, params["w2"], 1, 1)
    h = _ref_bn(h, params["g2"], params["b2"])
    if downsample:
        i = _ref_conv(i, params["wd"], stride, 0)
        i = _ref_bn(i, params["gd"], params["bd"])
    out = jnp.maximum(h + i, 0.0)
    return jnp.transpose(out, (0, 3, 1, 2))


# ---------------------------------- main ----------------------------------- #

if __name__ == "__main__":
    key = jax.random.PRNGKey(0)
    kx, kp1, kp2 = jax.random.split(key, 3)
    x = jax.random.normal(kx, (2, 4, 16, 16), jnp.float32)   # NCHW like PyTorch

    fwd = jax.jit(basic_block_forward, static_argnames=("stride", "downsample"))

    # Block with downsample: stride 2, channels 4 -> 8
    p1 = init_basic_block(kp1, 4, 8, stride=2, downsample=True)
    out1 = jax.block_until_ready(fwd(p1, x, stride=2, downsample=True))
    ref1 = basic_block_ref(p1, x, stride=2, downsample=True)
    assert out1.shape == (2, 8, 8, 8), out1.shape
    assert jnp.allclose(out1, ref1, atol=5e-2, rtol=5e-2)

    # Identity block: stride 1, channels 4 -> 4
    p2 = init_basic_block(kp2, 4, 4, stride=1, downsample=False)
    out2 = jax.block_until_ready(fwd(p2, x, stride=1, downsample=False))
    ref2 = basic_block_ref(p2, x, stride=1, downsample=False)
    assert out2.shape == (2, 4, 16, 16), out2.shape
    assert jnp.allclose(out2, ref2, atol=5e-2, rtol=5e-2)

    print("KERNEL_OK")
</pallas_src>

<mosaic_0001>
module attributes {stable_mosaic.version = 11 : i64} {
  func.func @_conv_tap_kernel(%arg0: i32, %arg1: memref<1x1x80x128xf32, #tpu.memory_space<vmem>>, %arg2: memref<1x128x128xbf16, #tpu.memory_space<vmem>>, %arg3: memref<1x80x128xf32, #tpu.memory_space<vmem>>, %arg4: memref<1x1x128xf32, #tpu.memory_space<vmem>>, %arg5: memref<1x1x128xf32, #tpu.memory_space<vmem>>, %arg6: memref<80x128xf32, #tpu.memory_space<vmem>>) attributes {dimension_semantics = [#tpu.dimension_semantics<parallel>], iteration_bounds = array<i64: 2>, scalar_prefetch = 0 : i64, scratch_operands = 1 : i64, tpu.core_type = #tpu.core_type<tc>, window_params = [{transform_indices = @transform_0, window_bounds = array<i64: 1, 1, 80, 128>}, {pipeline_mode = #tpu.pipeline_mode<synchronous>, transform_indices = @transform_1, window_bounds = array<i64: 1, 128, 128>}, {transform_indices = @transform_2, window_bounds = array<i64: 1, 80, 128>}, {transform_indices = @transform_3, window_bounds = array<i64: 1, 1, 128>}, {transform_indices = @transform_4, window_bounds = array<i64: 1, 1, 128>}]} {
    %cst = arith.constant 0.000000e+00 : f32
    %0 = vector.broadcast %cst : f32 to vector<80x128xf32>
    %c0 = arith.constant 0 : index
    %c0_0 = arith.constant 0 : index
    %1 = vector.load %arg6[%c0, %c0_0] : memref<80x128xf32, #tpu.memory_space<vmem>>, vector<80x128xf32>
    tpu.vector_store %arg6[%c0, %c0_0], %0 {strides = array<i32>} : memref<80x128xf32, #tpu.memory_space<vmem>>, vector<80x128xf32>,
    %c0_1 = arith.constant 0 : index
    %c0_2 = arith.constant 0 : index
    %c0_3 = arith.constant 0 : index
    %c0_4 = arith.constant 0 : index
    %2 = vector.load %arg1[%c0_1, %c0_2, %c0_3, %c0_4] : memref<1x1x80x128xf32, #tpu.memory_space<vmem>>, vector<1x1x80x128xf32>
    %3 = vector.shape_cast %2 : vector<1x1x80x128xf32> to vector<80x128xf32>
    %4 = arith.truncf %3 : vector<80x128xf32> to vector<80x128xbf16>
    %c0_5 = arith.constant 0 : index
    %c0_6 = arith.constant 0 : index
    %5 = vector.load %arg6[%c0_5, %c0_6] : memref<80x128xf32, #tpu.memory_space<vmem>>, vector<80x128xf32>
    %c0_7 = arith.constant 0 : index
    %c0_8 = arith.constant 0 : index
    %c0_9 = arith.constant 0 : index
    %6 = vector.load %arg2[%c0_7, %c0_8, %c0_9] : memref<1x128x128xbf16, #tpu.memory_space<vmem>>, vector<1x128x128xbf16>
    %7 = vector.shape_cast %6 : vector<1x128x128xbf16> to vector<128x128xbf16>
    %cst_10 = arith.constant dense<0.000000e+00> : vector<80x128xf32>
    %8 = tpu.matmul %4, %7, %cst_10 {dimension_numbers = #tpu.dot_dimension_numbers<[1], [0], [0], [1], [0, 0, 1, 1], [], []>} : vector<80x128xbf16>, vector<128x128xbf16>, vector<80x128xf32> -> vector<80x128xf32>
    %9 = arith.addf %5, %8 : vector<80x128xf32>
    %c0_11 = arith.constant 0 : index
    %c0_12 = arith.constant 0 : index
    %10 = vector.load %arg6[%c0_11, %c0_12] : memref<80x128xf32, #tpu.memory_space<vmem>>, vector<80x128xf32>
    tpu.vector_store %arg6[%c0_11, %c0_12], %9 {strides = array<i32>} : memref<80x128xf32, #tpu.memory_space<vmem>>, vector<80x128xf32>,
    %c0_13 = arith.constant 0 : index
    %c0_14 = arith.constant 0 : index
    %11 = vector.load %arg6[%c0_13, %c0_14] : memref<80x128xf32, #tpu.memory_space<vmem>>, vector<80x128xf32>
    %c0_15 = arith.constant 0 : index
    %c0_16 = arith.constant 0 : index
    %c0_17 = arith.constant 0 : index
    %12 = vector.load %arg3[%c0_15, %c0_16, %c0_17] : memref<1x80x128xf32, #tpu.memory_space<vmem>>, vector<1x80x128xf32>
    %13 = vector.shape_cast %12 : vector<1x80x128xf32> to vector<80x128xf32>
    %14 = vector.shape_cast %11 : vector<80x128xf32> to vector<1x80x128xf32>
    tpu.vector_store %arg3[%c0_15, %c0_16, %c0_17], %14 {strides = array<i32>} : memref<1x80x128xf32, #tpu.memory_space<vmem>>, vector<1x80x128xf32>,
    %15 = tpu.iota {dimensions = array<i32: 0>} : vector<80x1xi32>
    %c10_i32 = arith.constant 10 : i32
    %c0_i32 = arith.constant 0 : i32
    %16 = arith.cmpi eq, %c10_i32, %c0_i32 : i32
    %c1_i32 = arith.constant 1 : i32
    %17 = arith.select %16, %c1_i32, %c10_i32 : i32
    %18 = vector.broadcast %17 : i32 to vector<80x1xi32>
    %19 = arith.remsi %15, %18 : vector<80x1xi32>
    %c0_i32_18 = arith.constant 0 : i32
    %20 = vector.broadcast %c0_i32_18 : i32 to vector<80x1xi32>
    %21 = arith.cmpi ne, %19, %20 : vector<80x1xi32>
    %c0_i32_19 = arith.constant 0 : i32
    %22 = vector.broadcast %c0_i32_19 : i32 to vector<80x1xi32>
    %23 = arith.cmpi slt, %19, %22 : vector<80x1xi32>
    %c0_i32_20 = arith.constant 0 : i32
    %24 = arith.cmpi slt, %17, %c0_i32_20 : i32
    %25 = vector.broadcast %24 : i1 to vector<80x1xi1>
    %26 = vector.broadcast %25 : vector<80x1xi1> to vector<80x1xi1>
    %27 = arith.xori %23, %26 : vector<80x1xi1>
    %28 = arith.andi %27, %21 : vector<80x1xi1>
    %29 = vector.broadcast %17 : i32 to vector<80x1xi32>
    %30 = arith.addi %19, %29 : vector<80x1xi32>
    %31 = arith.select %28, %30, %19 : vector<80x1xi1>, vector<80x1xi32>
    %c8_i32 = arith.constant 8 : i32
    %32 = vector.broadcast %c8_i32 : i32 to vector<80x1xi32>
    %33 = arith.cmpi slt, %31, %32 : vector<80x1xi32>
    %34 = arith.extui %33 : vector<80x1xi1> to vector<80x1xi32>
    %35 = arith.sitofp %34 : vector<80x1xi32> to vector<80x1xf32>
    %36 = vector.broadcast %35 : vector<80x1xf32> to vector<80x128xf32>
    %37 = arith.mulf %11, %36 : vector<80x128xf32>
    %cst_21 = arith.constant dense<0.000000e+00> : vector<128xf32>
    %38 = vector.multi_reduction <add>, %37, %cst_21 [0] : vector<80x128xf32> to vector<128xf32>
    %39 = vector.shape_cast %38 : vector<128xf32> to vector<1x128xf32>
    %c0_22 = arith.constant 0 : index
    %c0_23 = arith.constant 0 : index
    %c0_24 = arith.constant 0 : index
    %40 = vector.load %arg4[%c0_22, %c0_23, %c0_24] : memref<1x1x128xf32, #tpu.memory_space<vmem>>, vector<1x1x128xf32>
    %41 = vector.shape_cast %40 : vector<1x1x128xf32> to vector<1x128xf32>
    %42 = vector.shape_cast %39 : vector<1x128xf32> to vector<1x1x128xf32>
    tpu.vector_store %arg4[%c0_22, %c0_23, %c0_24], %42 {strides = array<i32>} : memref<1x1x128xf32, #tpu.memory_space<vmem>>, vector<1x1x128xf32>,
    %43 = arith.mulf %11, %37 : vector<80x128xf32>
    %cst_25 = arith.constant dense<0.000000e+00> : vector<128xf32>
    %44 = vector.multi_reduction <add>, %43, %cst_25 [0] : vector<80x128xf32> to vector<128xf32>
    %45 = vector.shape_cast %44 : vector<128xf32> to vector<1x128xf32>
    %c0_26 = arith.constant 0 : index
    %c0_27 = arith.constant 0 : index
    %c0_28 = arith.constant 0 : index
    %46 = vector.load %arg5[%c0_26, %c0_27, %c0_28] : memref<1x1x128xf32, #tpu.memory_space<vmem>>, vector<1x1x128xf32>
    %47 = vector.shape_cast %46 : vector<1x1x128xf32> to vector<1x128xf32>
    %48 = vector.shape_cast %45 : vector<1x128xf32> to vector<1x1x128xf32>
    tpu.vector_store %arg5[%c0_26, %c0_27, %c0_28], %48 {strides = array<i32>} : memref<1x1x128xf32, #tpu.memory_space<vmem>>, vector<1x1x128xf32>,
    return
  }
  func.func @transform_0(%arg0: i32) -> (i32, i32, i32, i32) {
    %c0_i32 = arith.constant 0 : i32
    %c0_i32_0 = arith.constant 0 : i32
    %c0_i32_1 = arith.constant 0 : i32
    %c0_i32_2 = arith.constant 0 : i32
    return %arg0, %c0_i32, %c0_i32_0, %c0_i32_1 : i32, i32, i32, i32
  }
  func.func @transform_1(%arg0: i32) -> (i32, i32, i32) {
    %c0_i32 = arith.constant 0 : i32
    %c0_i32_0 = arith.constant 0 : i32
    %c0_i32_1 = arith.constant 0 : i32
    %c0_i32_2 = arith.constant 0 : i32
    return %c0_i32, %c0_i32_0, %c0_i32_1 : i32, i32, i32
  }
  func.func @transform_2(%arg0: i32) -> (i32, i32, i32) {
    %c0_i32 = arith.constant 0 : i32
    %c0_i32_0 = arith.constant 0 : i32
    %c0_i32_1 = arith.constant 0 : i32
    return %arg0, %c0_i32, %c0_i32_0 : i32, i32, i32
  }
  func.func @transform_3(%arg0: i32) -> (i32, i32, i32) {
    %c0_i32 = arith.constant 0 : i32
    %c0_i32_0 = arith.constant 0 : i32
    %c0_i32_1 = arith.constant 0 : i32
    return %arg0, %c0_i32, %c0_i32_0 : i32, i32, i32
  }
  func.func @transform_4(%arg0: i32) -> (i32, i32, i32) {
    %c0_i32 = arith.constant 0 : i32
    %c0_i32_0 = arith.constant 0 : i32
    %c0_i32_1 = arith.constant 0 : i32
    return %arg0, %c0_i32, %c0_i32_0 : i32, i32, i32
  }
}

module attributes {stable_mosaic.version = 11 : i64} {
  func.func @_conv_tap_kernel(%arg0: i32, %arg1: memref<1x4x90x128xf32, #tpu.memory_space<vmem>>, %arg2: memref<9x128x128xbf16, #tpu.memory_space<vmem>>, %arg3: memref<1x72x128xf32, #tpu.memory_space<vmem>>, %arg4: memref<1x1x128xf32, #tpu.memory_space<vmem>>, %arg5: memref<1x1x128xf32, #tpu.memory_space<vmem>>, %arg6: memref<72x128xf32, #tpu.memory_space<vmem>>) attributes {dimension_semantics = [#tpu.dimension_semantics<parallel>], iteration_bounds = array<i64: 2>, scalar_prefetch = 0 : i64, scratch_operands = 1 : i64, tpu.core_type = #tpu.core_type<tc>, window_params = [{transform_indices = @transform_0, window_bounds = array<i64: 1, 4, 90, 128>}, {pipeline_mode = #tpu.pipeline_mode<synchronous>, transform_indices = @transform_1, window_bounds = array<i64: 9, 128, 128>}, {transform_indices = @transform_2, window_bounds = array<i64: 1, 72, 128>}, {transform_indices = @transform_3, window_bounds = array<i64: 1, 1, 128>}, {transform_indices = @transform_4, window_bounds = array<i64: 1, 1, 128>}]} {
    %cst = arith.constant 0.000000e+00 : f32
    %0 = vector.broadcast %cst : f32 to vector<72x128xf32>
    %c0 = arith.constant 0 : index
    %c0_0 = arith.constant 0 : index
    %1 = vector.load %arg6[%c0, %c0_0] : memref<72x128xf32, #tpu.memory_space<vmem>>, vector<72x128xf32>
    tpu.vector_store %arg6[%c0, %c0_0], %0 {strides = array<i32>} : memref<72x128xf32, #tpu.memory_space<vmem>>, vector<72x128xf32>,
    %c0_1 = arith.constant 0 : index
    %c0_2 = arith.constant 0 : index
    %c0_3 = arith.constant 0 : index
    %c0_4 = arith.constant 0 : index
    %2 = vector.load %arg1[%c0_1, %c0_2, %c0_3, %c0_4] : memref<1x4x90x128xf32, #tpu.memory_space<vmem>>, vector<1x1x72x128xf32>
    %3 = vector.shape_cast %2 : vector<1x1x72x128xf32> to vector<72x128xf32>
    %4 = arith.truncf %3 : vector<72x128xf32> to vector<72x128xbf16>
    %c0_5 = arith.constant 0 : index
    %c0_6 = arith.constant 0 : index
    %5 = vector.load %arg6[%c0_5, %c0_6] : memref<72x128xf32, #tpu.memory_space<vmem>>, vector<72x128xf32>
    %c0_7 = arith.constant 0 : index
    %c0_8 = arith.constant 0 : index
    %c0_9 = arith.constant 0 : index
    %6 = vector.load %arg2[%c0_7, %c0_8, %c0_9] : memref<9x128x128xbf16, #tpu.memory_space<vmem>>, vector<1x128x128xbf16>
    %7 = vector.shape_cast %6 : vector<1x128x128xbf16> to vector<128x128xbf16>
    %cst_10 = arith.constant dense<0.000000e+00> : vector<72x128xf32>
    %8 = tpu.matmul %4, %7, %cst_10 {dimension_numbers = #tpu.dot_dimension_numbers<[1], [0], [0], [1], [0, 0, 1, 1], [], []>} : vector<72x128xbf16>, vector<128x128xbf16>, vector<72x128xf32> -> vector<72x128xf32>
    %9 = arith.addf %5, %8 : vector<72x128xf32>
    %c0_11 = arith.constant 0 : index
    %c0_12 = arith.constant 0 : index
    %10 = vector.load %arg6[%c0_11, %c0_12] : memref<72x128xf32, #tpu.memory_space<vmem>>, vector<72x128xf32>
    tpu.vector_store %arg6[%c0_11, %c0_12], %9 {strides = array<i32>} : memref<72x128xf32, #tpu.memory_space<vmem>>, vector<72x128xf32>,
    %c0_13 = arith.constant 0 : index
    %c1 = arith.constant 1 : index
    %c0_14 = arith.constant 0 : index
    %c0_15 = arith.constant 0 : index
    %11 = vector.load %arg1[%c0_13, %c1, %c0_14, %c0_15] : memref<1x4x90x128xf32, #tpu.memory_space<vmem>>, vector<1x1x72x128xf32>
    %12 = vector.shape_cast %11 : vector<1x1x72x128xf32> to vector<72x128xf32>
    %13 = arith.truncf %12 : vector<72x128xf32> to vector<72x128xbf16>
    %c0_16 = arith.constant 0 : index
    %c0_17 = arith.constant 0 : index
    %14 = vector.load %arg6[%c0_16, %c0_17] : memref<72x128xf32, #tpu.memory_space<vmem>>, vector<72x128xf32>
    %c1_18 = arith.constant 1 : index
    %c0_19 = arith.constant 0 : index
    %c0_20 = arith.constant 0 : index
    %15 = vector.load %arg2[%c1_18, %c0_19, %c0_20] : memref<9x128x128xbf16, #tpu.memory_space<vmem>>, vector<1x128x128xbf16>
    %16 = vector.shape_cast %15 : vector<1x128x128xbf16> to vector<128x128xbf16>
    %cst_21 = arith.constant dense<0.000000e+00> : vector<72x128xf32>
    %17 = tpu.matmul %13, %16, %cst_21 {dimension_numbers = #tpu.dot_dimension_numbers<[1], [0], [0], [1], [0, 0, 1, 1], [], []>} : vector<72x128xbf16>, vector<128x128xbf16>, vector<72x128xf32> -> vector<72x128xf32>
    %18 = arith.addf %14, %17 : vector<72x128xf32>
    %c0_22 = arith.constant 0 : index
    %c0_23 = arith.constant 0 : index
    %19 = vector.load %arg6[%c0_22, %c0_23] : memref<72x128xf32, #tpu.memory_space<vmem>>, vector<72x128xf32>
    tpu.vector_store %arg6[%c0_22, %c0_23], %18 {strides = array<i32>} : memref<72x128xf32, #tpu.memory_space<vmem>>, vector<72x128xf32>,
    %c0_24 = arith.constant 0 : index
    %c0_25 = arith.constant 0 : index
    %c1_26 = arith.constant 1 : index
    %c0_27 = arith.constant 0 : index
    %20 = vector.load %arg1[%c0_24, %c0_25, %c1_26, %c0_27] : memref<1x4x90x128xf32, #tpu.memory_space<vmem>>, vector<1x1x72x128xf32>
    %21 = vector.shape_cast %20 : vector<1x1x72x128xf32> to vector<72x128xf32>
    %22 = arith.truncf %21 : vector<72x128xf32> to vector<72x128xbf16>
    %c0_28 = arith.constant 0 : index
    %c0_29 = arith.constant 0 : index
    %23 = vector.load %arg6[%c0_28, %c0_29] : memref<72x128xf32, #tpu.memory_space<vmem>>, vector<72x128xf32>
    %c2 = arith.constant 2 : index
    %c0_30 = arith.constant 0 : index
    %c0_31 = arith.constant 0 : index
    %24 = vector.load %arg2[%c2, %c0_30, %c0_31] : memref<9x128x128xbf16, #tpu.memory_space<vmem>>, vector<1x128x128xbf16>
    %25 = vector.shape_cast %24 : vector<1x128x128xbf16> to vector<128x128xbf16>
    %cst_32 = arith.constant dense<0.000000e+00> : vector<72x128xf32>
    %26 = tpu.matmul %22, %25, %cst_32 {dimension_numbers = #tpu.dot_dimension_numbers<[1], [0], [0], [1], [0, 0, 1, 1], [], []>} : vector<72x128xbf16>, vector<128x128xbf16>, vector<72x128xf32> -> vector<72x128xf32>
    %27 = arith.addf %23, %26 : vector<72x128xf32>
    %c0_33 = arith.constant 0 : index
    %c0_34 = arith.constant 0 : index
    %28 = vector.load %arg6[%c0_33, %c0_34] : memref<72x128xf32, #tpu.memory_space<vmem>>, vector<72x128xf32>
    tpu.vector_store %arg6[%c0_33, %c0_34], %27 {strides = array<i32>} : memref<72x128xf32, #tpu.memory_space<vmem>>, vector<72x128xf32>,
    %c0_35 = arith.constant 0 : index
    %c2_36 = arith.constant 2 : index
    %c0_37 = arith.constant 0 : index
    %c0_38 = arith.constant 0 : index
    %29 = vector.load %arg1[%c0_35, %c2_36, %c0_37, %c0_38] : memref<1x4x90x128xf32, #tpu.memory_space<vmem>>, vector<1x1x72x128xf32>
    %30 = vector.shape_cast %29 : vector<1x1x72x128xf32> to vector<72x128xf32>
    %31 = arith.truncf %30 : vector<72x128xf32> to vector<72x128xbf16>
    %c0_39 = arith.constant 0 : index
    %c0_40 = arith.constant 0 : index
    %32 = vector.load %arg6[%c0_39, %c0_40] : memref<72x128xf32, #tpu.memory_space<vmem>>, vector<72x128xf32>
    %c3 = arith.constant 3 : index
    %c0_41 = arith.constant 0 : index
    %c0_42 = arith.constant 0 : index
    %33 = vector.load %arg2[%c3, %c0_41, %c0_42] : memref<9x128x128xbf16, #tpu.memory_space<vmem>>, vector<1x128x128xbf16>
    %34 = vector.shape_cast %33 : vector<1x128x128xbf16> to vector<128x128xbf16>
    %cst_43 = arith.constant dense<0.000000e+00> : vector<72x128xf32>
    %35 = tpu.matmul %31, %34, %cst_43 {dimension_numbers = #tpu.dot_dimension_numbers<[1], [0], [0], [1], [0, 0, 1, 1], [], []>} : vector<72x128xbf16>, vector<128x128xbf16>, vector<72x128xf32> -> vector<72x128xf32>
    %36 = arith.addf %32, %35 : vector<72x128xf32>
    %c0_44 = arith.constant 0 : index
    %c0_45 = arith.constant 0 : index
    %37 = vector.load %arg6[%c0_44, %c0_45] : memref<72x128xf32, #tpu.memory_space<vmem>>, vector<72x128xf32>
    tpu.vector_store %arg6[%c0_44, %c0_45], %36 {strides = array<i32>} : memref<72x128xf32, #tpu.memory_space<vmem>>, vector<72x128xf32>,
    %c0_46 = arith.constant 0 : index
    %c3_47 = arith.constant 3 : index
    %c0_48 = arith.constant 0 : index
    %c0_49 = arith.constant 0 : index
    %38 = vector.load %arg1[%c0_46, %c3_47, %c0_48, %c0_49] : memref<1x4x90x128xf32, #tpu.memory_space<vmem>>, vector<1x1x72x128xf32>
    %39 = vector.shape_cast %38 : vector<1x1x72x128xf32> to vector<72x128xf32>
    %40 = arith.truncf %39 : vector<72x128xf32> to vector<72x128xbf16>
    %c0_50 = arith.constant 0 : index
    %c0_51 = arith.constant 0 : index
    %41 = vector.load %arg6[%c0_50, %c0_51] : memref<72x128xf32, #tpu.memory_space<vmem>>, vector<72x128xf32>
    %c4 = arith.constant 4 : index
    %c0_52 = arith.constant 0 : index
    %c0_53 = arith.constant 0 : index
    %42 = vector.load %arg2[%c4, %c0_52, %c0_53] : memref<9x128x128xbf16, #tpu.memory_space<vmem>>, vector<1x128x128xbf16>
    %43 = vector.shape_cast %42 : vector<1x128x128xbf16> to vector<128x128xbf16>
    %cst_54 = arith.constant dense<0.000000e+00> : vector<72x128xf32>
    %44 = tpu.matmul %40, %43, %cst_54 {dimension_numbers = #tpu.dot_dimension_numbers<[1], [0], [0], [1], [0, 0, 1, 1], [], []>} : vector<72x128xbf16>, vector<128x128xbf16>, vector<72x128xf32> -> vector<72x128xf32>
    %45 = arith.addf %41, %44 : vector<72x128xf32>
    %c0_55 = arith.constant 0 : index
    %c0_56 = arith.constant 0 : index
    %46 = vector.load %arg6[%c0_55, %c0_56] : memref<72x128xf32, #tpu.memory_space<vmem>>, vector<72x128xf32>
    tpu.vector_store %arg6[%c0_55, %c0_56], %45 {strides = array<i32>} : memref<72x128xf32, #tpu.memory_space<vmem>>, vector<72x128xf32>,
    %c0_57 = arith.constant 0 : index
    %c2_58 = arith.constant 2 : index
    %c1_59 = arith.constant 1 : index
    %c0_60 = arith.constant 0 : index
    %47 = vector.load %arg1[%c0_57, %c2_58, %c1_59, %c0_60] : memref<1x4x90x128xf32, #tpu.memory_space<vmem>>, vector<1x1x72x128xf32>
    %48 = vector.shape_cast %47 : vector<1x1x72x128xf32> to vector<72x128xf32>
    %49 = arith.truncf %48 : vector<72x128xf32> to vector<72x128xbf16>
    %c0_61 = arith.constant 0 : index
    %c0_62 = arith.constant 0 : index
    %50 = vector.load %arg6[%c0_61, %c0_62] : memref<72x128xf32, #tpu.memory_space<vmem>>, vector<72x128xf32>
    %c5 = arith.constant 5 : index
    %c0_63 = arith.constant 0 : index
    %c0_64 = arith.constant 0 : index
    %51 = vector.load %arg2[%c5, %c0_63, %c0_64] : memref<9x128x128xbf16, #tpu.memory_space<vmem>>, vector<1x128x128xbf16>
    %52 = vector.shape_cast %51 : vector<1x128x128xbf16> to vector<128x128xbf16>
    %cst_65 = arith.constant dense<0.000000e+00> : vector<72x128xf32>
    %53 = tpu.matmul %49, %52, %cst_65 {dimension_numbers = #tpu.dot_dimension_numbers<[1], [0], [0], [1], [0, 0, 1, 1], [], []>} : vector<72x128xbf16>, vector<128x128xbf16>, vector<72x128xf32> -> vector<72x128xf32>
    %54 = arith.addf %50, %53 : vector<72x128xf32>
    %c0_66 = arith.constant 0 : index
    %c0_67 = arith.constant 0 : index
    %55 = vector.load %arg6[%c0_66, %c0_67] : memref<72x128xf32, #tpu.memory_space<vmem>>, vector<72x128xf32>
    tpu.vector_store %arg6[%c0_66, %c0_67], %54 {strides = array<i32>} : memref<72x128xf32, #tpu.memory_space<vmem>>, vector<72x128xf32>,
    %c0_68 = arith.constant 0 : index
    %c0_69 = arith.constant 0 : index
    %c9 = arith.constant 9 : index
    %c0_70 = arith.constant 0 : index
    %56 = vector.load %arg1[%c0_68, %c0_69, %c9, %c0_70] : memref<1x4x90x128xf32, #tpu.memory_space<vmem>>, vector<1x1x72x128xf32>
    %57 = vector.shape_cast %56 : vector<1x1x72x128xf32> to vector<72x128xf32>
    %58 = arith.truncf %57 : vector<72x128xf32> to vector<72x128xbf16>
    %c0_71 = arith.constant 0 : index
    %c0_72 = arith.constant 0 : index
    %59 = vector.load %arg6[%c0_71, %c0_72] : memref<72x128xf32, #tpu.memory_space<vmem>>, vector<72x128xf32>
    %c6 = arith.constant 6 : index
    %c0_73 = arith.constant 0 : index
    %c0_74 = arith.constant 0 : index
    %60 = vector.load %arg2[%c6, %c0_73, %c0_74] : memref<9x128x128xbf16, #tpu.memory_space<vmem>>, vector<1x128x128xbf16>
    %61 = vector.shape_cast %60 : vector<1x128x128xbf16> to vector<128x128xbf16>
    %cst_75 = arith.constant dense<0.000000e+00> : vector<72x128xf32>
    %62 = tpu.matmul %58, %61, %cst_75 {dimension_numbers = #tpu.dot_dimension_numbers<[1], [0], [0], [1], [0, 0, 1, 1], [], []>} : vector<72x128xbf16>, vector<128x128xbf16>, vector<72x128xf32> -> vector<72x128xf32>
    %63 = arith.addf %59, %62 : vector<72x128xf32>
    %c0_76 = arith.constant 0 : index
    %c0_77 = arith.constant 0 : index
    %64 = vector.load %arg6[%c0_76, %c0_77] : memref<72x128xf32, #tpu.memory_space<vmem>>, vector<72x128xf32>
    tpu.vector_store %arg6[%c0_76, %c0_77], %63 {strides = array<i32>} : memref<72x128xf32, #tpu.memory_space<vmem>>, vector<72x128xf32>,
    %c0_78 = arith.constant 0 : index
    %c1_79 = arith.constant 1 : index
    %c9_80 = arith.constant 9 : index
    %c0_81 = arith.constant 0 : index
    %65 = vector.load %arg1[%c0_78, %c1_79, %c9_80, %c0_81] : memref<1x4x90x128xf32, #tpu.memory_space<vmem>>, vector<1x1x72x128xf32>
    %66 = vector.shape_cast %65 : vector<1x1x72x128xf32> to vector<72x128xf32>
    %67 = arith.truncf %66 : vector<72x128xf32> to vector<72x128xbf16>
    %c0_82 = arith.constant 0 : index
    %c0_83 = arith.constant 0 : index
    %68 = vector.load %arg6[%c0_82, %c0_83] : memref<72x128xf32, #tpu.memory_space<vmem>>, vector<72x128xf32>
    %c7 = arith.constant 7 : index
    %c0_84 = arith.constant 0 : index
    %c0_85 = arith.constant 0 : index
    %69 = vector.load %arg2[%c7, %c0_84, %c0_85] : memref<9x128x128xbf16, #tpu.memory_space<vmem>>, vector<1x128x128xbf16>
    %70 = vector.shape_cast %69 : vector<1x128x128xbf16> to vector<128x128xbf16>
    %cst_86 = arith.constant dense<0.000000e+00> : vector<72x128xf32>
    %71 = tpu.matmul %67, %70, %cst_86 {dimension_numbers = #tpu.dot_dimension_numbers<[1], [0], [0], [1], [0, 0, 1, 1], [], []>} : vector<72x128xbf16>, vector<128x128xbf16>, vector<72x128xf32> -> vector<72x128xf32>
    %72 = arith.addf %68, %71 : vector<72x128xf32>
    %c0_87 = arith.constant 0 : index
    %c0_88 = arith.constant 0 : index
    %73 = vector.load %arg6[%c0_87, %c0_88] : memref<72x128xf32, #tpu.memory_space<vmem>>, vector<72x128xf32>
    tpu.vector_store %arg6[%c0_87, %c0_88], %72 {strides = array<i32>} : memref<72x128xf32, #tpu.memory_space<vmem>>, vector<72x128xf32>,
    %c0_89 = arith.constant 0 : index
    %c0_90 = arith.constant 0 : index
    %c10 = arith.constant 10 : index
    %c0_91 = arith.constant 0 : index
    %74 = vector.load %arg1[%c0_89, %c0_90, %c10, %c0_91] : memref<1x4x90x128xf32, #tpu.memory_space<vmem>>, vector<1x1x72x128xf32>
    %75 = vector.shape_cast %74 : vector<1x1x72x128xf32> to vector<72x128xf32>
    %76 = arith.truncf %75 : vector<72x128xf32> to vector<72x128xbf16>
    %c0_92 = arith.constant 0 : index
    %c0_93 = arith.constant 0 : index
    %77 = vector.load %arg6[%c0_92, %c0_93] : memref<72x128xf32, #tpu.memory_space<vmem>>, vector<72x128xf32>
    %c8 = arith.constant 8 : index
    %c0_94 = arith.constant 0 : index
    %c0_95 = arith.constant 0 : index
    %78 = vector.load %arg2[%c8, %c0_94, %c0_95] : memref<9x128x128xbf16, #tpu.memory_space<vmem>>, vector<1x128x128xbf16>
    %79 = vector.shape_cast %78 : vector<1x128x128xbf16> to vector<128x128xbf16>
    %cst_96 = arith.constant dense<0.000000e+00> : vector<72x128xf32>
    %80 = tpu.matmul %76, %79, %cst_96 {dimension_numbers = #tpu.dot_dimension_numbers<[1], [0], [0], [1], [0, 0, 1, 1], [], []>} : vector<72x128xbf16>, vector<128x128xbf16>, vector<72x128xf32> -> vector<72x128xf32>
    %81 = arith.addf %77, %80 : vector<72x128xf32>
    %c0_97 = arith.constant 0 : index
    %c0_98 = arith.constant 0 : index
    %82 = vector.load %arg6[%c0_97, %c0_98] : memref<72x128xf32, #tpu.memory_space<vmem>>, vector<72x128xf32>
    tpu.vector_store %arg6[%c0_97, %c0_98], %81 {strides = array<i32>} : memref<72x128xf32, #tpu.memory_space<vmem>>, vector<72x128xf32>,
    %c0_99 = arith.constant 0 : index
    %c0_100 = arith.constant 0 : index
    %83 = vector.load %arg6[%c0_99, %c0_100] : memref<72x128xf32, #tpu.memory_space<vmem>>, vector<72x128xf32>
    %c0_101 = arith.constant 0 : index
    %c0_102 = arith.constant 0 : index
    %c0_103 = arith.constant 0 : index
    %84 = vector.load %arg3[%c0_101, %c0_102, %c0_103] : memref<1x72x128xf32, #tpu.memory_space<vmem>>, vector<1x72x128xf32>
    %85 = vector.shape_cast %84 : vector<1x72x128xf32> to vector<72x128xf32>
    %86 = vector.shape_cast %83 : vector<72x128xf32> to vector<1x72x128xf32>
    tpu.vector_store %arg3[%c0_101, %c0_102, %c0_103], %86 {strides = array<i32>} : memref<1x72x128xf32, #tpu.memory_space<vmem>>, vector<1x72x128xf32>,
    %87 = tpu.iota {dimensions = array<i32: 0>} : vector<72x1xi32>
    %c9_i32 = arith.constant 9 : i32
    %c0_i32 = arith.constant 0 : i32
    %88 = arith.cmpi eq, %c9_i32, %c0_i32 : i32
    %c1_i32 = arith.constant 1 : i32
    %89 = arith.select %88, %c1_i32, %c9_i32 : i32
    %90 = vector.broadcast %89 : i32 to vector<72x1xi32>
    %91 = arith.remsi %87, %90 : vector<72x1xi32>
    %c0_i32_104 = arith.constant 0 : i32
    %92 = vector.broadcast %c0_i32_104 : i32 to vector<72x1xi32>
    %93 = arith.cmpi ne, %91, %92 : vector<72x1xi32>
    %c0_i32_105 = arith.constant 0 : i32
    %94 = vector.broadcast %c0_i32_105 : i32 to vector<72x1xi32>
    %95 = arith.cmpi slt, %91, %94 : vector<72x1xi32>
    %c0_i32_106 = arith.constant 0 : i32
    %96 = arith.cmpi slt, %89, %c0_i32_106 : i32
    %97 = vector.broadcast %96 : i1 to vector<72x1xi1>
    %98 = vector.broadcast %97 : vector<72x1xi1> to vector<72x1xi1>
    %99 = arith.xori %95, %98 : vector<72x1xi1>
    %100 = arith.andi %99, %93 : vector<72x1xi1>
    %101 = vector.broadcast %89 : i32 to vector<72x1xi32>
    %102 = arith.addi %91, %101 : vector<72x1xi32>
    %103 = arith.select %100, %102, %91 : vector<72x1xi1>, vector<72x1xi32>
    %c8_i32 = arith.constant 8 : i32
    %104 = vector.broadcast %c8_i32 : i32 to vector<72x1xi32>
    %105 = arith.cmpi slt, %103, %104 : vector<72x1xi32>
    %106 = arith.extui %105 : vector<72x1xi1> to vector<72x1xi32>
    %107 = arith.sitofp %106 : vector<72x1xi32> to vector<72x1xf32>
    %108 = vector.broadcast %107 : vector<72x1xf32> to vector<72x128xf32>
    %109 = arith.mulf %83, %108 : vector<72x128xf32>
    %cst_107 = arith.constant dense<0.000000e+00> : vector<128xf32>
    %110 = vector.multi_reduction <add>, %109, %cst_107 [0] : vector<72x128xf32> to vector<128xf32>
    %111 = vector.shape_cast %110 : vector<128xf32> to vector<1x128xf32>
    %c0_108 = arith.constant 0 : index
    %c0_109 = arith.constant 0 : index
    %c0_110 = arith.constant 0 : index
    %112 = vector.load %arg4[%c0_108, %c0_109, %c0_110] : memref<1x1x128xf32, #tpu.memory_space<vmem>>, vector<1x1x128xf32>
    %113 = vector.shape_cast %112 : vector<1x1x128xf32> to vector<1x128xf32>
    %114 = vector.shape_cast %111 : vector<1x128xf32> to vector<1x1x128xf32>
    tpu.vector_store %arg4[%c0_108, %c0_109, %c0_110], %114 {strides = array<i32>} : memref<1x1x128xf32, #tpu.memory_space<vmem>>, vector<1x1x128xf32>,
    %115 = arith.mulf %83, %109 : vector<72x128xf32>
    %cst_111 = arith.constant dense<0.000000e+00> : vector<128xf32>
    %116 = vector.multi_reduction <add>, %115, %cst_111 [0] : vector<72x128xf32> to vector<128xf32>
    %117 = vector.shape_cast %116 : vector<128xf32> to vector<1x128xf32>
    %c0_112 = arith.constant 0 : index
    %c0_113 = arith.constant 0 : index
    %c0_114 = arith.constant 0 : index
    %118 = vector.load %arg5[%c0_112, %c0_113, %c0_114] : memref<1x1x128xf32, #tpu.memory_space<vmem>>, vector<1x1x128xf32>
    %119 = vector.shape_cast %118 : vector<1x1x128xf32> to vector<1x128xf32>
    %120 = vector.shape_cast %117 : vector<1x128xf32> to vector<1x1x128xf32>
    tpu.vector_store %arg5[%c0_112, %c0_113, %c0_114], %120 {strides = array<i32>} : memref<1x1x128xf32, #tpu.memory_space<vmem>>, vector<1x1x128xf32>,
    return
  }
  func.func @transform_0(%arg0: i32) -> (i32, i32, i32, i32) {
    %c0_i32 = arith.constant 0 : i32
    %c0_i32_0 = arith.constant 0 : i32
    %c0_i32_1 = arith.constant 0 : i32
    %c0_i32_2 = arith.constant 0 : i32
    return %arg0, %c0_i32, %c0_i32_0, %c0_i32_1 : i32, i32, i32, i32
  }
  func.func @transform_1(%arg0: i32) -> (i32, i32, i32) {
    %c0_i32 = arith.constant 0 : i32
    %c0_i32_0 = arith.constant 0 : i32
    %c0_i32_1 = arith.constant 0 : i32
    %c0_i32_2 = arith.constant 0 : i32
    return %c0_i32, %c0_i32_0, %c0_i32_1 : i32, i32, i32
  }
  func.func @transform_2(%arg0: i32) -> (i32, i32, i32) {
    %c0_i32 = arith.constant 0 : i32
    %c0_i32_0 = arith.constant 0 : i32
    %c0_i32_1 = arith.constant 0 : i32
    return %arg0, %c0_i32, %c0_i32_0 : i32, i32, i32
  }
  func.func @transform_3(%arg0: i32) -> (i32, i32, i32) {
    %c0_i32 = arith.constant 0 : i32
    %c0_i32_0 = arith.constant 0 : i32
    %c0_i32_1 = arith.constant 0 : i32
    return %arg0, %c0_i32, %c0_i32_0 : i32, i32, i32
  }
  func.func @transform_4(%arg0: i32) -> (i32, i32, i32) {
    %c0_i32 = arith.constant 0 : i32
    %c0_i32_0 = arith.constant 0 : i32
    %c0_i32_1 = arith.constant 0 : i32
    return %arg0, %c0_i32, %c0_i32_0 : i32, i32, i32
  }
}

module attributes {stable_mosaic.version = 11 : i64} {
  func.func @_bn_relu_kernel(%arg0: i32, %arg1: memref<72x128xf32, #tpu.memory_space<vmem>>, %arg2: memref<1x128xf32, #tpu.memory_space<vmem>>, %arg3: memref<1x128xf32, #tpu.memory_space<vmem>>, %arg4: memref<72x128xf32, #tpu.memory_space<vmem>>) attributes {dimension_semantics = [#tpu.dimension_semantics<parallel>], iteration_bounds = array<i64: 2>, scalar_prefetch = 0 : i64, scratch_operands = 0 : i64, tpu.core_type = #tpu.core_type<tc>, window_params = [{transform_indices = @transform_0, window_bounds = array<i64: 72, 128>}, {pipeline_mode = #tpu.pipeline_mode<synchronous>, transform_indices = @transform_1, window_bounds = array<i64: 1, 128>}, {pipeline_mode = #tpu.pipeline_mode<synchronous>, transform_indices = @transform_2, window_bounds = array<i64: 1, 128>}, {transform_indices = @transform_3, window_bounds = array<i64: 72, 128>}]} {
    %c0 = arith.constant 0 : index
    %c0_0 = arith.constant 0 : index
    %0 = vector.load %arg1[%c0, %c0_0] : memref<72x128xf32, #tpu.memory_space<vmem>>, vector<72x128xf32>
    %c0_1 = arith.constant 0 : index
    %c0_2 = arith.constant 0 : index
    %1 = vector.load %arg2[%c0_1, %c0_2] : memref<1x128xf32, #tpu.memory_space<vmem>>, vector<1x128xf32>
    %2 = vector.broadcast %1 : vector<1x128xf32> to vector<72x128xf32>
    %3 = arith.mulf %0, %2 : vector<72x128xf32>
    %c0_3 = arith.constant 0 : index
    %c0_4 = arith.constant 0 : index
    %4 = vector.load %arg3[%c0_3, %c0_4] : memref<1x128xf32, #tpu.memory_space<vmem>>, vector<1x128xf32>
    %5 = vector.broadcast %4 : vector<1x128xf32> to vector<72x128xf32>
    %6 = arith.addf %3, %5 : vector<72x128xf32>
    %cst = arith.constant 0.000000e+00 : f32
    %7 = vector.broadcast %cst : f32 to vector<72x128xf32>
    %8 = arith.maximumf %6, %7 : vector<72x128xf32>
    %c0_5 = arith.constant 0 : index
    %c0_6 = arith.constant 0 : index
    %9 = vector.load %arg4[%c0_5, %c0_6] : memref<72x128xf32, #tpu.memory_space<vmem>>, vector<72x128xf32>
    tpu.vector_store %arg4[%c0_5, %c0_6], %8 {strides = array<i32>} : memref<72x128xf32, #tpu.memory_space<vmem>>, vector<72x128xf32>,
    return
  }
  func.func @transform_0(%arg0: i32) -> (i32, i32) {
    %c0_i32 = arith.constant 0 : i32
    %c0_i32_0 = arith.constant 0 : i32
    return %arg0, %c0_i32 : i32, i32
  }
  func.func @transform_1(%arg0: i32) -> (i32, i32) {
    %c0_i32 = arith.constant 0 : i32
    %c0_i32_0 = arith.constant 0 : i32
    %c0_i32_1 = arith.constant 0 : i32
    return %c0_i32, %c0_i32_0 : i32, i32
  }
  func.func @transform_2(%arg0: i32) -> (i32, i32) {
    %c0_i32 = arith.constant 0 : i32
    %c0_i32_0 = arith.constant 0 : i32
    %c0_i32_1 = arith.constant 0 : i32
    return %c0_i32, %c0_i32_0 : i32, i32
  }
  func.func @transform_3(%arg0: i32) -> (i32, i32) {
    %c0_i32 = arith.constant 0 : i32
    %c0_i32_0 = arith.constant 0 : i32
    return %arg0, %c0_i32 : i32, i32
  }
}

module attributes {stable_mosaic.version = 11 : i64} {
  func.func @_conv_tap_kernel(%arg0: i32, %arg1: memref<1x1x110x128xf32, #tpu.memory_space<vmem>>, %arg2: memref<9x128x128xbf16, #tpu.memory_space<vmem>>, %arg3: memref<1x80x128xf32, #tpu.memory_space<vmem>>, %arg4: memref<1x1x128xf32, #tpu.memory_space<vmem>>, %arg5: memref<1x1x128xf32, #tpu.memory_space<vmem>>, %arg6: memref<80x128xf32, #tpu.memory_space<vmem>>) attributes {dimension_semantics = [#tpu.dimension_semantics<parallel>], iteration_bounds = array<i64: 2>, scalar_prefetch = 0 : i64, scratch_operands = 1 : i64, tpu.core_type = #tpu.core_type<tc>, window_params = [{transform_indices = @transform_0, window_bounds = array<i64: 1, 1, 110, 128>}, {pipeline_mode = #tpu.pipeline_mode<synchronous>, transform_indices = @transform_1, window_bounds = array<i64: 9, 128, 128>}, {transform_indices = @transform_2, window_bounds = array<i64: 1, 80, 128>}, {transform_indices = @transform_3, window_bounds = array<i64: 1, 1, 128>}, {transform_indices = @transform_4, window_bounds = array<i64: 1, 1, 128>}]} {
    %cst = arith.constant 0.000000e+00 : f32
    %0 = vector.broadcast %cst : f32 to vector<80x128xf32>
    %c0 = arith.constant 0 : index
    %c0_0 = arith.constant 0 : index
    %1 = vector.load %arg6[%c0, %c0_0] : memref<80x128xf32, #tpu.memory_space<vmem>>, vector<80x128xf32>
    tpu.vector_store %arg6[%c0, %c0_0], %0 {strides = array<i32>} : memref<80x128xf32, #tpu.memory_space<vmem>>, vector<80x128xf32>,
    %c0_1 = arith.constant 0 : index
    %c0_2 = arith.constant 0 : index
    %c0_3 = arith.constant 0 : index
    %c0_4 = arith.constant 0 : index
    %2 = vector.load %arg1[%c0_1, %c0_2, %c0_3, %c0_4] : memref<1x1x110x128xf32, #tpu.memory_space<vmem>>, vector<1x1x80x128xf32>
    %3 = vector.shape_cast %2 : vector<1x1x80x128xf32> to vector<80x128xf32>
    %4 = arith.truncf %3 : vector<80x128xf32> to vector<80x128xbf16>
    %c0_5 = arith.constant 0 : index
    %c0_6 = arith.constant 0 : index
    %5 = vector.load %arg6[%c0_5, %c0_6] : memref<80x128xf32, #tpu.memory_space<vmem>>, vector<80x128xf32>
    %c0_7 = arith.constant 0 : index
    %c0_8 = arith.constant 0 : index
    %c0_9 = arith.constant 0 : index
    %6 = vector.load %arg2[%c0_7, %c0_8, %c0_9] : memref<9x128x128xbf16, #tpu.memory_space<vmem>>, vector<1x128x128xbf16>
    %7 = vector.shape_cast %6 : vector<1x128x128xbf16> to vector<128x128xbf16>
    %cst_10 = arith.constant dense<0.000000e+00> : vector<80x128xf32>
    %8 = tpu.matmul %4, %7, %cst_10 {dimension_numbers = #tpu.dot_dimension_numbers<[1], [0], [0], [1], [0, 0, 1, 1], [], []>} : vector<80x128xbf16>, vector<128x128xbf16>, vector<80x128xf32> -> vector<80x128xf32>
    %9 = arith.addf %5, %8 : vector<80x128xf32>
    %c0_11 = arith.constant 0 : index
    %c0_12 = arith.constant 0 : index
    %10 = vector.load %arg6[%c0_11, %c0_12] : memref<80x128xf32, #tpu.memory_space<vmem>>, vector<80x128xf32>
    tpu.vector_store %arg6[%c0_11, %c0_12], %9 {strides = array<i32>} : memref<80x128xf32, #tpu.memory_space<vmem>>, vector<80x128xf32>,
    %c0_13 = arith.constant 0 : index
    %c0_14 = arith.constant 0 : index
    %c1 = arith.constant 1 : index
    %c0_15 = arith.constant 0 : index
    %11 = vector.load %arg1[%c0_13, %c0_14, %c1, %c0_15] : memref<1x1x110x128xf32, #tpu.memory_space<vmem>>, vector<1x1x80x128xf32>
    %12 = vector.shape_cast %11 : vector<1x1x80x128xf32> to vector<80x128xf32>
    %13 = arith.truncf %12 : vector<80x128xf32> to vector<80x128xbf16>
    %c0_16 = arith.constant 0 : index
    %c0_17 = arith.constant 0 : index
    %14 = vector.load %arg6[%c0_16, %c0_17] : memref<80x128xf32, #tpu.memory_space<vmem>>, vector<80x128xf32>
    %c1_18 = arith.constant 1 : index
    %c0_19 = arith.constant 0 : index
    %c0_20 = arith.constant 0 : index
    %15 = vector.load %arg2[%c1_18, %c0_19, %c0_20] : memref<9x128x128xbf16, #tpu.memory_space<vmem>>, vector<1x128x128xbf16>
    %16 = vector.shape_cast %15 : vector<1x128x128xbf16> to vector<128x128xbf16>
    %cst_21 = arith.constant dense<0.000000e+00> : vector<80x128xf32>
    %17 = tpu.matmul %13, %16, %cst_21 {dimension_numbers = #tpu.dot_dimension_numbers<[1], [0], [0], [1], [0, 0, 1, 1], [], []>} : vector<80x128xbf16>, vector<128x128xbf16>, vector<80x128xf32> -> vector<80x128xf32>
    %18 = arith.addf %14, %17 : vector<80x128xf32>
    %c0_22 = arith.constant 0 : index
    %c0_23 = arith.constant 0 : index
    %19 = vector.load %arg6[%c0_22, %c0_23] : memref<80x128xf32, #tpu.memory_space<vmem>>, vector<80x128xf32>
    tpu.vector_store %arg6[%c0_22, %c0_23], %18 {strides = array<i32>} : memref<80x128xf32, #tpu.memory_space<vmem>>, vector<80x128xf32>,
    %c0_24 = arith.constant 0 : index
    %c0_25 = arith.constant 0 : index
    %c2 = arith.constant 2 : index
    %c0_26 = arith.constant 0 : index
    %20 = vector.load %arg1[%c0_24, %c0_25, %c2, %c0_26] : memref<1x1x110x128xf32, #tpu.memory_space<vmem>>, vector<1x1x80x128xf32>
    %21 = vector.shape_cast %20 : vector<1x1x80x128xf32> to vector<80x128xf32>
    %22 = arith.truncf %21 : vector<80x128xf32> to vector<80x128xbf16>
    %c0_27 = arith.constant 0 : index
    %c0_28 = arith.constant 0 : index
    %23 = vector.load %arg6[%c0_27, %c0_28] : memref<80x128xf32, #tpu.memory_space<vmem>>, vector<80x128xf32>
    %c2_29 = arith.constant 2 : index
    %c0_30 = arith.constant 0 : index
    %c0_31 = arith.constant 0 : index
    %24 = vector.load %arg2[%c2_29, %c0_30, %c0_31] : memref<9x128x128xbf16, #tpu.memory_space<vmem>>, vector<1x128x128xbf16>
    %25 = vector.shape_cast %24 : vector<1x128x128xbf16> to vector<128x128xbf16>
    %cst_32 = arith.constant dense<0.000000e+00> : vector<80x128xf32>
    %26 = tpu.matmul %22, %25, %cst_32 {dimension_numbers = #tpu.dot_dimension_numbers<[1], [0], [0], [1], [0, 0, 1, 1], [], []>} : vector<80x128xbf16>, vector<128x128xbf16>, vector<80x128xf32> -> vector<80x128xf32>
    %27 = arith.addf %23, %26 : vector<80x128xf32>
    %c0_33 = arith.constant 0 : index
    %c0_34 = arith.constant 0 : index
    %28 = vector.load %arg6[%c0_33, %c0_34] : memref<80x128xf32, #tpu.memory_space<vmem>>, vector<80x128xf32>
    tpu.vector_store %arg6[%c0_33, %c0_34], %27 {strides = array<i32>} : memref<80x128xf32, #tpu.memory_space<vmem>>, vector<80x128xf32>,
    %c0_35 = arith.constant 0 : index
    %c0_36 = arith.constant 0 : index
    %c10 = arith.constant 10 : index
    %c0_37 = arith.constant 0 : index
    %29 = vector.load %arg1[%c0_35, %c0_36, %c10, %c0_37] : memref<1x1x110x128xf32, #tpu.memory_space<vmem>>, vector<1x1x80x128xf32>
    %30 = vector.shape_cast %29 : vector<1x1x80x128xf32> to vector<80x128xf32>
    %31 = arith.truncf %30 : vector<80x128xf32> to vector<80x128xbf16>
    %c0_38 = arith.constant 0 : index
    %c0_39 = arith.constant 0 : index
    %32 = vector.load %arg6[%c0_38, %c0_39] : memref<80x128xf32, #tpu.memory_space<vmem>>, vector<80x128xf32>
    %c3 = arith.constant 3 : index
    %c0_40 = arith.constant 0 : index
    %c0_41 = arith.constant 0 : index
    %33 = vector.load %arg2[%c3, %c0_40, %c0_41] : memref<9x128x128xbf16, #tpu.memory_space<vmem>>, vector<1x128x128xbf16>
    %34 = vector.shape_cast %33 : vector<1x128x128xbf16> to vector<128x128xbf16>
    %cst_42 = arith.constant dense<0.000000e+00> : vector<80x128xf32>
    %35 = tpu.matmul %31, %34, %cst_42 {dimension_numbers = #tpu.dot_dimension_numbers<[1], [0], [0], [1], [0, 0, 1, 1], [], []>} : vector<80x128xbf16>, vector<128x128xbf16>, vector<80x128xf32> -> vector<80x128xf32>
    %36 = arith.addf %32, %35 : vector<80x128xf32>
    %c0_43 = arith.constant 0 : index
    %c0_44 = arith.constant 0 : index
    %37 = vector.load %arg6[%c0_43, %c0_44] : memref<80x128xf32, #tpu.memory_space<vmem>>, vector<80x128xf32>
    tpu.vector_store %arg6[%c0_43, %c0_44], %36 {strides = array<i32>} : memref<80x128xf32, #tpu.memory_space<vmem>>, vector<80x128xf32>,
    %c0_45 = arith.constant 0 : index
    %c0_46 = arith.constant 0 : index
    %c11 = arith.constant 11 : index
    %c0_47 = arith.constant 0 : index
    %38 = vector.load %arg1[%c0_45, %c0_46, %c11, %c0_47] : memref<1x1x110x128xf32, #tpu.memory_space<vmem>>, vector<1x1x80x128xf32>
    %39 = vector.shape_cast %38 : vector<1x1x80x128xf32> to vector<80x128xf32>
    %40 = arith.truncf %39 : vector<80x128xf32> to vector<80x128xbf16>
    %c0_48 = arith.constant 0 : index
    %c0_49 = arith.constant 0 : index
    %41 = vector.load %arg6[%c0_48, %c0_49] : memref<80x128xf32, #tpu.memory_space<vmem>>, vector<80x128xf32>
    %c4 = arith.constant 4 : index
    %c0_50 = arith.constant 0 : index
    %c0_51 = arith.constant 0 : index
    %42 = vector.load %arg2[%c4, %c0_50, %c0_51] : memref<9x128x128xbf16, #tpu.memory_space<vmem>>, vector<1x128x128xbf16>
    %43 = vector.shape_cast %42 : vector<1x128x128xbf16> to vector<128x128xbf16>
    %cst_52 = arith.constant dense<0.000000e+00> : vector<80x128xf32>
    %44 = tpu.matmul %40, %43, %cst_52 {dimension_numbers = #tpu.dot_dimension_numbers<[1], [0], [0], [1], [0, 0, 1, 1], [], []>} : vector<80x128xbf16>, vector<128x128xbf16>, vector<80x128xf32> -> vector<80x128xf32>
    %45 = arith.addf %41, %44 : vector<80x128xf32>
    %c0_53 = arith.constant 0 : index
    %c0_54 = arith.constant 0 : index
    %46 = vector.load %arg6[%c0_53, %c0_54] : memref<80x128xf32, #tpu.memory_space<vmem>>, vector<80x128xf32>
    tpu.vector_store %arg6[%c0_53, %c0_54], %45 {strides = array<i32>} : memref<80x128xf32, #tpu.memory_space<vmem>>, vector<80x128xf32>,
    %c0_55 = arith.constant 0 : index
    %c0_56 = arith.constant 0 : index
    %c12 = arith.constant 12 : index
    %c0_57 = arith.constant 0 : index
    %47 = vector.load %arg1[%c0_55, %c0_56, %c12, %c0_57] : memref<1x1x110x128xf32, #tpu.memory_space<vmem>>, vector<1x1x80x128xf32>
    %48 = vector.shape_cast %47 : vector<1x1x80x128xf32> to vector<80x128xf32>
    %49 = arith.truncf %48 : vector<80x128xf32> to vector<80x128xbf16>
    %c0_58 = arith.constant 0 : index
    %c0_59 = arith.constant 0 : index
    %50 = vector.load %arg6[%c0_58, %c0_59] : memref<80x128xf32, #tpu.memory_space<vmem>>, vector<80x128xf32>
    %c5 = arith.constant 5 : index
    %c0_60 = arith.constant 0 : index
    %c0_61 = arith.constant 0 : index
    %51 = vector.load %arg2[%c5, %c0_60, %c0_61] : memref<9x128x128xbf16, #tpu.memory_space<vmem>>, vector<1x128x128xbf16>
    %52 = vector.shape_cast %51 : vector<1x128x128xbf16> to vector<128x128xbf16>
    %cst_62 = arith.constant dense<0.000000e+00> : vector<80x128xf32>
    %53 = tpu.matmul %49, %52, %cst_62 {dimension_numbers = #tpu.dot_dimension_numbers<[1], [0], [0], [1], [0, 0, 1, 1], [], []>} : vector<80x128xbf16>, vector<128x128xbf16>, vector<80x128xf32> -> vector<80x128xf32>
    %54 = arith.addf %50, %53 : vector<80x128xf32>
    %c0_63 = arith.constant 0 : index
    %c0_64 = arith.constant 0 : index
    %55 = vector.load %arg6[%c0_63, %c0_64] : memref<80x128xf32, #tpu.memory_space<vmem>>, vector<80x128xf32>
    tpu.vector_store %arg6[%c0_63, %c0_64], %54 {strides = array<i32>} : memref<80x128xf32, #tpu.memory_space<vmem>>, vector<80x128xf32>,
    %c0_65 = arith.constant 0 : index
    %c0_66 = arith.constant 0 : index
    %c20 = arith.constant 20 : index
    %c0_67 = arith.constant 0 : index
    %56 = vector.load %arg1[%c0_65, %c0_66, %c20, %c0_67] : memref<1x1x110x128xf32, #tpu.memory_space<vmem>>, vector<1x1x80x128xf32>
    %57 = vector.shape_cast %56 : vector<1x1x80x128xf32> to vector<80x128xf32>
    %58 = arith.truncf %57 : vector<80x128xf32> to vector<80x128xbf16>
    %c0_68 = arith.constant 0 : index
    %c0_69 = arith.constant 0 : index
    %59 = vector.load %arg6[%c0_68, %c0_69] : memref<80x128xf32, #tpu.memory_space<vmem>>, vector<80x128xf32>
    %c6 = arith.constant 6 : index
    %c0_70 = arith.constant 0 : index
    %c0_71 = arith.constant 0 : index
    %60 = vector.load %arg2[%c6, %c0_70, %c0_71] : memref<9x128x128xbf16, #tpu.memory_space<vmem>>, vector<1x128x128xbf16>
    %61 = vector.shape_cast %60 : vector<1x128x128xbf16> to vector<128x128xbf16>
    %cst_72 = arith.constant dense<0.000000e+00> : vector<80x128xf32>
    %62 = tpu.matmul %58, %61, %cst_72 {dimension_numbers = #tpu.dot_dimension_numbers<[1], [0], [0], [1], [0, 0, 1, 1], [], []>} : vector<80x128xbf16>, vector<128x128xbf16>, vector<80x128xf32> -> vector<80x128xf32>
    %63 = arith.addf %59, %62 : vector<80x128xf32>
    %c0_73 = arith.constant 0 : index
    %c0_74 = arith.constant 0 : index
    %64 = vector.load %arg6[%c0_73, %c0_74] : memref<80x128xf32, #tpu.memory_space<vmem>>, vector<80x128xf32>
    tpu.vector_store %arg6[%c0_73, %c0_74], %63 {strides = array<i32>} : memref<80x128xf32, #tpu.memory_space<vmem>>, vector<80x128xf32>,
    %c0_75 = arith.constant 0 : index
    %c0_76 = arith.constant 0 : index
    %c21 = arith.constant 21 : index
    %c0_77 = arith.constant 0 : index
    %65 = vector.load %arg1[%c0_75, %c0_76, %c21, %c0_77] : memref<1x1x110x128xf32, #tpu.memory_space<vmem>>, vector<1x1x80x128xf32>
    %66 = vector.shape_cast %65 : vector<1x1x80x128xf32> to vector<80x128xf32>
    %67 = arith.truncf %66 : vector<80x128xf32> to vector<80x128xbf16>
    %c0_78 = arith.constant 0 : index
    %c0_79 = arith.constant 0 : index
    %68 = vector.load %arg6[%c0_78, %c0_79] : memref<80x128xf32, #tpu.memory_space<vmem>>, vector<80x128xf32>
    %c7 = arith.constant 7 : index
    %c0_80 = arith.constant 0 : index
    %c0_81 = arith.constant 0 : index
    %69 = vector.load %arg2[%c7, %c0_80, %c0_81] : memref<9x128x128xbf16, #tpu.memory_space<vmem>>, vector<1x128x128xbf16>
    %70 = vector.shape_cast %69 : vector<1x128x128xbf16> to vector<128x128xbf16>
    %cst_82 = arith.constant dense<0.000000e+00> : vector<80x128xf32>
    %71 = tpu.matmul %67, %70, %cst_82 {dimension_numbers = #tpu.dot_dimension_numbers<[1], [0], [0], [1], [0, 0, 1, 1], [], []>} : vector<80x128xbf16>, vector<128x128xbf16>, vector<80x128xf32> -> vector<80x128xf32>
    %72 = arith.addf %68, %71 : vector<80x128xf32>
    %c0_83 = arith.constant 0 : index
    %c0_84 = arith.constant 0 : index
    %73 = vector.load %arg6[%c0_83, %c0_84] : memref<80x128xf32, #tpu.memory_space<vmem>>, vector<80x128xf32>
    tpu.vector_store %arg6[%c0_83, %c0_84], %72 {strides = array<i32>} : memref<80x128xf32, #tpu.memory_space<vmem>>, vector<80x128xf32>,
    %c0_85 = arith.constant 0 : index
    %c0_86 = arith.constant 0 : index
    %c22 = arith.constant 22 : index
    %c0_87 = arith.constant 0 : index
    %74 = vector.load %arg1[%c0_85, %c0_86, %c22, %c0_87] : memref<1x1x110x128xf32, #tpu.memory_space<vmem>>, vector<1x1x80x128xf32>
    %75 = vector.shape_cast %74 : vector<1x1x80x128xf32> to vector<80x128xf32>
    %76 = arith.truncf %75 : vector<80x128xf32> to vector<80x128xbf16>
    %c0_88 = arith.constant 0 : index
    %c0_89 = arith.constant 0 : index
    %77 = vector.load %arg6[%c0_88, %c0_89] : memref<80x128xf32, #tpu.memory_space<vmem>>, vector<80x128xf32>
    %c8 = arith.constant 8 : index
    %c0_90 = arith.constant 0 : index
    %c0_91 = arith.constant 0 : index
    %78 = vector.load %arg2[%c8, %c0_90, %c0_91] : memref<9x128x128xbf16, #tpu.memory_space<vmem>>, vector<1x128x128xbf16>
    %79 = vector.shape_cast %78 : vector<1x128x128xbf16> to vector<128x128xbf16>
    %cst_92 = arith.constant dense<0.000000e+00> : vector<80x128xf32>
    %80 = tpu.matmul %76, %79, %cst_92 {dimension_numbers = #tpu.dot_dimension_numbers<[1], [0], [0], [1], [0, 0, 1, 1], [], []>} : vector<80x128xbf16>, vector<128x128xbf16>, vector<80x128xf32> -> vector<80x128xf32>
    %81 = arith.addf %77, %80 : vector<80x128xf32>
    %c0_93 = arith.constant 0 : index
    %c0_94 = arith.constant 0 : index
    %82 = vector.load %arg6[%c0_93, %c0_94] : memref<80x128xf32, #tpu.memory_space<vmem>>, vector<80x128xf32>
    tpu.vector_store %arg6[%c0_93, %c0_94], %81 {strides = array<i32>} : memref<80x128xf32, #tpu.memory_space<vmem>>, vector<80x128xf32>,
    %c0_95 = arith.constant 0 : index
    %c0_96 = arith.constant 0 : index
    %83 = vector.load %arg6[%c0_95, %c0_96] : memref<80x128xf32, #tpu.memory_space<vmem>>, vector<80x128xf32>
    %c0_97 = arith.constant 0 : index
    %c0_98 = arith.constant 0 : index
    %c0_99 = arith.constant 0 : index
    %84 = vector.load %arg3[%c0_97, %c0_98, %c0_99] : memref<1x80x128xf32, #tpu.memory_space<vmem>>, vector<1x80x128xf32>
    %85 = vector.shape_cast %84 : vector<1x80x128xf32> to vector<80x128xf32>
    %86 = vector.shape_cast %83 : vector<80x128xf32> to vector<1x80x128xf32>
    tpu.vector_store %arg3[%c0_97, %c0_98, %c0_99], %86 {strides = array<i32>} : memref<1x80x128xf32, #tpu.memory_space<vmem>>, vector<1x80x128xf32>,
    %87 = tpu.iota {dimensions = array<i32: 0>} : vector<80x1xi32>
    %c10_i32 = arith.constant 10 : i32
    %c0_i32 = arith.constant 0 : i32
    %88 = arith.cmpi eq, %c10_i32, %c0_i32 : i32
    %c1_i32 = arith.constant 1 : i32
    %89 = arith.select %88, %c1_i32, %c10_i32 : i32
    %90 = vector.broadcast %89 : i32 to vector<80x1xi32>
    %91 = arith.remsi %87, %90 : vector<80x1xi32>
    %c0_i32_100 = arith.constant 0 : i32
    %92 = vector.broadcast %c0_i32_100 : i32 to vector<80x1xi32>
    %93 = arith.cmpi ne, %91, %92 : vector<80x1xi32>
    %c0_i32_101 = arith.constant 0 : i32
    %94 = vector.broadcast %c0_i32_101 : i32 to vector<80x1xi32>
    %95 = arith.cmpi slt, %91, %94 : vector<80x1xi32>
    %c0_i32_102 = arith.constant 0 : i32
    %96 = arith.cmpi slt, %89, %c0_i32_102 : i32
    %97 = vector.broadcast %96 : i1 to vector<80x1xi1>
    %98 = vector.broadcast %97 : vector<80x1xi1> to vector<80x1xi1>
    %99 = arith.xori %95, %98 : vector<80x1xi1>
    %100 = arith.andi %99, %93 : vector<80x1xi1>
    %101 = vector.broadcast %89 : i32 to vector<80x1xi32>
    %102 = arith.addi %91, %101 : vector<80x1xi32>
    %103 = arith.select %100, %102, %91 : vector<80x1xi1>, vector<80x1xi32>
    %c8_i32 = arith.constant 8 : i32
    %104 = vector.broadcast %c8_i32 : i32 to vector<80x1xi32>
    %105 = arith.cmpi slt, %103, %104 : vector<80x1xi32>
    %106 = arith.extui %105 : vector<80x1xi1> to vector<80x1xi32>
    %107 = arith.sitofp %106 : vector<80x1xi32> to vector<80x1xf32>
    %108 = vector.broadcast %107 : vector<80x1xf32> to vector<80x128xf32>
    %109 = arith.mulf %83, %108 : vector<80x128xf32>
    %cst_103 = arith.constant dense<0.000000e+00> : vector<128xf32>
    %110 = vector.multi_reduction <add>, %109, %cst_103 [0] : vector<80x128xf32> to vector<128xf32>
    %111 = vector.shape_cast %110 : vector<128xf32> to vector<1x128xf32>
    %c0_104 = arith.constant 0 : index
    %c0_105 = arith.constant 0 : index
    %c0_106 = arith.constant 0 : index
    %112 = vector.load %arg4[%c0_104, %c0_105, %c0_106] : memref<1x1x128xf32, #tpu.memory_space<vmem>>, vector<1x1x128xf32>
    %113 = vector.shape_cast %112 : vector<1x1x128xf32> to vector<1x128xf32>
    %114 = vector.shape_cast %111 : vector<1x128xf32> to vector<1x1x128xf32>
    tpu.vector_store %arg4[%c0_104, %c0_105, %c0_106], %114 {strides = array<i32>} : memref<1x1x128xf32, #tpu.memory_space<vmem>>, vector<1x1x128xf32>,
    %115 = arith.mulf %83, %109 : vector<80x128xf32>
    %cst_107 = arith.constant dense<0.000000e+00> : vector<128xf32>
    %116 = vector.multi_reduction <add>, %115, %cst_107 [0] : vector<80x128xf32> to vector<128xf32>
    %117 = vector.shape_cast %116 : vector<128xf32> to vector<1x128xf32>
    %c0_108 = arith.constant 0 : index
    %c0_109 = arith.constant 0 : index
    %c0_110 = arith.constant 0 : index
    %118 = vector.load %arg5[%c0_108, %c0_109, %c0_110] : memref<1x1x128xf32, #tpu.memory_space<vmem>>, vector<1x1x128xf32>
    %119 = vector.shape_cast %118 : vector<1x1x128xf32> to vector<1x128xf32>
    %120 = vector.shape_cast %117 : vector<1x128xf32> to vector<1x1x128xf32>
    tpu.vector_store %arg5[%c0_108, %c0_109, %c0_110], %120 {strides = array<i32>} : memref<1x1x128xf32, #tpu.memory_space<vmem>>, vector<1x1x128xf32>,
    return
  }
  func.func @transform_0(%arg0: i32) -> (i32, i32, i32, i32) {
    %c0_i32 = arith.constant 0 : i32
    %c0_i32_0 = arith.constant 0 : i32
    %c0_i32_1 = arith.constant 0 : i32
    %c0_i32_2 = arith.constant 0 : i32
    return %arg0, %c0_i32, %c0_i32_0, %c0_i32_1 : i32, i32, i32, i32
  }
  func.func @transform_1(%arg0: i32) -> (i32, i32, i32) {
    %c0_i32 = arith.constant 0 : i32
    %c0_i32_0 = arith.constant 0 : i32
    %c0_i32_1 = arith.constant 0 : i32
    %c0_i32_2 = arith.constant 0 : i32
    return %c0_i32, %c0_i32_0, %c0_i32_1 : i32, i32, i32
  }
  func.func @transform_2(%arg0: i32) -> (i32, i32, i32) {
    %c0_i32 = arith.constant 0 : i32
    %c0_i32_0 = arith.constant 0 : i32
    %c0_i32_1 = arith.constant 0 : i32
    return %arg0, %c0_i32, %c0_i32_0 : i32, i32, i32
  }
  func.func @transform_3(%arg0: i32) -> (i32, i32, i32) {
    %c0_i32 = arith.constant 0 : i32
    %c0_i32_0 = arith.constant 0 : i32
    %c0_i32_1 = arith.constant 0 : i32
    return %arg0, %c0_i32, %c0_i32_0 : i32, i32, i32
  }
  func.func @transform_4(%arg0: i32) -> (i32, i32, i32) {
    %c0_i32 = arith.constant 0 : i32
    %c0_i32_0 = arith.constant 0 : i32
    %c0_i32_1 = arith.constant 0 : i32
    return %arg0, %c0_i32, %c0_i32_0 : i32, i32, i32
  }
}

module attributes {stable_mosaic.version = 11 : i64} {
  func.func @_bn_add_relu_kernel(%arg0: i32, %arg1: memref<80x128xf32, #tpu.memory_space<vmem>>, %arg2: memref<80x128xf32, #tpu.memory_space<vmem>>, %arg3: memref<1x128xf32, #tpu.memory_space<vmem>>, %arg4: memref<1x128xf32, #tpu.memory_space<vmem>>, %arg5: memref<1x128xf32, #tpu.memory_space<vmem>>, %arg6: memref<1x128xf32, #tpu.memory_space<vmem>>, %arg7: memref<80x128xf32, #tpu.memory_space<vmem>>) attributes {dimension_semantics = [#tpu.dimension_semantics<parallel>], iteration_bounds = array<i64: 2>, scalar_prefetch = 0 : i64, scratch_operands = 0 : i64, tpu.core_type = #tpu.core_type<tc>, window_params = [{transform_indices = @transform_0, window_bounds = array<i64: 80, 128>}, {transform_indices = @transform_1, window_bounds = array<i64: 80, 128>}, {pipeline_mode = #tpu.pipeline_mode<synchronous>, transform_indices = @transform_2, window_bounds = array<i64: 1, 128>}, {pipeline_mode = #tpu.pipeline_mode<synchronous>, transform_indices = @transform_3, window_bounds = array<i64: 1, 128>}, {pipeline_mode = #tpu.pipeline_mode<synchronous>, transform_indices = @transform_4, window_bounds = array<i64: 1, 128>}, {pipeline_mode = #tpu.pipeline_mode<synchronous>, transform_indices = @transform_5, window_bounds = array<i64: 1, 128>}, {transform_indices = @transform_6, window_bounds = array<i64: 80, 128>}]} {
    %c0 = arith.constant 0 : index
    %c0_0 = arith.constant 0 : index
    %0 = vector.load %arg1[%c0, %c0_0] : memref<80x128xf32, #tpu.memory_space<vmem>>, vector<80x128xf32>
    %c0_1 = arith.constant 0 : index
    %c0_2 = arith.constant 0 : index
    %1 = vector.load %arg3[%c0_1, %c0_2] : memref<1x128xf32, #tpu.memory_space<vmem>>, vector<1x128xf32>
    %2 = vector.broadcast %1 : vector<1x128xf32> to vector<80x128xf32>
    %3 = arith.mulf %0, %2 : vector<80x128xf32>
    %c0_3 = arith.constant 0 : index
    %c0_4 = arith.constant 0 : index
    %4 = vector.load %arg4[%c0_3, %c0_4] : memref<1x128xf32, #tpu.memory_space<vmem>>, vector<1x128xf32>
    %5 = vector.broadcast %4 : vector<1x128xf32> to vector<80x128xf32>
    %6 = arith.addf %3, %5 : vector<80x128xf32>
    %c0_5 = arith.constant 0 : index
    %c0_6 = arith.constant 0 : index
    %7 = vector.load %arg2[%c0_5, %c0_6] : memref<80x128xf32, #tpu.memory_space<vmem>>, vector<80x128xf32>
    %c0_7 = arith.constant 0 : index
    %c0_8 = arith.constant 0 : index
    %8 = vector.load %arg5[%c0_7, %c0_8] : memref<1x128xf32, #tpu.memory_space<vmem>>, vector<1x128xf32>
    %9 = vector.broadcast %8 : vector<1x128xf32> to vector<80x128xf32>
    %10 = arith.mulf %7, %9 : vector<80x128xf32>
    %11 = arith.addf %6, %10 : vector<80x128xf32>
    %c0_9 = arith.constant 0 : index
    %c0_10 = arith.constant 0 : index
    %12 = vector.load %arg6[%c0_9, %c0_10] : memref<1x128xf32, #tpu.memory_space<vmem>>, vector<1x128xf32>
    %13 = vector.broadcast %12 : vector<1x128xf32> to vector<80x128xf32>
    %14 = arith.addf %11, %13 : vector<80x128xf32>
    %cst = arith.constant 0.000000e+00 : f32
    %15 = vector.broadcast %cst : f32 to vector<80x128xf32>
    %16 = arith.maximumf %14, %15 : vector<80x128xf32>
    %c0_11 = arith.constant 0 : index
    %c0_12 = arith.constant 0 : index
    %17 = vector.load %arg7[%c0_11, %c0_12] : memref<80x128xf32, #tpu.memory_space<vmem>>, vector<80x128xf32>
    tpu.vector_store %arg7[%c0_11, %c0_12], %16 {strides = array<i32>} : memref<80x128xf32, #tpu.memory_space<vmem>>, vector<80x128xf32>,
    return
  }
  func.func @transform_0(%arg0: i32) -> (i32, i32) {
    %c0_i32 = arith.constant 0 : i32
    %c0_i32_0 = arith.constant 0 : i32
    return %arg0, %c0_i32 : i32, i32
  }
  func.func @transform_1(%arg0: i32) -> (i32, i32) {
    %c0_i32 = arith.constant 0 : i32
    %c0_i32_0 = arith.constant 0 : i32
    return %arg0, %c0_i32 : i32, i32
  }
  func.func @transform_2(%arg0: i32) -> (i32, i32) {
    %c0_i32 = arith.constant 0 : i32
    %c0_i32_0 = arith.constant 0 : i32
    %c0_i32_1 = arith.constant 0 : i32
    return %c0_i32, %c0_i32_0 : i32, i32
  }
  func.func @transform_3(%arg0: i32) -> (i32, i32) {
    %c0_i32 = arith.constant 0 : i32
    %c0_i32_0 = arith.constant 0 : i32
    %c0_i32_1 = arith.constant 0 : i32
    return %c0_i32, %c0_i32_0 : i32, i32
  }
  func.func @transform_4(%arg0: i32) -> (i32, i32) {
    %c0_i32 = arith.constant 0 : i32
    %c0_i32_0 = arith.constant 0 : i32
    %c0_i32_1 = arith.constant 0 : i32
    return %c0_i32, %c0_i32_0 : i32, i32
  }
  func.func @transform_5(%arg0: i32) -> (i32, i32) {
    %c0_i32 = arith.constant 0 : i32
    %c0_i32_0 = arith.constant 0 : i32
    %c0_i32_1 = arith.constant 0 : i32
    return %c0_i32, %c0_i32_0 : i32, i32
  }
  func.func @transform_6(%arg0: i32) -> (i32, i32) {
    %c0_i32 = arith.constant 0 : i32
    %c0_i32_0 = arith.constant 0 : i32
    return %arg0, %c0_i32 : i32, i32
  }
}

</mosaic_0001>

<bundles_post_ra>
// kernel: basic_block_forward.8
= control target key start
LH: loop header
LB: loop body
LE: loop exit
PB: predicated region body
PF: predicated region fallthrough
CT: control target
= control target key end

     0   :  { %s952_s15 = smov 0   ;;  %s1294_s0 = inlined_call_operand.vmem [shape: f32[2,1,80,128], index: 0, kind: input, shape index: {}]   ;;  %s1295_s1 = inlined_call_operand.vmem [shape: bf16[1,128,128], index: 1, kind: input, shape index: {}]   ;;  %s1296_s2 = inlined_call_operand.vmem [shape: f32[2,80,128], index: 2, kind: output, shape index: {0}]   ;;  %s1297_s3 = inlined_call_operand.vmem [shape: f32[2,1,128], index: 3, kind: output, shape index: {1}]   ;;  %s1298_s4 = inlined_call_operand.vmem [shape: f32[2,1,128], index: 4, kind: output, shape index: {2}]  }
   0x1 LB: > { %s786_s16 = sadd.s32 4294967295, %s923_s15   ;;  %p790_p0 = scmp.ge.s32.totalorder %s923_s15, 1  ;;  %s923_s15 = sphi %s952_s15, %s15_s15  }
   0x2   : > { %p167_p1 = scmp.lt.s32.totalorder %s923_s15, 3 }
   0x4   : > { %p168_p2 = pnand %p790_p0, %p167_p1 }
   0x5   : > { %p199_p3 = scmp.lt.s32.totalorder (!%p168_p2), %s786_s16, 1 }
   0x6   : > { %171 = sbr.rel (%p168_p2) target bundleno = 284 (0x11c), region = 28 }
   0xb   : > { %v909_v0 = vld [vmem:[%s1295_s1 + $0x38] sm:$0xff]   ;;  %v925_v1 = vmov 0.0   ;;  %v910_v2 = vld [vmem:[%s1295_s1 + $0x30] sm:$0xff]   ;;  %vm926_vm0 = vmmov 0   ;;  %v911_v3 = vld [vmem:[%s1295_s1 + $0x28] sm:$0xff]   ;;  %s1330_s16 = smov (!%p199_p3, %s786_s16), 1  ;;  %v428_v24 = vlaneseq }
   0xc   : > { %826 = vmatprep.subr.bf16.mxu0 %v925_v1  ;;  %862 = vmatprep.subr.bf16.mxu1 %v925_v1  ;;  %v912_v4 = vld [vmem:[%s1295_s1 + $0x20] sm:$0xff]   ;;  %v913_v5 = vld [vmem:[%s1295_s1 + $0x18] sm:$0xff]   ;;  %v914_v6 = vld [vmem:[%s1295_s1 + $0x10] sm:$0xff]   ;;  %s878_s29 = smul.u32 80, %s1330_s16  ;;  %s211_s18 = scalar_lea.vmem %s1297_s3, %s1330_s16 }
   0xd   : > { %827 = vmatpush3.bf16.msra.mxu0 %v909_v0  ;;  %870 = vmatpush3.bf16.msra.mxu1 %v909_v0  ;;  %v915_v7 = vld [vmem:[%s1295_s1 + $0x8] sm:$0xff]   ;;  %v916_v8 = vld [vmem:[%s1295_s1] sm:$0xff]   ;;  %v429_v25 = vshrl.u32 %v428_v24, 7  ;;  %s214_s21 = scalar_lea.vmem %s1298_s4, %s1330_s16 }
   0xe   : > { %828 = vmatprep.subr.bf16.mxu0 %v925_v1  ;;  %863 = vmatprep.subr.bf16.mxu1 %v925_v1  ;;  %s203_s8 = scalar_lea.vmem %s1294_s0, %s878_s29  ;;  %s1092_s13 = scalar_lea.vmem %s1296_s2, %s878_s29 }
   0xf   : > { %842 = vmatprep.mubr.msk.bf16.mxu0 %vm926_vm0, %v925_v1  ;;  %854 = vmatprep.mubr.msk.bf16.mxu1 %vm926_vm0, %v925_v1  ;;  %v226_v9 = vld [vmem:[%s203_s8] sm:$0xff]  ;;  %v227_v10 = vld [vmem:[%s203_s8 + $0x8] sm:$0xff]  ;;  %v232_v11 = vld [vmem:[%s203_s8 + $0x30] sm:$0xff]  ;;  %v430_v26 = vadd.s32 8, %v429_v25  ;;  %v431_v27 = vadd.s32 16, %v429_v25  ;;  %v432_v30 = vadd.s32 24, %v429_v25 }
  0x10   : > { %v233_v12 = vld [vmem:[%s203_s8 + $0x38] sm:$0xff]  ;;  %v236_v13 = vpack.c.bf16 %v227_v10, %v226_v9  ;;  %v228_v15 = vld [vmem:[%s203_s8 + $0x10] sm:$0xff]  ;;  %v234_v17 = vld [vmem:[%s203_s8 + $0x40] sm:$0xff]  ;;  %v1022_v28 = vmul.u32.u64.low 3435973837, %v429_v25  ;;  %v1023_v29 = vmul.u32.u64.high 3435973837, %v429_v25, %v1022_v28  ;;  %v433_v37 = vadd.s32 32, %v429_v25 }
  0x11   : > { %829 = vmatpush3.bf16.msra.mxu0 %v910_v2  ;;  %871 = vmatpush3.bf16.msra.mxu1 %v910_v2  ;;  %v239_v14 = vpack.c.bf16 %v233_v12, %v232_v11  ;;  %v229_v16 = vld [vmem:[%s203_s8 + $0x18] sm:$0xff]  ;;  %v235_v18 = vld [vmem:[%s203_s8 + $0x48] sm:$0xff]  ;;  %v230_v21 = vld [vmem:[%s203_s8 + $0x20] sm:$0xff]  ;;  %v1025_v31 = vmul.u32.u64.low 3435973837, %v430_v26  ;;  %v1026_v32 = vmul.u32.u64.high 3435973837, %v430_v26, %v1025_v31  ;;  %v1035_v39 = vadd.s32 48, %v429_v25 }
  0x12   : > { %830 = vmatprep.subr.bf16.mxu0 %v925_v1  ;;  %864 = vmatprep.subr.bf16.mxu1 %v925_v1  ;;  %v237_v19 = vpack.c.bf16 %v229_v16, %v228_v15  ;;  %v240_v20 = vpack.c.bf16 %v235_v18, %v234_v17  ;;  %v231_v22 = vld [vmem:[%s203_s8 + $0x28] sm:$0xff]  ;;  %v1028_v33 = vmul.u32.u64.low 3435973837, %v431_v27  ;;  %v1029_v34 = vmul.u32.u64.high 3435973837, %v431_v27, %v1028_v33 }
  0x13   : > { %v238_v23 = vpack.c.bf16 %v231_v22, %v230_v21  ;;  %v1031_v35 = vmul.u32.u64.low 3435973837, %v432_v30  ;;  %v1032_v36 = vmul.u32.u64.high 3435973837, %v432_v30, %v1031_v35  ;;  %v445_v38 = vshrl.u32 %v1023_v29, 3 }
  0x14   : > { %v456_v40 = vshrl.u32 %v1026_v32, 3  ;;  %v1038_v41 = vmul.u32.u64.low 3435973837, %v433_v37  ;;  %v1039_v42 = vmul.u32.u64.high 3435973837, %v433_v37, %v1038_v41  ;;  %v1041_v43 = vadd.s32 40, %v429_v25 }
  0x15   : > { %831 = vmatpush3.bf16.msra.mxu0 %v911_v3  ;;  %872 = vmatpush3.bf16.msra.mxu1 %v911_v3  ;;  %v467_v44 = vshrl.u32 %v1029_v34, 3  ;;  %v1044_v45 = vadd.s32 56, %v429_v25  ;;  %v446_v46 = vmul.u32 10, %v445_v38  ;;  %v478_v49 = vshrl.u32 %v1032_v36, 3 }
  0x16   : > { %832 = vmatprep.subr.bf16.mxu0 %v925_v1  ;;  %865 = vmatprep.subr.bf16.mxu1 %v925_v1  ;;  %v1047_v47 = vmul.u32.u64.low 3435973837, %v1035_v39  ;;  %v1048_v48 = vmul.u32.u64.high 3435973837, %v1035_v39, %v1047_v47  ;;  %v1051_v50 = vadd.s32 64, %v429_v25  ;;  %v457_v51 = vmul.u32 10, %v456_v40 }
  0x17   : > { %v1054_v52 = vmul.u32.u64.low 3435973837, %v1041_v43  ;;  %v1055_v53 = vmul.u32.u64.high 3435973837, %v1041_v43, %v1054_v52  ;;  %v1057_v54 = vadd.s32 72, %v429_v25  ;;  %v468_v55 = vmul.u32 10, %v467_v44 }
  0x18   : > { %v1060_v56 = vmul.u32.u64.low 3435973837, %v1044_v45  ;;  %v1061_v57 = vmul.u32.u64.high 3435973837, %v1044_v45, %v1060_v56  ;;  %v447_v58 = vsub.s32 %v429_v25, %v446_v46  ;;  %v479_v59 = vmul.u32 10, %v478_v49 }
  0x19   : > { %833 = vmatpush3.bf16.msra.mxu0 %v912_v4  ;;  %873 = vmatpush3.bf16.msra.mxu1 %v912_v4  ;;  %v1064_v60 = vmul.u32.u64.low 3435973837, %v1051_v50  ;;  %v1065_v61 = vmul.u32.u64.high 3435973837, %v1051_v50, %v1064_v60  ;;  %v458_v62 = vsub.s32 %v430_v26, %v457_v51  ;;  %v489_v63 = vshrl.u32 %v1039_v42, 3 }
  0x1a   : > { %834 = vmatprep.subr.bf16.mxu0 %v925_v1  ;;  %866 = vmatprep.subr.bf16.mxu1 %v925_v1  ;;  %v1069_v0 = vmul.u32.u64.low 3435973837, %v1057_v54  ;;  %v1070_v2 = vmul.u32.u64.high 3435973837, %v1057_v54, %v1069_v0  ;;  %v469_v3 = vsub.s32 %v431_v27, %v468_v55  ;;  %vm549_vm1 = vcmp.ne.s32.totalorder %v447_v58, 0 }
  0x1b   : > { %vm559_vm2 = vcmp.lt.s32.totalorder %v447_v58, 0  ;;  %v511_v4 = vshrl.u32 %v1048_v48, 3  ;;  %vm550_vm3 = vcmp.ne.s32.totalorder %v458_v62, 0  ;;  %vm560_vm4 = vcmp.lt.s32.totalorder %v458_v62, 0 }
  0x1c   : > { %vm551_vm5 = vcmp.ne.s32.totalorder %v469_v3, 0  ;;  %vm561_vm6 = vcmp.lt.s32.totalorder %v469_v3, 0  ;;  %vm1077_vm7 = vmand %vm559_vm2, %vm549_vm1  ;;  %v579_v10 = vadd.s32 10, %v447_v58  ;;  %v580_v11 = vadd.s32 10, %v458_v62 }
  0x1d   : > { %835 = vmatpush3.bf16.msra.mxu0 %v913_v5  ;;  %874 = vmatpush3.bf16.msra.mxu1 %v913_v5  ;;  %v1073_v5 = vsub.s32 %v432_v30, %v479_v59  ;;  %vm1081_vm8 = vmand %vm560_vm4, %vm550_vm3  ;;  %v533_v15 = vshrl.u32 %v1065_v61, 3 }
  0x1e   : > { %836 = vmatprep.subr.bf16.mxu0 %v925_v1  ;;  %867 = vmatprep.subr.bf16.mxu1 %v925_v1  ;;  %vm1094_vm10 = vmand %vm561_vm6, %vm551_vm5  ;;  %v590_v22 = vsel %vm1081_vm8, %v580_v11, %v458_v62  ;;  %v589_v25 = vsel %vm1077_vm7, %v579_v10, %v447_v58 }
  0x1f   : > { %vm552_vm9 = vcmp.ne.s32.totalorder %v1073_v5, 0  ;;  %vm562_vm11 = vcmp.lt.s32.totalorder %v1073_v5, 0  ;;  %v582_v24 = vadd.s32 10, %v1073_v5  ;;  %v534_v29 = vmul.u32 10, %v533_v15 }
  0x20   : > { %vm1122_vm12 = vmand %vm562_vm11, %vm552_vm9  ;;  %vm600_vm15 = vcmp.lt.s32.totalorder %v590_v22, 8 }
  0x21   : > { %837 = vmatpush3.bf16.msra.mxu0 %v914_v6  ;;  %875 = vmatpush3.bf16.msra.mxu1 %v914_v6  ;;  %v490_v6 = vmul.u32 10, %v489_v63  ;;  %v1162_v42 = vsub.s32 %v1051_v50, %v534_v29 }
  0x22   : > { %838 = vmatprep.subr.bf16.mxu0 %v925_v1  ;;  %868 = vmatprep.subr.bf16.mxu1 %v925_v1 }
  0x23   : > { %v1099_v17 = vsub.s32 %v433_v37, %v490_v6  ;;  %v592_v37 = vsel %vm1122_vm12, %v582_v24, %v1073_v5  ;;  %vm557_vm11 = vcmp.ne.s32.totalorder %v1162_v42, 0  ;;  %vm567_vm12 = vcmp.lt.s32.totalorder %v1162_v42, 0 }
  0x24   : > { %vm1171_vm7 = vcmp.lt.s32.totalorder %v592_v37, 8  ;;  %v587_v5 = vadd.s32 10, %v1162_v42 }
  0x25   : > { %839 = vmatpush3.bf16.msra.mxu0 %v915_v7  ;;  %876 = vmatpush3.bf16.msra.mxu1 %v915_v7  ;;  %v500_v7 = vshrl.u32 %v1055_v53, 3  ;;  %vm553_vm13 = vcmp.ne.s32.totalorder %v1099_v17, 0  ;;  %vm563_vm14 = vcmp.lt.s32.totalorder %v1099_v17, 0  ;;  %v804_v60 = vsel %vm1171_vm7, 1.0, %v925_v1 }
  0x26   : > { %840 = vmatprep.subr.bf16.mxu0 %v925_v1  ;;  %869 = vmatprep.subr.bf16.mxu1 %v925_v1  ;;  %vm1157_vm4 = vmand %vm563_vm14, %vm553_vm13 }
  0x27   : > { %v501_v18 = vmul.u32 10, %v500_v7 }
  0x29   : > { %841 = vmatpush3.bf16.msra.mxu0 %v916_v8  ;;  %877 = vmatpush3.bf16.msra.mxu1 %v916_v8  ;;  %v522_v8 = vshrl.u32 %v1061_v57, 3  ;;  %v1129_v32 = vsub.s32 %v1041_v43, %v501_v18  ;;  %v802_v43 = vsel %vm600_vm15, 1.0, %v925_v1 }
  0x2b   : > { %vm554_vm5 = vcmp.ne.s32.totalorder %v1129_v32, 0  ;;  %vm564_vm6 = vcmp.lt.s32.totalorder %v1129_v32, 0  ;;  %v584_v55 = vadd.s32 10, %v1129_v32 }
  0x2c   : > { %843 = vmatmul.mubr.bf16.vlgmr.msra.gmra.mxu0 %v236_v13  ;;  %855 = vmatmul.mubr.bf16.vlgmr.msra.gmra.mxu1 %v239_v14  ;;  %v581_v13 = vadd.s32 10, %v469_v3  ;;  %v512_v14 = vmul.u32 10, %v511_v4  ;;  %vm1207_vm13 = vmand %vm564_vm6, %vm554_vm5 }
  0x2d   : > { %846 = vmatprep.mubr.msk.bf16.mxu0 %vm926_vm0, %v925_v1  ;;  %858 = vmatprep.mubr.msk.bf16.mxu1 %vm926_vm0, %v925_v1  ;;  %v594_v6 = vsel %vm1207_vm13, %v584_v55, %v1129_v32 }
  0x2e   : > { %v591_v26 = vsel %vm1094_vm10, %v581_v13, %v469_v3  ;;  %v1118_v27 = vsub.s32 %v1035_v39, %v512_v14  ;;  %v583_v39 = vadd.s32 10, %v1099_v17  ;;  %vm604_vm5 = vcmp.lt.s32.totalorder %v594_v6, 8 }
  0x2f   : > { %vm1145_vm1 = vcmp.lt.s32.totalorder %v591_v26, 8 }
  0x30   : > { %vm555_vm2 = vcmp.ne.s32.totalorder %v1118_v27, 0  ;;  %vm565_vm3 = vcmp.lt.s32.totalorder %v1118_v27, 0  ;;  %v585_v47 = vadd.s32 10, %v1118_v27  ;;  %v803_v51 = vsel %vm1145_vm1, 1.0, %v925_v1 }
  0x31   : > { %vm1187_vm10 = vmand %vm565_vm3, %vm555_vm2  ;;  %v593_v53 = vsel %vm1157_vm4, %v583_v39, %v1099_v17 }
  0x32   : > { %vm603_vm1 = vcmp.lt.s32.totalorder %v593_v53, 8  ;;  %vm1228_vm2 = vmand %vm567_vm12, %vm557_vm11 }
  0x33   : > { %v805_v15 = vsel %vm603_vm1, 1.0, %v925_v1  ;;  %v597_v24 = vsel %vm1228_vm2, %v587_v5, %v1162_v42 }
  0x34   : > { %847 = vmatmul.mubr.bf16.gmra.mxu0 %v237_v19  ;;  %859 = vmatmul.mubr.bf16.gmra.mxu1 %v240_v20  ;;  %v544_v19 = vshrl.u32 %v1070_v2, 3  ;;  %v523_v20 = vmul.u32 10, %v522_v8  ;;  %v595_v2 = vsel %vm1187_vm10, %v585_v47, %v1118_v27  ;;  %vm607_vm7 = vcmp.lt.s32.totalorder %v597_v24, 8 }
  0x35   : > { %850 = vmatprep.mubr.msk.bf16.mxu0 %vm926_vm0, %v925_v1  ;;  %vm1134_vm0 = vcmp.lt.s32.totalorder %v589_v25, 8  ;;  %vm1250_vm4 = vcmp.lt.s32.totalorder %v595_v2, 8  ;;  %v809_v42 = vsel %vm607_vm7, 1.0, %v925_v1 }
  0x36   : > { %v545_v33 = vmul.u32 10, %v544_v19  ;;  %v1132_v34 = vsub.s32 %v1044_v45, %v523_v20  ;;  %v801_v49 = vsel %vm1134_vm0, 1.0, %v925_v1  ;;  %v807_v29 = vsel %vm1250_vm4, 1.0, %v925_v1 }
  0x38   : > { %v1168_v46 = vsub.s32 %v1057_v54, %v545_v33  ;;  %vm556_vm8 = vcmp.ne.s32.totalorder %v1132_v34, 0  ;;  %vm566_vm9 = vcmp.lt.s32.totalorder %v1132_v34, 0  ;;  %v586_v57 = vadd.s32 10, %v1132_v34 }
  0x39   : > { %vm1218_vm14 = vmand %vm566_vm9, %vm556_vm8 }
  0x3a   : > { %vm558_vm15 = vcmp.ne.s32.totalorder %v1168_v46, 0  ;;  %vm568_vm0 = vcmp.lt.s32.totalorder %v1168_v46, 0  ;;  %v588_v8 = vadd.s32 10, %v1168_v46  ;;  %v596_v11 = vsel %vm1218_vm14, %v586_v57, %v1132_v34 }
  0x3b   : > { %vm1246_vm3 = vmand %vm568_vm0, %vm558_vm15  ;;  %vm1256_vm6 = vcmp.lt.s32.totalorder %v596_v11, 8 }
  0x3c   : > { %851 = vmatmul.mubr.bf16.gmra.mxu0 %v238_v23  ;;  %v598_v25 = vsel %vm1246_vm3, %v588_v8, %v1168_v46  ;;  %v808_v35 = vsel %vm1256_vm6, 1.0, %v925_v1 }
  0x3d   : > { %vm608_vm8 = vcmp.lt.s32.totalorder %v598_v25, 8 }
  0x3e   : > { %v810_v48 = vsel %vm608_vm8, 1.0, %v925_v1 }
  0xec   : > { %v1102_v21 = vpop.f32.mrf.mxu0  ;;  %v1106_v23 = vpop.f32.mrf.mxu1 }
  0xed   : > { %418 = vst [vmem:[%s1092_s13] sm:$0xff] %v1102_v21  ;;  %424 = vst [vmem:[%s1092_s13 + $0x30] sm:$0xff] %v1106_v23  ;;  %v629_v63 = vmul.f32 %v801_v49, %v1102_v21  ;;  %v635_v37 = vmul.f32 %v807_v29, %v1106_v23 }
  0xee   : > { %v844_v30 = vpop.f32.mrf.mxu0  ;;  %v856_v31 = vpop.f32.mrf.mxu1 }
  0xef   : > { %v655_v17 = vmul.f32 %v629_v63, %v1102_v21  ;;  %v806_v31 = vsel %vm604_vm5, 1.0, %v925_v1  ;;  %v661_v49 = vmul.f32 %v635_v37, %v1106_v23 }
  0xf0   : > { %v352_v36 = vpop.f32.mrf.mxu0  ;;  %v1141_v38 = vpop.f32.mrf.mxu1 }
  0xf1   : > { %419 = vst [vmem:[%s1092_s13 + $0x8] sm:$0xff] %v352_v36  ;;  %425 = vst [vmem:[%s1092_s13 + $0x38] sm:$0xff] %v1141_v38  ;;  %v630_v56 = vmul.f32 %v802_v43, %v352_v36 }
  0xf2   : > { %v845_v44 = vpop.f32.mrf.mxu0  ;;  %v857_v45 = vpop.f32.mrf.mxu1 }
  0xf3   : > { %v656_v9 = vmul.f32 %v630_v56, %v352_v36  ;;  %v639_v18 = vadd.f32 %v630_v56, %v629_v63  ;;  %v636_v44 = vmul.f32 %v808_v35, %v1141_v38 }
  0xf4   : > { %v357_v50 = vpop.f32.mrf.mxu0  ;;  %v1194_v54 = vpop.f32.mrf.mxu1 }
  0xf5   : > { %420 = vst [vmem:[%s1092_s13 + $0x10] sm:$0xff] %v357_v50  ;;  %426 = vst [vmem:[%s1092_s13 + $0x40] sm:$0xff] %v1194_v54  ;;  %v631_v0 = vmul.f32 %v803_v51, %v357_v50  ;;  %v665_v26 = vadd.f32 %v656_v9, %v655_v17  ;;  %v662_v53 = vmul.f32 %v636_v44, %v1141_v38 }
  0xf6   : > { %v848_v59 = vpop.f32.mrf.mxu0  ;;  %v860_v62 = vpop.f32.mrf.mxu1 }
  0xf7   : > { %v657_v19 = vmul.f32 %v631_v0, %v357_v50  ;;  %v640_v27 = vadd.f32 %v639_v18, %v631_v0  ;;  %v637_v50 = vmul.f32 %v809_v42, %v1194_v54 }
  0xf8   : > { %v360_v3 = vpop.f32.mrf.mxu0  ;;  %v384_v7 = vpop.f32.mrf.mxu1 }
  0xf9   : > { %421 = vst [vmem:[%s1092_s13 + $0x18] sm:$0xff] %v360_v3  ;;  %v632_v10 = vmul.f32 %v804_v60, %v360_v3  ;;  %427 = vst [vmem:[%s1092_s13 + $0x48] sm:$0xff] %v384_v7  ;;  %v666_v32 = vadd.f32 %v665_v26, %v657_v19  ;;  %v638_v56 = vmul.f32 %v810_v48, %v384_v7 }
  0xfa   : > { %v849_v14 = vpop.f32.mrf.mxu0  ;;  %v861_v16 = vpop.f32.mrf.mxu1  ;;  %v663_v58 = vmul.f32 %v637_v50, %v1194_v54 }
  0xfb   : > { %v658_v28 = vmul.f32 %v632_v10, %v360_v3  ;;  %v641_v33 = vadd.f32 %v640_v27, %v632_v10  ;;  %v664_v62 = vmul.f32 %v638_v56, %v384_v7 }
  0xfc   : > { %v365_v22 = vpop.f32.mrf.mxu0 }
  0xfd   : > { %422 = vst [vmem:[%s1092_s13 + $0x20] sm:$0xff] %v365_v22  ;;  %v633_v21 = vmul.f32 %v805_v15, %v365_v22  ;;  %v667_v39 = vadd.f32 %v666_v32, %v658_v28 }
  0xfe   : > { %v852_v30 = vpop.f32.mrf.mxu0 }
  0xff   : > { %v659_v34 = vmul.f32 %v633_v21, %v365_v22  ;;  %v642_v40 = vadd.f32 %v641_v33, %v633_v21 }
 0x100   : > { %v368_v36 = vpop.f32.mrf.mxu0 }
 0x101   : > { %423 = vst [vmem:[%s1092_s13 + $0x28] sm:$0xff] %v368_v36  ;;  %v634_v41 = vmul.f32 %v806_v31, %v368_v36  ;;  %v668_v45 = vadd.f32 %v667_v39, %v659_v34 }
 0x102   : > { %v853_v43 = vpop.f32.mrf.mxu0 }
 0x103   : > { %v643_v46 = vadd.f32 %v642_v40, %v634_v41  ;;  %v660_v47 = vmul.f32 %v634_v41, %v368_v36 }
 0x105   : > { %v644_v51 = vadd.f32 %v643_v46, %v635_v37  ;;  %v669_v52 = vadd.f32 %v668_v45, %v660_v47 }
 0x107   : > { %v670_v55 = vadd.f32 %v669_v52, %v661_v49  ;;  %v645_v57 = vadd.f32 %v644_v51, %v636_v44 }
 0x109   : > { %v646_v59 = vadd.f32 %v645_v57, %v637_v50  ;;  %v671_v60 = vadd.f32 %v670_v55, %v662_v53 }
 0x10b   : > { %v647_v61 = vadd.f32 %v646_v59, %v638_v56  ;;  %v672_v1 = vadd.f32 %v671_v60, %v663_v58 }
 0x10d   : > { %v648_v63 = vrot.slane %v647_v61, 4  ;;  %v673_v23 = vadd.f32 %v672_v1, %v664_v62 }
 0x10f   : > { %v649_v0 = vadd.f32 %v648_v63, %v647_v61  ;;  %v674_v2 = vrot.slane %v673_v23, 4 }
 0x111   : > { %v650_v3 = vrot.slane %v649_v0, 2  ;;  %v675_v4 = vadd.f32 %v674_v2, %v673_v23 }
 0x113   : > { %v651_v5 = vadd.f32 %v650_v3, %v649_v0  ;;  %v676_v38 = vrot.slane %v675_v4, 2 }
 0x115   : > { %v652_v6 = vrot.slane %v651_v5, 1  ;;  %v677_v8 = vadd.f32 %v676_v38, %v675_v4 }
 0x117   : > { %v653_v54 = vadd.f32 %v652_v6, %v651_v5  ;;  %v678_v9 = vrot.slane %v677_v8, 1 }
 0x119   : > { %654 = vst [vmem:[%s211_s18] sm:$0x1] %v653_v54  ;;  %v679_v7 = vadd.f32 %v678_v9, %v677_v8 }
 0x11b   : > { %680 = vst [vmem:[%s214_s21] sm:$0x1] %v679_v7 }
 0x11c PF: > { %s15_s15 = sadd.s32 1, %s923_s15  }
 0x11d   : > { %p12_p4 = scmp.ge.s32.totalorder %s15_s15, 4  }
 0x11f   :  { %14 = sbr.rel (!%p12_p4) target bundleno = 1 (0x1), region = 82 }

// kernel: basic_block_forward.6
= control target key start
LH: loop header
LB: loop body
LE: loop exit
PB: predicated region body
PF: predicated region fallthrough
CT: control target
= control target key end

     0   :  { %s336_s12 = smov 0   ;;  %s359_s0 = inlined_call_operand.vmem [shape: f32[144,128], index: 0, kind: input, shape index: {}]   ;;  %s360_s1 = inlined_call_operand.vmem [shape: f32[1,128], index: 1, kind: input, shape index: {}]   ;;  %s361_s2 = inlined_call_operand.vmem [shape: f32[1,128], index: 2, kind: input, shape index: {}]   ;;  %s362_s3 = inlined_call_operand.vmem [shape: f32[144,128], index: 3, kind: output, shape index: {}]  }
   0x1 LB: > { %s289_s13 = sadd.s32 4294967295, %s314_s12   ;;  %p293_p0 = scmp.ge.s32.totalorder %s314_s12, 1  ;;  %s314_s12 = sphi %s336_s12, %s13_s12  }
   0x2   : > { %p138_p1 = scmp.lt.s32.totalorder %s314_s12, 3 }
   0x4   : > { %p139_p2 = pnand %p293_p0, %p138_p1 }
   0x5   : > { %s162_s14 = smul.u32 (!%p139_p2), 9, %s289_s13 }
   0x6   : > { %142 = sbr.rel (%p139_p2) target bundleno = 28 (0x1c), region = 32 }
   0x7   : > { %p163_p3 = scmp.lt.s32.totalorder (!%p139_p2), %s162_s14, 17 }
   0xb   : > { %s364_s14 = smov (!%p163_p3, %s162_s14), 17  ;;  %v296_v0 = vld [vmem:[%s360_s1] ss:$0 sm:$0xff] }
   0xc   : > { %s294_s15 = sshll.u32 %s364_s14, 3  ;;  %v297_v1 = vld [vmem:[%s361_s2] ss:$0 sm:$0xff] }
   0xd   : > { %s166_s20 = scalar_lea.vmem %s359_s0, %s294_s15  ;;  %s172_s25 = scalar_lea.vmem %s362_s3, %s294_s15 }
   0xe   : > { %v174_v2 = vld [vmem:[%s166_s20] sm:$0xff]  ;;  %v175_v3 = vld [vmem:[%s166_s20 + $0x8] sm:$0xff]  ;;  %v176_v4 = vld [vmem:[%s166_s20 + $0x10] sm:$0xff] }
   0xf   : > { %v190_v5 = vmul.f32 %v296_v0, %v174_v2  ;;  %v191_v6 = vmul.f32 %v296_v0, %v175_v3  ;;  %v192_v7 = vmul.f32 %v296_v0, %v176_v4  ;;  %v177_v8 = vld [vmem:[%s166_s20 + $0x18] sm:$0xff]  ;;  %v178_v9 = vld [vmem:[%s166_s20 + $0x20] sm:$0xff]  ;;  %v179_v10 = vld [vmem:[%s166_s20 + $0x28] sm:$0xff] }
  0x10   : > { %v193_v11 = vmul.f32 %v296_v0, %v177_v8  ;;  %v194_v12 = vmul.f32 %v296_v0, %v178_v9  ;;  %v195_v13 = vmul.f32 %v296_v0, %v179_v10  ;;  %v180_v14 = vld [vmem:[%s166_s20 + $0x30] sm:$0xff]  ;;  %v181_v15 = vld [vmem:[%s166_s20 + $0x38] sm:$0xff]  ;;  %v182_v24 = vld [vmem:[%s166_s20 + $0x40] sm:$0xff] }
  0x11   : > { %v206_v16 = vadd.f32 %v297_v1, %v190_v5  ;;  %v207_v17 = vadd.f32 %v297_v1, %v191_v6  ;;  %v208_v18 = vadd.f32 %v297_v1, %v192_v7  ;;  %v196_v19 = vmul.f32 %v296_v0, %v180_v14 }
  0x12   : > { %v209_v20 = vadd.f32 %v297_v1, %v193_v11  ;;  %v210_v21 = vadd.f32 %v297_v1, %v194_v12  ;;  %v211_v22 = vadd.f32 %v297_v1, %v195_v13  ;;  %v197_v23 = vmul.f32 %v296_v0, %v181_v15 }
  0x13   : > { %v215_v25 = vmax.f32 %v206_v16, 0.0  ;;  %v216_v26 = vmax.f32 %v207_v17, 0.0  ;;  %v217_v27 = vmax.f32 %v208_v18, 0.0  ;;  %v212_v28 = vadd.f32 %v297_v1, %v196_v19 }
  0x14   : > { %v218_v29 = vmax.f32 %v209_v20, 0.0  ;;  %v219_v30 = vmax.f32 %v210_v21, 0.0  ;;  %v220_v31 = vmax.f32 %v211_v22, 0.0  ;;  %v213_v32 = vadd.f32 %v297_v1, %v197_v23 }
  0x15   : > { %224 = vst [vmem:[%s172_s25] sm:$0xff] %v215_v25  ;;  %225 = vst [vmem:[%s172_s25 + $0x8] sm:$0xff] %v216_v26  ;;  %v221_v33 = vmax.f32 %v212_v28, 0.0  ;;  %v198_v34 = vmul.f32 %v296_v0, %v182_v24 }
  0x16   : > { %226 = vst [vmem:[%s172_s25 + $0x10] sm:$0xff] %v217_v27  ;;  %227 = vst [vmem:[%s172_s25 + $0x18] sm:$0xff] %v218_v29  ;;  %v222_v35 = vmax.f32 %v213_v32, 0.0 }
  0x17   : > { %228 = vst [vmem:[%s172_s25 + $0x20] sm:$0xff] %v219_v30  ;;  %229 = vst [vmem:[%s172_s25 + $0x28] sm:$0xff] %v220_v31  ;;  %v214_v36 = vadd.f32 %v297_v1, %v198_v34 }
  0x18   : > { %230 = vst [vmem:[%s172_s25 + $0x30] sm:$0xff] %v221_v33  ;;  %231 = vst [vmem:[%s172_s25 + $0x38] sm:$0xff] %v222_v35 }
  0x19   : > { %v223_v37 = vmax.f32 %v214_v36, 0.0 }
  0x1b   : > { %232 = vst [vmem:[%s172_s25 + $0x40] sm:$0xff] %v223_v37 }
  0x1c PF: > { %s13_s12 = sadd.s32 1, %s314_s12  }
  0x1d   : > { %p10_p4 = scmp.ge.s32.totalorder %s13_s12, 4  }
  0x1f   :  { %12 = sbr.rel (!%p10_p4) target bundleno = 1 (0x1), region = 62 }

// kernel: basic_block_forward.5
= control target key start
LH: loop header
LB: loop body
LE: loop exit
PB: predicated region body
PF: predicated region fallthrough
CT: control target
= control target key end

     0   :  { %s3038_s15 = smov 0   ;;  %s3913_s0 = inlined_call_operand.vmem [shape: f32[2,4,90,128], index: 0, kind: input, shape index: {}]   ;;  %s3914_s1 = inlined_call_operand.vmem [shape: bf16[9,128,128], index: 1, kind: input, shape index: {}]   ;;  %s3915_s2 = inlined_call_operand.vmem [shape: f32[2,72,128], index: 2, kind: output, shape index: {0}]   ;;  %s3916_s3 = inlined_call_operand.vmem [shape: f32[2,1,128], index: 3, kind: output, shape index: {1}]   ;;  %s3917_s4 = inlined_call_operand.vmem [shape: f32[2,1,128], index: 4, kind: output, shape index: {2}]  }
   0x1 LB: > { %s2181_s16 = sadd.s32 4294967295, %s3009_s15   ;;  %p2185_p0 = scmp.ge.s32.totalorder %s3009_s15, 1  ;;  %s3009_s15 = sphi %s3038_s15, %s15_s15  }
   0x2   : > { %p167_p1 = scmp.lt.s32.totalorder %s3009_s15, 3 }
   0x4   : > { %p168_p2 = pnand %p2185_p0, %p167_p1 }
   0x5   : > { %p199_p3 = scmp.lt.s32.totalorder (!%p168_p2), %s2181_s16, 1 }
   0x6   : > { %171 = sbr.rel (%p168_p2) target bundleno = 444 (0x1bc), region = 28 }
   0xb   : > { %v2931_v0 = vld [vmem:[%s3914_s1 + $0x38] sm:$0xff]   ;;  %v3011_v1 = vmov 0.0   ;;  %v2933_v3 = vld [vmem:[%s3914_s1 + $0x30] sm:$0xff]   ;;  %vm3012_vm0 = vmmov 0   ;;  %v2935_v5 = vld [vmem:[%s3914_s1 + $0x28] sm:$0xff]   ;;  %s3945_s16 = smov (!%p199_p3, %s2181_s16), 1 }
   0xc   : > { %2561 = vmatprep.subr.bf16.mxu0 %v3011_v1  ;;  %2597 = vmatprep.subr.bf16.mxu1 %v3011_v1  ;;  %v2932_v2 = vld [vmem:[%s3914_s1 + $0x78] sm:$0xff]   ;;  %v2934_v4 = vld [vmem:[%s3914_s1 + $0x70] sm:$0xff]   ;;  %v2936_v6 = vld [vmem:[%s3914_s1 + $0x68] sm:$0xff]   ;;  %s2901_s11 = smul.u32 384, %s3945_s16  ;;  %s211_s5 = scalar_lea.vmem %s3916_s3, %s3945_s16 }
   0xd   : > { %2562 = vmatpush3.bf16.msra.mxu0 %v2931_v0  ;;  %2577 = vmatprep.mubr.msk.bf16.mxu0 %vm3012_vm0, %v3011_v1  ;;  %v2937_v7 = vld [vmem:[%s3914_s1 + $0x20] sm:$0xff]   ;;  %v2939_v9 = vld [vmem:[%s3914_s1 + $0x18] sm:$0xff]   ;;  %v2941_v11 = vld [vmem:[%s3914_s1 + $0x10] sm:$0xff]   ;;  %s214_s8 = scalar_lea.vmem %s3917_s4, %s3945_s16 }
   0xe   : > { %2598 = vmatpush3.bf16.msra.mxu1 %v2932_v2  ;;  %2563 = vmatprep.subr.bf16.mxu0 %v3011_v1  ;;  %v2938_v8 = vld [vmem:[%s3914_s1 + $0x60] sm:$0xff]   ;;  %v2940_v10 = vld [vmem:[%s3914_s1 + $0x58] sm:$0xff]   ;;  %v2942_v12 = vld [vmem:[%s3914_s1 + $0x50] sm:$0xff]   ;;  %s3108_s20 = scalar_lea.vmem %s3913_s0, %s2901_s11 }
   0xf   : > { %2599 = vmatprep.subr.bf16.mxu1 %v3011_v1  ;;  %2613 = vmatprep.mubr.msk.bf16.mxu1 %vm3012_vm0, %v3011_v1  ;;  %v2943_v13 = vld [vmem:[%s3914_s1 + $0x8] sm:$0xff]   ;;  %v2945_v15 = vld [vmem:[%s3914_s1] sm:$0xff]   ;;  %v2947_v23 = vld [vmem:[%s3914_s1 + $0xb8] sm:$0xff]  }
  0x10   : > { %v2944_v14 = vld [vmem:[%s3914_s1 + $0x48] sm:$0xff]   ;;  %v225_v16 = vld [vmem:[%s3108_s20] sm:$0xff]  ;;  %v2949_v24 = vld [vmem:[%s3914_s1 + $0xf8] sm:$0xff]  }
  0x11   : > { %2564 = vmatpush3.bf16.msra.mxu0 %v2933_v3  ;;  %v2946_v17 = vld [vmem:[%s3914_s1 + $0x40] sm:$0xff]   ;;  %v226_v18 = vld [vmem:[%s3108_s20 + $0x8] sm:$0xff]  ;;  %v2948_v25 = vld [vmem:[%s3914_s1 + $0xb0] sm:$0xff]  }
  0x12   : > { %2600 = vmatpush3.bf16.msra.mxu1 %v2934_v4  ;;  %2565 = vmatprep.subr.bf16.mxu0 %v3011_v1  ;;  %v2196_v19 = vld [vmem:[%s3108_s20 + $0x60] sm:$0xff]  ;;  %v2197_v20 = vld [vmem:[%s3108_s20 + $0x68] sm:$0xff]  ;;  %v234_v21 = vpack.c.bf16 %v226_v18, %v225_v16  ;;  %v227_v26 = vld [vmem:[%s3108_s20 + $0x10] sm:$0xff] }
  0x13   : > { %2601 = vmatprep.subr.bf16.mxu1 %v3011_v1  ;;  %v412_v22 = vpack.c.bf16 %v2197_v20, %v2196_v19  ;;  %v228_v27 = vld [vmem:[%s3108_s20 + $0x18] sm:$0xff]  ;;  %v2198_v28 = vld [vmem:[%s3108_s20 + $0x70] sm:$0xff]  ;;  %v2950_v33 = vld [vmem:[%s3914_s1 + $0xa8] sm:$0xff]  }
  0x14   : > { %v2199_v29 = vld [vmem:[%s3108_s20 + $0x78] sm:$0xff]  ;;  %v2951_v30 = vld [vmem:[%s3914_s1 + $0xf0] sm:$0xff]   ;;  %v235_v31 = vpack.c.bf16 %v228_v27, %v227_v26  ;;  %v229_v34 = vld [vmem:[%s3108_s20 + $0x20] sm:$0xff] }
  0x15   : > { %2566 = vmatpush3.bf16.msra.mxu0 %v2935_v5  ;;  %v413_v32 = vpack.c.bf16 %v2199_v29, %v2198_v28  ;;  %v2953_v35 = vld [vmem:[%s3914_s1 + $0xe8] sm:$0xff]   ;;  %v3168_v38 = vld [vmem:[%s3108_s20 + $0x11] sm:$0xff]  ;;  %v2200_v39 = vld [vmem:[%s3108_s20 + $0x80] sm:$0xff] }
  0x16   : > { %2602 = vmatpush3.bf16.msra.mxu1 %v2936_v6  ;;  %2567 = vmatprep.subr.bf16.mxu0 %v3011_v1  ;;  %v230_v36 = vld [vmem:[%s3108_s20 + $0x28] sm:$0xff]  ;;  %v2952_v40 = vld [vmem:[%s3914_s1 + $0xa0] sm:$0xff]   ;;  %v2954_v48 = vld [vmem:[%s3914_s1 + $0x98] sm:$0xff]  }
  0x17   : > { %2603 = vmatprep.subr.bf16.mxu1 %v3011_v1  ;;  %v3165_v37 = vld [vmem:[%s3108_s20 + $0x9] sm:$0xff]  ;;  %v2955_v43 = vld [vmem:[%s3914_s1 + $0xe0] sm:$0xff]   ;;  %v236_v44 = vpack.c.bf16 %v230_v36, %v229_v34  ;;  %v232_v51 = vld [vmem:[%s3108_s20 + $0x38] sm:$0xff] }
  0x18   : > { %v1304_v41 = vpack.c.bf16 %v3168_v38, %v3165_v37  ;;  %v2201_v42 = vld [vmem:[%s3108_s20 + $0x88] sm:$0xff]  ;;  %v3187_v45 = vld [vmem:[%s3108_s20 + $0x19] sm:$0xff]  ;;  %v231_v50 = vld [vmem:[%s3108_s20 + $0x30] sm:$0xff] }
  0x19   : > { %2568 = vmatpush3.bf16.msra.mxu0 %v2937_v7  ;;  %v3190_v46 = vld [vmem:[%s3108_s20 + $0x21] sm:$0xff]  ;;  %v414_v47 = vpack.c.bf16 %v2201_v42, %v2200_v39  ;;  %v2956_v52 = vld [vmem:[%s3914_s1 + $0xd8] sm:$0xff]   ;;  %v2202_v53 = vld [vmem:[%s3108_s20 + $0x90] sm:$0xff]  ;;  %v237_v60 = vpack.c.bf16 %v232_v51, %v231_v50 }
  0x1a   : > { %2604 = vmatpush3.bf16.msra.mxu1 %v2938_v8  ;;  %2569 = vmatprep.subr.bf16.mxu0 %v3011_v1  ;;  %v1305_v49 = vpack.c.bf16 %v3190_v46, %v3187_v45  ;;  %v2957_v54 = vld [vmem:[%s3914_s1 + $0x90] sm:$0xff]   ;;  %v2203_v55 = vld [vmem:[%s3108_s20 + $0x98] sm:$0xff]  ;;  %v2959_v62 = vld [vmem:[%s3914_s1 + $0x88] sm:$0xff]  }
  0x1b   : > { %2605 = vmatprep.subr.bf16.mxu1 %v3011_v1  ;;  %v3214_v56 = vld [vmem:[%s3108_s20 + $0x29] sm:$0xff]  ;;  %v3217_v57 = vld [vmem:[%s3108_s20 + $0x31] sm:$0xff]  ;;  %v415_v61 = vpack.c.bf16 %v2203_v55, %v2202_v53  ;;  %v3234_v0 = vld [vmem:[%s3108_s20 + $0x39] sm:$0xff] }
  0x1c   : > { %v2958_v58 = vld [vmem:[%s3914_s1 + $0xd0] sm:$0xff]   ;;  %v1306_v59 = vpack.c.bf16 %v3217_v57, %v3214_v56  ;;  %v2960_v63 = vld [vmem:[%s3914_s1 + $0xc8] sm:$0xff]   ;;  %v233_v3 = vld [vmem:[%s3108_s20 + $0x40] sm:$0xff]  ;;  %v592_v29 = vpack.c.bf16 %v3214_v56, %v3190_v46  ;;  %v593_v39 = vpack.c.bf16 %v3234_v0, %v3217_v57 }
  0x1d   : > { %2570 = vmatpush3.bf16.msra.mxu0 %v2939_v9  ;;  %v3237_v2 = vld [vmem:[%s3108_s20 + $0x41] sm:$0xff]  ;;  %v238_v8 = vpack.c.bf16 %v233_v3, %v233_v3  ;;  %v2965_v16 = vld [vmem:[%s3914_s1 + $0x178] sm:$0xff]   ;;  %v2255_v18 = vld [vmem:[%s3108_s20 + $0xd0] sm:$0xff] }
  0x1e   : > { %2606 = vmatpush3.bf16.msra.mxu1 %v2940_v10  ;;  %2571 = vmatprep.subr.bf16.mxu0 %v3011_v1  ;;  %v1307_v4 = vpack.c.bf16 %v3237_v2, %v3234_v0  ;;  %v2204_v5 = vld [vmem:[%s3108_s20 + $0xa0] sm:$0xff]  ;;  %v2256_v19 = vld [vmem:[%s3108_s20 + $0xd8] sm:$0xff]  ;;  %v2967_v20 = vld [vmem:[%s3914_s1 + $0x170] sm:$0xff]   ;;  %v594_v50 = vpack.c.bf16 %v3237_v2, %v3237_v2 }
  0x1f   : > { %2607 = vmatprep.subr.bf16.mxu1 %v3011_v1  ;;  %v2961_v6 = vld [vmem:[%s3914_s1 + $0x80] sm:$0xff]   ;;  %v416_v9 = vpack.c.bf16 %v2204_v5, %v2204_v5  ;;  %v2258_v27 = vld [vmem:[%s3108_s20 + $0xe8] sm:$0xff]  ;;  %v2259_v34 = vld [vmem:[%s3108_s20 + $0xf0] sm:$0xff] }
  0x20   : > { %v2962_v7 = vld [vmem:[%s3914_s1 + $0xc0] sm:$0xff]   ;;  %v2974_v36 = vld [vmem:[%s3914_s1 + $0x150] sm:$0xff]   ;;  %v2975_v42 = vld [vmem:[%s3914_s1 + $0x108] sm:$0xff]  }
  0x21   : > { %2572 = vmatpush3.bf16.msra.mxu0 %v2941_v11  ;;  %v581_v10 = vld [vmem:[%s3108_s20 + $0x1] sm:$0xff]  ;;  %v2320_v55 = vld [vmem:[%s3108_s20 + $0xc9] sm:$0xff]  ;;  %v2289_v5 = vld [vmem:[%s3108_s20 + $0x138] sm:$0xff] }
  0x22   : > { %2608 = vmatpush3.bf16.msra.mxu1 %v2942_v12  ;;  %2573 = vmatprep.subr.bf16.mxu0 %v3011_v1  ;;  %v2253_v11 = vld [vmem:[%s3108_s20 + $0xc0] sm:$0xff]  ;;  %v2254_v12 = vld [vmem:[%s3108_s20 + $0xc8] sm:$0xff]  ;;  %v2288_v3 = vld [vmem:[%s3108_s20 + $0x130] sm:$0xff] }
  0x23   : > { %2609 = vmatprep.subr.bf16.mxu1 %v3011_v1  ;;  %v2968_v26 = vld [vmem:[%s3914_s1 + $0x120] sm:$0xff]   ;;  %v2287_v53 = vld [vmem:[%s3108_s20 + $0x128] sm:$0xff]  ;;  %v2999_v46 = vld [vmem:[%s3914_s1 + $0x218] sm:$0xff]  }
  0x24   : > { %v2971_v28 = vld [vmem:[%s3914_s1 + $0x160] sm:$0xff]   ;;  %v3001_v57 = vld [vmem:[%s3914_s1 + $0x208] sm:$0xff]  }
  0x25   : > { %2574 = vmatpush3.bf16.msra.mxu0 %v2943_v13  ;;  %v590_v13 = vpack.c.bf16 %v3165_v37, %v581_v10  ;;  %v3002_v0 = vld [vmem:[%s3914_s1 + $0x200] sm:$0xff]  }
  0x26   : > { %2610 = vmatpush3.bf16.msra.mxu1 %v2944_v14  ;;  %2575 = vmatprep.subr.bf16.mxu0 %v3011_v1  ;;  %v769_v14 = vpack.c.bf16 %v2254_v12, %v2253_v11  ;;  %v2982_v11 = vld [vmem:[%s3914_s1 + $0x1a8] sm:$0xff]  }
  0x27   : > { %2611 = vmatprep.subr.bf16.mxu1 %v3011_v1  ;;  %v2985_v12 = vld [vmem:[%s3914_s1 + $0x1e8] sm:$0xff]  }
  0x29   : > { %2576 = vmatpush3.bf16.msra.mxu0 %v2945_v15  ;;  %v2963_v15 = vld [vmem:[%s3914_s1 + $0x138] sm:$0xff]  }
  0x2a   : > { %2612 = vmatpush3.bf16.msra.mxu1 %v2946_v17  ;;  %2633 = vmatprep.subr.bf16.mxu0 %v3011_v1  ;;  %v2964_v17 = vld [vmem:[%s3914_s1 + $0x130] sm:$0xff]  }
  0x2b   : > { %2669 = vmatprep.subr.bf16.mxu1 %v3011_v1 }
  0x2c   : > { %2578 = vmatmul.mubr.bf16.vlgmr.msra.gmra.mxu0 %v234_v21  ;;  %v591_v21 = vpack.c.bf16 %v3187_v45, %v3168_v38  ;;  %v2997_v38 = vld [vmem:[%s3914_s1 + $0x228] sm:$0xff]  }
  0x2d   : > { %2614 = vmatmul.mubr.bf16.vlgmr.msra.gmra.mxu1 %v412_v22  ;;  %2634 = vmatpush3.bf16.msra.mxu0 %v2947_v23  ;;  %v770_v22 = vpack.c.bf16 %v2256_v19, %v2255_v18  ;;  %v2966_v23 = vld [vmem:[%s3914_s1 + $0x128] sm:$0xff]   ;;  %v2987_v18 = vld [vmem:[%s3914_s1 + $0x1e0] sm:$0xff]  }
  0x2e   : > { %2635 = vmatprep.subr.bf16.mxu0 %v3011_v1  ;;  %2581 = vmatprep.mubr.msk.bf16.mxu0 %vm3012_vm0, %v3011_v1 }
  0x2f   : > { %2617 = vmatprep.mubr.msk.bf16.mxu1 %vm3012_vm0, %v3011_v1  ;;  %2670 = vmatpush3.bf16.msra.mxu1 %v2949_v24  ;;  %v2969_v24 = vld [vmem:[%s3914_s1 + $0x168] sm:$0xff]  }
  0x30   : > { %2671 = vmatprep.subr.bf16.mxu1 %v3011_v1 }
  0x31   : > { %2636 = vmatpush3.bf16.msra.mxu0 %v2948_v25  ;;  %v2257_v25 = vld [vmem:[%s3108_s20 + $0xe0] sm:$0xff] }
  0x32   : > { %2637 = vmatprep.subr.bf16.mxu0 %v3011_v1 }
  0x33   : > { %2672 = vmatpush3.bf16.msra.mxu1 %v2951_v30  ;;  %v771_v30 = vpack.c.bf16 %v2258_v27, %v2257_v25  ;;  %v2989_v25 = vld [vmem:[%s3914_s1 + $0x190] sm:$0xff]   ;;  %v2326_v27 = vld [vmem:[%s3108_s20 + $0xf9] sm:$0xff] }
  0x34   : > { %2582 = vmatmul.mubr.bf16.gmra.mxu0 %v235_v31  ;;  %2673 = vmatprep.subr.bf16.mxu1 %v3011_v1  ;;  %v2970_v31 = vld [vmem:[%s3914_s1 + $0x118] sm:$0xff]  }
  0x35   : > { %2618 = vmatmul.mubr.bf16.gmra.mxu1 %v413_v32  ;;  %2638 = vmatpush3.bf16.msra.mxu0 %v2950_v33  ;;  %v2972_v32 = vld [vmem:[%s3914_s1 + $0x158] sm:$0xff]   ;;  %v2973_v33 = vld [vmem:[%s3914_s1 + $0x110] sm:$0xff]  }
  0x36   : > { %2585 = vmatprep.mubr.msk.bf16.mxu0 %vm3012_vm0, %v3011_v1  ;;  %2621 = vmatprep.mubr.msk.bf16.mxu1 %vm3012_vm0, %v3011_v1 }
  0x37   : > { %2639 = vmatprep.subr.bf16.mxu0 %v3011_v1  ;;  %2674 = vmatpush3.bf16.msra.mxu1 %v2953_v35  ;;  %v2260_v35 = vld [vmem:[%s3108_s20 + $0xf8] sm:$0xff] }
  0x38   : > { %2675 = vmatprep.subr.bf16.mxu1 %v3011_v1 }
  0x39   : > { %2640 = vmatpush3.bf16.msra.mxu0 %v2952_v40  ;;  %v772_v40 = vpack.c.bf16 %v2260_v35, %v2259_v34  ;;  %v2327_v34 = vld [vmem:[%s3108_s20 + $0x101] sm:$0xff] }
  0x3a   : > { %2641 = vmatprep.subr.bf16.mxu0 %v3011_v1  ;;  %v2993_v35 = vld [vmem:[%s3914_s1 + $0x180] sm:$0xff]  }
  0x3b   : > { %2676 = vmatpush3.bf16.msra.mxu1 %v2955_v43  ;;  %v2976_v43 = vld [vmem:[%s3914_s1 + $0x148] sm:$0xff]  }
  0x3c   : > { %2586 = vmatmul.mubr.bf16.gmra.mxu0 %v236_v44  ;;  %2677 = vmatprep.subr.bf16.mxu1 %v3011_v1  ;;  %v2261_v44 = vld [vmem:[%s3108_s20 + $0x100] sm:$0xff] }
  0x3d   : > { %2622 = vmatmul.mubr.bf16.gmra.mxu1 %v414_v47  ;;  %2642 = vmatpush3.bf16.msra.mxu0 %v2954_v48  ;;  %v2977_v47 = vld [vmem:[%s3914_s1 + $0x100] sm:$0xff]   ;;  %v773_v51 = vpack.c.bf16 %v2261_v44, %v2261_v44 }
  0x3e   : > { %2589 = vmatprep.mubr.msk.bf16.mxu0 %vm3012_vm0, %v3011_v1  ;;  %2625 = vmatprep.mubr.msk.bf16.mxu1 %vm3012_vm0, %v3011_v1  ;;  %v2978_v48 = vld [vmem:[%s3914_s1 + $0x140] sm:$0xff]  }
  0x3f   : > { %2643 = vmatprep.subr.bf16.mxu0 %v3011_v1  ;;  %2678 = vmatpush3.bf16.msra.mxu1 %v2956_v52  ;;  %v2286_v52 = vld [vmem:[%s3108_s20 + $0x120] sm:$0xff] }
  0x40   : > { %2679 = vmatprep.subr.bf16.mxu1 %v3011_v1 }
  0x41   : > { %2644 = vmatpush3.bf16.msra.mxu0 %v2957_v54  ;;  %v2319_v54 = vld [vmem:[%s3108_s20 + $0xc1] sm:$0xff] }
  0x42   : > { %2645 = vmatprep.subr.bf16.mxu0 %v3011_v1 }
  0x43   : > { %2680 = vmatpush3.bf16.msra.mxu1 %v2958_v58  ;;  %v948_v58 = vpack.c.bf16 %v2287_v53, %v2286_v52  ;;  %v2380_v52 = vld [vmem:[%s3108_s20 + $0x89] sm:$0xff]  ;;  %v2381_v53 = vld [vmem:[%s3108_s20 + $0x91] sm:$0xff] }
  0x44   : > { %2590 = vmatmul.mubr.bf16.gmra.mxu0 %v237_v60  ;;  %2681 = vmatprep.subr.bf16.mxu1 %v3011_v1  ;;  %v1126_v60 = vpack.c.bf16 %v2320_v55, %v2319_v54  ;;  %v1484_v45 = vpack.c.bf16 %v2381_v53, %v2380_v52  ;;  %v2382_v54 = vld [vmem:[%s3108_s20 + $0x99] sm:$0xff]  ;;  %v2383_v55 = vld [vmem:[%s3108_s20 + $0xa1] sm:$0xff] }
  0x45   : > { %2626 = vmatmul.mubr.bf16.gmra.mxu1 %v415_v61  ;;  %2593 = vmatprep.mubr.msk.bf16.mxu0 %vm3012_vm0, %v3011_v1  ;;  %v2979_v61 = vld [vmem:[%s3914_s1 + $0x1b8] sm:$0xff]   ;;  %v1485_v56 = vpack.c.bf16 %v2383_v55, %v2382_v54 }
  0x46   : > { %2629 = vmatprep.mubr.msk.bf16.mxu1 %vm3012_vm0, %v3011_v1  ;;  %2646 = vmatpush3.bf16.msra.mxu0 %v2959_v62  ;;  %v2981_v62 = vld [vmem:[%s3914_s1 + $0x1f8] sm:$0xff]  }
  0x47   : > { %2682 = vmatpush3.bf16.msra.mxu1 %v2960_v63  ;;  %2647 = vmatprep.subr.bf16.mxu0 %v3011_v1  ;;  %v2980_v63 = vld [vmem:[%s3914_s1 + $0x1b0] sm:$0xff]  }
  0x48   : > { %2683 = vmatprep.subr.bf16.mxu1 %v3011_v1 }
  0x4a   : > { %2648 = vmatpush3.bf16.msra.mxu0 %v2961_v6  ;;  %v2321_v6 = vld [vmem:[%s3108_s20 + $0xd1] sm:$0xff] }
  0x4b   : > { %2684 = vmatpush3.bf16.msra.mxu1 %v2962_v7  ;;  %2705 = vmatprep.subr.bf16.mxu0 %v3011_v1  ;;  %v2322_v7 = vld [vmem:[%s3108_s20 + $0xd9] sm:$0xff] }
  0x4c   : > { %2594 = vmatmul.mubr.bf16.gmra.mxu0 %v238_v8  ;;  %2741 = vmatprep.subr.bf16.mxu1 %v3011_v1  ;;  %v2983_v8 = vld [vmem:[%s3914_s1 + $0x1f0] sm:$0xff]   ;;  %v1127_v10 = vpack.c.bf16 %v2322_v7, %v2321_v6  ;;  %v1653_v6 = vld [vmem:[%s3108_s20 + $0x1a] sm:$0xff]  ;;  %v1654_v7 = vld [vmem:[%s3108_s20 + $0x22] sm:$0xff] }
  0x4d   : > { %2630 = vmatmul.mubr.bf16.gmra.mxu1 %v416_v9  ;;  %2649 = vmatprep.mubr.msk.bf16.mxu0 %vm3012_vm0, %v3011_v1  ;;  %v949_v9 = vpack.c.bf16 %v2289_v5, %v2288_v3 }
  0x4e   : > { %2685 = vmatprep.mubr.msk.bf16.mxu1 %vm3012_vm0, %v3011_v1 }
  0x54   : > { %2650 = vmatmul.mubr.bf16.vlgmr.msra.gmra.mxu0 %v590_v13  ;;  %v2290_v13 = vld [vmem:[%s3108_s20 + $0x140] sm:$0xff] }
  0x55   : > { %2686 = vmatmul.mubr.bf16.vlgmr.msra.gmra.mxu1 %v769_v14  ;;  %2706 = vmatpush3.bf16.msra.mxu0 %v2963_v15  ;;  %v2291_v14 = vld [vmem:[%s3108_s20 + $0x148] sm:$0xff]  ;;  %v2984_v15 = vld [vmem:[%s3914_s1 + $0x1a0] sm:$0xff]  }
  0x56   : > { %2707 = vmatprep.subr.bf16.mxu0 %v3011_v1  ;;  %2653 = vmatprep.mubr.msk.bf16.mxu0 %vm3012_vm0, %v3011_v1  ;;  %v950_v19 = vpack.c.bf16 %v2291_v14, %v2290_v13 }
  0x57   : > { %2689 = vmatprep.mubr.msk.bf16.mxu1 %vm3012_vm0, %v3011_v1  ;;  %2742 = vmatpush3.bf16.msra.mxu1 %v2965_v16  ;;  %v2323_v16 = vld [vmem:[%s3108_s20 + $0xe1] sm:$0xff] }
  0x58   : > { %2743 = vmatprep.subr.bf16.mxu1 %v3011_v1 }
  0x59   : > { %2708 = vmatpush3.bf16.msra.mxu0 %v2964_v17  ;;  %v2324_v17 = vld [vmem:[%s3108_s20 + $0xe9] sm:$0xff] }
  0x5a   : > { %2709 = vmatprep.subr.bf16.mxu0 %v3011_v1 }
  0x5b   : > { %2744 = vmatpush3.bf16.msra.mxu1 %v2967_v20  ;;  %v1128_v20 = vpack.c.bf16 %v2324_v17, %v2323_v16 }
  0x5c   : > { %2654 = vmatmul.mubr.bf16.gmra.mxu0 %v591_v21  ;;  %2745 = vmatprep.subr.bf16.mxu1 %v3011_v1  ;;  %v2986_v21 = vld [vmem:[%s3914_s1 + $0x198] sm:$0xff]  }
  0x5d   : > { %2690 = vmatmul.mubr.bf16.gmra.mxu1 %v770_v22  ;;  %2710 = vmatpush3.bf16.msra.mxu0 %v2966_v23  ;;  %v2988_v22 = vld [vmem:[%s3914_s1 + $0x1d8] sm:$0xff]   ;;  %v2292_v23 = vld [vmem:[%s3108_s20 + $0x150] sm:$0xff] }
  0x5e   : > { %2657 = vmatprep.mubr.msk.bf16.mxu0 %vm3012_vm0, %v3011_v1  ;;  %2693 = vmatprep.mubr.msk.bf16.mxu1 %vm3012_vm0, %v3011_v1 }
  0x5f   : > { %2711 = vmatprep.subr.bf16.mxu0 %v3011_v1  ;;  %2746 = vmatpush3.bf16.msra.mxu1 %v2969_v24  ;;  %v2293_v24 = vld [vmem:[%s3108_s20 + $0x158] sm:$0xff] }
  0x60   : > { %2747 = vmatprep.subr.bf16.mxu1 %v3011_v1 }
  0x61   : > { %2712 = vmatpush3.bf16.msra.mxu0 %v2968_v26  ;;  %v2325_v26 = vld [vmem:[%s3108_s20 + $0xf1] sm:$0xff] }
  0x62   : > { %2713 = vmatprep.subr.bf16.mxu0 %v3011_v1 }
  0x63   : > { %2748 = vmatpush3.bf16.msra.mxu1 %v2971_v28  ;;  %v2990_v28 = vld [vmem:[%s3914_s1 + $0x1d0] sm:$0xff]  }
  0x64   : > { %2658 = vmatmul.mubr.bf16.gmra.mxu0 %v592_v29  ;;  %2749 = vmatprep.subr.bf16.mxu1 %v3011_v1  ;;  %v951_v29 = vpack.c.bf16 %v2293_v24, %v2292_v23 }
  0x65   : > { %2694 = vmatmul.mubr.bf16.gmra.mxu1 %v771_v30  ;;  %2714 = vmatpush3.bf16.msra.mxu0 %v2970_v31  ;;  %v1129_v30 = vpack.c.bf16 %v2326_v27, %v2325_v26  ;;  %v2991_v31 = vld [vmem:[%s3914_s1 + $0x188] sm:$0xff]  }
  0x66   : > { %2661 = vmatprep.mubr.msk.bf16.mxu0 %vm3012_vm0, %v3011_v1  ;;  %2697 = vmatprep.mubr.msk.bf16.mxu1 %vm3012_vm0, %v3011_v1 }
  0x67   : > { %2715 = vmatprep.subr.bf16.mxu0 %v3011_v1  ;;  %2750 = vmatpush3.bf16.msra.mxu1 %v2972_v32  ;;  %v2992_v32 = vld [vmem:[%s3914_s1 + $0x1c8] sm:$0xff]  }
  0x68   : > { %2751 = vmatprep.subr.bf16.mxu1 %v3011_v1 }
  0x69   : > { %2716 = vmatpush3.bf16.msra.mxu0 %v2973_v33  ;;  %v2294_v33 = vld [vmem:[%s3108_s20 + $0x160] sm:$0xff] }
  0x6a   : > { %2717 = vmatprep.subr.bf16.mxu0 %v3011_v1 }
  0x6b   : > { %2752 = vmatpush3.bf16.msra.mxu1 %v2974_v36  ;;  %v2994_v36 = vld [vmem:[%s3914_s1 + $0x1c0] sm:$0xff]  }
  0x6c   : > { %2662 = vmatmul.mubr.bf16.gmra.mxu0 %v593_v39  ;;  %2753 = vmatprep.subr.bf16.mxu1 %v3011_v1  ;;  %v952_v39 = vpack.c.bf16 %v2294_v33, %v2294_v33 }
  0x6d   : > { %2698 = vmatmul.mubr.bf16.gmra.mxu1 %v772_v40  ;;  %2665 = vmatprep.mubr.msk.bf16.mxu0 %vm3012_vm0, %v3011_v1  ;;  %v1130_v40 = vpack.c.bf16 %v2327_v34, %v2327_v34 }
  0x6e   : > { %2701 = vmatprep.mubr.msk.bf16.mxu1 %vm3012_vm0, %v3011_v1  ;;  %2718 = vmatpush3.bf16.msra.mxu0 %v2975_v42  ;;  %v2376_v42 = vld [vmem:[%s3108_s20 + $0x69] sm:$0xff] }
  0x6f   : > { %2754 = vmatpush3.bf16.msra.mxu1 %v2976_v43  ;;  %2719 = vmatprep.subr.bf16.mxu0 %v3011_v1  ;;  %v2377_v43 = vld [vmem:[%s3108_s20 + $0x71] sm:$0xff] }
  0x70   : > { %2755 = vmatprep.subr.bf16.mxu1 %v3011_v1  ;;  %v1482_v44 = vpack.c.bf16 %v2377_v43, %v2376_v42 }
  0x72   : > { %2720 = vmatpush3.bf16.msra.mxu0 %v2977_v47  ;;  %v2995_v47 = vld [vmem:[%s3914_s1 + $0x238] sm:$0xff]  }
  0x73   : > { %2756 = vmatpush3.bf16.msra.mxu1 %v2978_v48  ;;  %2777 = vmatprep.subr.bf16.mxu0 %v3011_v1  ;;  %v2996_v48 = vld [vmem:[%s3914_s1 + $0x230] sm:$0xff]  }
  0x74   : > { %2666 = vmatmul.mubr.bf16.gmra.mxu0 %v594_v50  ;;  %2813 = vmatprep.subr.bf16.mxu1 %v3011_v1  ;;  %v2378_v50 = vld [vmem:[%s3108_s20 + $0x79] sm:$0xff] }
  0x75   : > { %2702 = vmatmul.mubr.bf16.gmra.mxu1 %v773_v51  ;;  %2721 = vmatprep.mubr.msk.bf16.mxu0 %vm3012_vm0, %v3011_v1  ;;  %v2379_v51 = vld [vmem:[%s3108_s20 + $0x81] sm:$0xff] }
  0x76   : > { %2757 = vmatprep.mubr.msk.bf16.mxu1 %vm3012_vm0, %v3011_v1  ;;  %v1483_v37 = vpack.c.bf16 %v2379_v51, %v2378_v50 }
  0x7c   : > { %2722 = vmatmul.mubr.bf16.vlgmr.msra.gmra.mxu0 %v948_v58  ;;  %v2384_v58 = vld [vmem:[%s3108_s20 + $0xa9] sm:$0xff] }
  0x7d   : > { %2758 = vmatmul.mubr.bf16.vlgmr.msra.gmra.mxu1 %v1126_v60  ;;  %2778 = vmatpush3.bf16.msra.mxu0 %v2979_v61  ;;  %v1651_v60 = vld [vmem:[%s3108_s20 + $0xa] sm:$0xff]  ;;  %v1652_v61 = vld [vmem:[%s3108_s20 + $0x12] sm:$0xff] }
  0x7e   : > { %2779 = vmatprep.subr.bf16.mxu0 %v3011_v1  ;;  %2725 = vmatprep.mubr.msk.bf16.mxu0 %vm3012_vm0, %v3011_v1  ;;  %v1660_v3 = vpack.c.bf16 %v1652_v61, %v1651_v60 }
  0x7f   : > { %2761 = vmatprep.mubr.msk.bf16.mxu1 %vm3012_vm0, %v3011_v1  ;;  %2814 = vmatpush3.bf16.msra.mxu1 %v2981_v62  ;;  %v1657_v62 = vld [vmem:[%s3108_s20 + $0x3a] sm:$0xff] }
  0x80   : > { %2815 = vmatprep.subr.bf16.mxu1 %v3011_v1 }
  0x81   : > { %2780 = vmatpush3.bf16.msra.mxu0 %v2980_v63  ;;  %v1658_v63 = vld [vmem:[%s3108_s20 + $0x42] sm:$0xff] }
  0x82   : > { %2781 = vmatprep.subr.bf16.mxu0 %v3011_v1  ;;  %v1663_v5 = vpack.c.bf16 %v1658_v63, %v1657_v62 }
  0x83   : > { %2816 = vmatpush3.bf16.msra.mxu1 %v2983_v8  ;;  %v1659_v8 = vld [vmem:[%s3108_s20 + $0x4a] sm:$0xff] }
  0x84   : > { %2726 = vmatmul.mubr.bf16.gmra.mxu0 %v949_v9  ;;  %2817 = vmatprep.subr.bf16.mxu1 %v3011_v1  ;;  %v1661_v9 = vpack.c.bf16 %v1654_v7, %v1653_v6 }
  0x85   : > { %2762 = vmatmul.mubr.bf16.gmra.mxu1 %v1127_v10  ;;  %2782 = vmatpush3.bf16.msra.mxu0 %v2982_v11  ;;  %v1664_v10 = vpack.c.bf16 %v1659_v8, %v1659_v8  ;;  %v1655_v11 = vld [vmem:[%s3108_s20 + $0x2a] sm:$0xff] }
  0x86   : > { %2729 = vmatprep.mubr.msk.bf16.mxu0 %vm3012_vm0, %v3011_v1  ;;  %2765 = vmatprep.mubr.msk.bf16.mxu1 %vm3012_vm0, %v3011_v1 }
  0x87   : > { %2783 = vmatprep.subr.bf16.mxu0 %v3011_v1  ;;  %2818 = vmatpush3.bf16.msra.mxu1 %v2985_v12  ;;  %v1656_v12 = vld [vmem:[%s3108_s20 + $0x32] sm:$0xff] }
  0x88   : > { %2819 = vmatprep.subr.bf16.mxu1 %v3011_v1  ;;  %v1662_v13 = vpack.c.bf16 %v1656_v12, %v1655_v11 }
  0x89   : > { %2784 = vmatpush3.bf16.msra.mxu0 %v2984_v15 }
  0x8a   : > { %2785 = vmatprep.subr.bf16.mxu0 %v3011_v1 }
  0x8b   : > { %2820 = vmatpush3.bf16.msra.mxu1 %v2987_v18 }
  0x8c   : > { %2730 = vmatmul.mubr.bf16.gmra.mxu0 %v950_v19  ;;  %2821 = vmatprep.subr.bf16.mxu1 %v3011_v1 }
  0x8d   : > { %2766 = vmatmul.mubr.bf16.gmra.mxu1 %v1128_v20  ;;  %2786 = vmatpush3.bf16.msra.mxu0 %v2986_v21 }
  0x8e   : > { %2733 = vmatprep.mubr.msk.bf16.mxu0 %vm3012_vm0, %v3011_v1  ;;  %2769 = vmatprep.mubr.msk.bf16.mxu1 %vm3012_vm0, %v3011_v1 }
  0x8f   : > { %2787 = vmatprep.subr.bf16.mxu0 %v3011_v1  ;;  %2822 = vmatpush3.bf16.msra.mxu1 %v2988_v22 }
  0x90   : > { %2823 = vmatprep.subr.bf16.mxu1 %v3011_v1 }
  0x91   : > { %2788 = vmatpush3.bf16.msra.mxu0 %v2989_v25 }
  0x92   : > { %2789 = vmatprep.subr.bf16.mxu0 %v3011_v1 }
  0x93   : > { %2824 = vmatpush3.bf16.msra.mxu1 %v2990_v28 }
  0x94   : > { %2734 = vmatmul.mubr.bf16.gmra.mxu0 %v951_v29  ;;  %2825 = vmatprep.subr.bf16.mxu1 %v3011_v1 }
  0x95   : > { %2770 = vmatmul.mubr.bf16.gmra.mxu1 %v1129_v30  ;;  %2737 = vmatprep.mubr.msk.bf16.mxu0 %vm3012_vm0, %v3011_v1 }
  0x96   : > { %2773 = vmatprep.mubr.msk.bf16.mxu1 %vm3012_vm0, %v3011_v1  ;;  %2790 = vmatpush3.bf16.msra.mxu0 %v2991_v31 }
  0x97   : > { %2826 = vmatpush3.bf16.msra.mxu1 %v2992_v32  ;;  %2791 = vmatprep.subr.bf16.mxu0 %v3011_v1 }
  0x98   : > { %2827 = vmatprep.subr.bf16.mxu1 %v3011_v1 }
  0x9a   : > { %2792 = vmatpush3.bf16.msra.mxu0 %v2993_v35 }
  0x9b   : > { %2828 = vmatpush3.bf16.msra.mxu1 %v2994_v36  ;;  %2849 = vmatprep.subr.bf16.mxu0 %v3011_v1 }
  0x9c   : > { %2738 = vmatmul.mubr.bf16.gmra.mxu0 %v952_v39  ;;  %2885 = vmatprep.subr.bf16.mxu1 %v3011_v1 }
  0x9d   : > { %2774 = vmatmul.mubr.bf16.gmra.mxu1 %v1130_v40  ;;  %2793 = vmatprep.mubr.msk.bf16.mxu0 %vm3012_vm0, %v3011_v1 }
  0x9e   : > { %2829 = vmatprep.mubr.msk.bf16.mxu1 %vm3012_vm0, %v3011_v1 }
  0xa4   : > { %2794 = vmatmul.mubr.bf16.vlgmr.msra.gmra.mxu0 %v1304_v41  ;;  %v2998_v41 = vld [vmem:[%s3914_s1 + $0x220] sm:$0xff]  }
  0xa5   : > { %2830 = vmatmul.mubr.bf16.vlgmr.msra.gmra.mxu1 %v1482_v44  ;;  %2850 = vmatpush3.bf16.msra.mxu0 %v2995_v47 }
  0xa6   : > { %2851 = vmatprep.subr.bf16.mxu0 %v3011_v1  ;;  %2797 = vmatprep.mubr.msk.bf16.mxu0 %vm3012_vm0, %v3011_v1 }
  0xa7   : > { %2833 = vmatprep.mubr.msk.bf16.mxu1 %vm3012_vm0, %v3011_v1  ;;  %2893 = vmatpush3.bf16.msra.mxu1 %v2995_v47 }
  0xa8   : > { %2886 = vmatprep.subr.bf16.mxu1 %v3011_v1 }
  0xa9   : > { %2852 = vmatpush3.bf16.msra.mxu0 %v2996_v48 }
  0xaa   : > { %2853 = vmatprep.subr.bf16.mxu0 %v3011_v1 }
  0xab   : > { %2894 = vmatpush3.bf16.msra.mxu1 %v2996_v48 }
  0xac   : > { %2798 = vmatmul.mubr.bf16.gmra.mxu0 %v1305_v49  ;;  %2887 = vmatprep.subr.bf16.mxu1 %v3011_v1  ;;  %v3000_v49 = vld [vmem:[%s3914_s1 + $0x210] sm:$0xff]  }
  0xad   : > { %2834 = vmatmul.mubr.bf16.gmra.mxu1 %v1483_v37  ;;  %2854 = vmatpush3.bf16.msra.mxu0 %v2997_v38 }
  0xae   : > { %2801 = vmatprep.mubr.msk.bf16.mxu0 %vm3012_vm0, %v3011_v1  ;;  %2837 = vmatprep.mubr.msk.bf16.mxu1 %vm3012_vm0, %v3011_v1 }
  0xaf   : > { %2855 = vmatprep.subr.bf16.mxu0 %v3011_v1  ;;  %2895 = vmatpush3.bf16.msra.mxu1 %v2997_v38 }
  0xb0   : > { %2888 = vmatprep.subr.bf16.mxu1 %v3011_v1 }
  0xb1   : > { %2856 = vmatpush3.bf16.msra.mxu0 %v2998_v41 }
  0xb2   : > { %2857 = vmatprep.subr.bf16.mxu0 %v3011_v1 }
  0xb3   : > { %2896 = vmatpush3.bf16.msra.mxu1 %v2998_v41 }
  0xb4   : > { %2802 = vmatmul.mubr.bf16.gmra.mxu0 %v1306_v59  ;;  %2889 = vmatprep.subr.bf16.mxu1 %v3011_v1  ;;  %v1303_v59 = vld [vmem:[%s3108_s20 + $0x49] sm:$0xff]  ;;  %s2902_s20 = smul.u32 72, %s3945_s16 }
  0xb5   : > { %2838 = vmatmul.mubr.bf16.gmra.mxu1 %v1484_v45  ;;  %2858 = vmatpush3.bf16.msra.mxu0 %v2999_v46  ;;  %v1308_v2 = vpack.c.bf16 %v1303_v59, %v1303_v59 }
  0xb6   : > { %2805 = vmatprep.mubr.msk.bf16.mxu0 %vm3012_vm0, %v3011_v1  ;;  %2841 = vmatprep.mubr.msk.bf16.mxu1 %vm3012_vm0, %v3011_v1  ;;  %s3742_s28 = scalar_lea.vmem %s3915_s2, %s2902_s20 }
  0xb7   : > { %2897 = vmatpush3.bf16.msra.mxu1 %v2999_v46  ;;  %2859 = vmatprep.subr.bf16.mxu0 %v3011_v1 }
  0xb8   : > { %2890 = vmatprep.subr.bf16.mxu1 %v3011_v1 }
  0xb9   : > { %2860 = vmatpush3.bf16.msra.mxu0 %v3000_v49 }
  0xba   : > { %2861 = vmatprep.subr.bf16.mxu0 %v3011_v1 }
  0xbb   : > { %2898 = vmatpush3.bf16.msra.mxu1 %v3000_v49 }
  0xbc   : > { %2806 = vmatmul.mubr.bf16.gmra.mxu0 %v1307_v4  ;;  %2891 = vmatprep.subr.bf16.mxu1 %v3011_v1  ;;  %v1486_v4 = vpack.c.bf16 %v2384_v58, %v2384_v58 }
  0xbd   : > { %2842 = vmatmul.mubr.bf16.gmra.mxu1 %v1485_v56  ;;  %2809 = vmatprep.mubr.msk.bf16.mxu0 %vm3012_vm0, %v3011_v1 }
  0xbe   : > { %2845 = vmatprep.mubr.msk.bf16.mxu1 %vm3012_vm0, %v3011_v1  ;;  %2862 = vmatpush3.bf16.msra.mxu0 %v3001_v57 }
  0xbf   : > { %2899 = vmatpush3.bf16.msra.mxu1 %v3001_v57  ;;  %2863 = vmatprep.subr.bf16.mxu0 %v3011_v1 }
  0xc0   : > { %2892 = vmatprep.subr.bf16.mxu1 %v3011_v1 }
  0xc2   : > { %2864 = vmatpush3.bf16.msra.mxu0 %v3002_v0 }
  0xc3   : > { %2900 = vmatpush3.bf16.msra.mxu1 %v3002_v0 }
  0xc4   : > { %2810 = vmatmul.mubr.bf16.gmra.mxu0 %v1308_v2 }
  0xc5   : > { %2846 = vmatmul.mubr.bf16.gmra.mxu1 %v1486_v4  ;;  %2865 = vmatprep.mubr.msk.bf16.mxu0 %vm3012_vm0, %v3011_v1 }
  0xc6   : > { %2877 = vmatprep.mubr.msk.bf16.mxu1 %vm3012_vm0, %v3011_v1 }
  0xcc   : > { %2866 = vmatmul.mubr.bf16.vlgmr.msra.gmra.mxu0 %v1660_v3 }
  0xcd   : > { %2878 = vmatmul.mubr.bf16.vlgmr.msra.gmra.mxu1 %v1663_v5  ;;  %2869 = vmatprep.mubr.msk.bf16.mxu0 %vm3012_vm0, %v3011_v1 }
  0xce   : > { %2881 = vmatprep.mubr.msk.bf16.mxu1 %vm3012_vm0, %v3011_v1 }
  0xd4   : > { %2870 = vmatmul.mubr.bf16.gmra.mxu0 %v1661_v9 }
  0xd5   : > { %2882 = vmatmul.mubr.bf16.gmra.mxu1 %v1664_v10  ;;  %2873 = vmatprep.mubr.msk.bf16.mxu0 %vm3012_vm0, %v3011_v1 }
  0xdc   : > { %2874 = vmatmul.mubr.bf16.gmra.mxu0 %v1662_v13 }
  0xec   : > { %v346_v14 = vpop.f32.mrf.mxu0 }
  0xed   : > { %v525_v15 = vpop.f32.mrf.mxu1 }
  0xee   : > { %v563_v16 = vadd.f32 %v525_v15, %v346_v14  ;;  %v2579_v17 = vpop.f32.mrf.mxu0 }
  0xef   : > { %v2615_v18 = vpop.f32.mrf.mxu1 }
  0xf0   : > { %v349_v19 = vpop.f32.mrf.mxu0 }
  0xf1   : > { %v528_v20 = vpop.f32.mrf.mxu1 }
  0xf2   : > { %v564_v21 = vadd.f32 %v528_v20, %v349_v19  ;;  %v2580_v22 = vpop.f32.mrf.mxu0 }
  0xf3   : > { %v2616_v23 = vpop.f32.mrf.mxu1 }
  0xf4   : > { %v354_v24 = vpop.f32.mrf.mxu0 }
  0xf5   : > { %v533_v25 = vpop.f32.mrf.mxu1 }
  0xf6   : > { %v565_v26 = vadd.f32 %v533_v25, %v354_v24  ;;  %v2583_v27 = vpop.f32.mrf.mxu0 }
  0xf7   : > { %v2619_v28 = vpop.f32.mrf.mxu1 }
  0xf8   : > { %v357_v29 = vpop.f32.mrf.mxu0 }
  0xf9   : > { %v536_v30 = vpop.f32.mrf.mxu1 }
  0xfa   : > { %v566_v31 = vadd.f32 %v536_v30, %v357_v29  ;;  %v2584_v32 = vpop.f32.mrf.mxu0 }
  0xfb   : > { %v2620_v33 = vpop.f32.mrf.mxu1 }
  0xfc   : > { %v362_v34 = vpop.f32.mrf.mxu0 }
  0xfd   : > { %v541_v35 = vpop.f32.mrf.mxu1 }
  0xfe   : > { %v567_v36 = vadd.f32 %v541_v35, %v362_v34  ;;  %v2587_v39 = vpop.f32.mrf.mxu0 }
  0xff   : > { %v2623_v40 = vpop.f32.mrf.mxu1 }
 0x100   : > { %v365_v42 = vpop.f32.mrf.mxu0 }
 0x101   : > { %v544_v43 = vpop.f32.mrf.mxu1 }
 0x102   : > { %v568_v44 = vadd.f32 %v544_v43, %v365_v42  ;;  %v2588_v47 = vpop.f32.mrf.mxu0 }
 0x103   : > { %v2624_v48 = vpop.f32.mrf.mxu1 }
 0x104   : > { %v370_v50 = vpop.f32.mrf.mxu0 }
 0x105   : > { %v549_v51 = vpop.f32.mrf.mxu1 }
 0x106   : > { %v569_v37 = vadd.f32 %v549_v51, %v370_v50  ;;  %v2591_v38 = vpop.f32.mrf.mxu0 }
 0x107   : > { %v2627_v41 = vpop.f32.mrf.mxu1 }
 0x108   : > { %v373_v52 = vpop.f32.mrf.mxu0 }
 0x109   : > { %v552_v53 = vpop.f32.mrf.mxu1 }
 0x10a   : > { %v570_v45 = vadd.f32 %v552_v53, %v373_v52  ;;  %v2592_v46 = vpop.f32.mrf.mxu0 }
 0x10b   : > { %v2628_v49 = vpop.f32.mrf.mxu1 }
 0x10c   : > { %v378_v54 = vpop.f32.mrf.mxu0 }
 0x10d   : > { %v557_v55 = vpop.f32.mrf.mxu1 }
 0x10e   : > { %v571_v56 = vadd.f32 %v557_v55, %v378_v54  ;;  %v2595_v57 = vpop.f32.mrf.mxu0 }
 0x10f   : > { %v2631_v59 = vpop.f32.mrf.mxu1 }
 0x110   : > { %v381_v58 = vpop.f32.mrf.mxu0 }
 0x111   : > { %v560_v0 = vpop.f32.mrf.mxu1 }
 0x112   : > { %v2596_v2 = vpop.f32.mrf.mxu0 }
 0x113   : > { %v2632_v4 = vpop.f32.mrf.mxu1 }
 0x114   : > { %v703_v60 = vpop.f32.mrf.mxu0 }
 0x115   : > { %v741_v61 = vadd.f32 %v703_v60, %v563_v16  ;;  %v882_v62 = vpop.f32.mrf.mxu1 }
 0x116   : > { %v2651_v63 = vpop.f32.mrf.mxu0 }
 0x117   : > { %v920_v3 = vadd.f32 %v882_v62, %v741_v61  ;;  %v2687_v5 = vpop.f32.mrf.mxu1 }
 0x118   : > { %v706_v6 = vpop.f32.mrf.mxu0 }
 0x119   : > { %v742_v7 = vadd.f32 %v706_v6, %v564_v21  ;;  %v885_v8 = vpop.f32.mrf.mxu1 }
 0x11a   : > { %v2652_v9 = vpop.f32.mrf.mxu0 }
 0x11b   : > { %v921_v10 = vadd.f32 %v885_v8, %v742_v7  ;;  %v2688_v11 = vpop.f32.mrf.mxu1 }
 0x11c   : > { %v711_v12 = vpop.f32.mrf.mxu0 }
 0x11d   : > { %v743_v13 = vadd.f32 %v711_v12, %v565_v26  ;;  %v890_v14 = vpop.f32.mrf.mxu1 }
 0x11e   : > { %v2655_v15 = vpop.f32.mrf.mxu0 }
 0x11f   : > { %v922_v17 = vadd.f32 %v890_v14, %v743_v13  ;;  %v2691_v18 = vpop.f32.mrf.mxu1 }
 0x120   : > { %v714_v19 = vpop.f32.mrf.mxu0 }
 0x121   : > { %v744_v20 = vadd.f32 %v714_v19, %v566_v31  ;;  %v893_v22 = vpop.f32.mrf.mxu1 }
 0x122   : > { %v2656_v16 = vpop.f32.mrf.mxu0 }
 0x123   : > { %v923_v23 = vadd.f32 %v893_v22, %v744_v20  ;;  %v2692_v24 = vpop.f32.mrf.mxu1 }
 0x124   : > { %v719_v25 = vpop.f32.mrf.mxu0 }
 0x125   : > { %v745_v27 = vadd.f32 %v719_v25, %v567_v36  ;;  %v898_v28 = vpop.f32.mrf.mxu1 }
 0x126   : > { %v2659_v21 = vpop.f32.mrf.mxu0 }
 0x127   : > { %v924_v29 = vadd.f32 %v898_v28, %v745_v27  ;;  %v2695_v30 = vpop.f32.mrf.mxu1 }
 0x128   : > { %v722_v32 = vpop.f32.mrf.mxu0 }
 0x129   : > { %v746_v33 = vadd.f32 %v722_v32, %v568_v44  ;;  %v901_v34 = vpop.f32.mrf.mxu1 }
 0x12a   : > { %v2660_v26 = vpop.f32.mrf.mxu0 }
 0x12b   : > { %v925_v35 = vadd.f32 %v901_v34, %v746_v33  ;;  %v2696_v39 = vpop.f32.mrf.mxu1 }
 0x12c   : > { %v727_v40 = vpop.f32.mrf.mxu0 }
 0x12d   : > { %v747_v42 = vadd.f32 %v727_v40, %v569_v37  ;;  %v906_v43 = vpop.f32.mrf.mxu1 }
 0x12e   : > { %v2663_v31 = vpop.f32.mrf.mxu0 }
 0x12f   : > { %v3562_v47 = vadd.f32 %v906_v43, %v747_v42  ;;  %v2699_v48 = vpop.f32.mrf.mxu1 }
 0x130   : > { %v730_v50 = vpop.f32.mrf.mxu0 }
 0x131   : > { %v748_v51 = vadd.f32 %v730_v50, %v570_v45  ;;  %v909_v36 = vpop.f32.mrf.mxu1 }
 0x132   : > { %v2664_v38 = vpop.f32.mrf.mxu0 }
 0x133   : > { %v3564_v41 = vadd.f32 %v909_v36, %v748_v51  ;;  %v2700_v52 = vpop.f32.mrf.mxu1 }
 0x134   : > { %v735_v53 = vpop.f32.mrf.mxu0 }
 0x135   : > { %v749_v44 = vadd.f32 %v735_v53, %v571_v56  ;;  %v914_v46 = vpop.f32.mrf.mxu1 }
 0x136   : > { %v2667_v49 = vpop.f32.mrf.mxu0 }
 0x137   : > { %v3566_v54 = vadd.f32 %v914_v46, %v749_v44  ;;  %v2703_v55 = vpop.f32.mrf.mxu1  ;;  %v1847_v44 = vlaneseq }
 0x138   : > { %v738_v37 = vpop.f32.mrf.mxu0 }
 0x139   : > { %v917_v57 = vpop.f32.mrf.mxu1 }
 0x13a   : > { %v2668_v59 = vpop.f32.mrf.mxu0  ;;  %v1848_v57 = vshrl.u32 %v1847_v44, 7 }
 0x13b   : > { %v2704_v58 = vpop.f32.mrf.mxu1 }
 0x13c   : > { %v1061_v0 = vpop.f32.mrf.mxu0 }
 0x13d   : > { %v1099_v2 = vadd.f32 %v1061_v0, %v920_v3  ;;  %v1239_v4 = vpop.f32.mrf.mxu1  ;;  %v1849_v0 = vadd.s32 8, %v1848_v57 }
 0x13e   : > { %v2723_v45 = vpop.f32.mrf.mxu0 }
 0x13f   : > { %v3568_v60 = vadd.f32 %v1239_v4, %v1099_v2  ;;  %v2759_v61 = vpop.f32.mrf.mxu1 }
 0x140   : > { %v1064_v62 = vpop.f32.mrf.mxu0  ;;  %v3600_v45 = vmul.u32.u64.low 3817748708, %v1848_v57  ;;  %v3601_v61 = vmul.u32.u64.high 3817748708, %v1848_v57, %v3600_v45 }
 0x141   : > { %v1100_v63 = vadd.f32 %v1064_v62, %v921_v10  ;;  %v1242_v5 = vpop.f32.mrf.mxu1  ;;  %v3648_v45 = vadd.s32 40, %v1848_v57 }
 0x142   : > { %v2724_v56 = vpop.f32.mrf.mxu0 }
 0x143   : > { %v3570_v6 = vadd.f32 %v1242_v5, %v1100_v63  ;;  %v2760_v7 = vpop.f32.mrf.mxu1  ;;  %v3607_v5 = vmul.u32.u64.low 3817748708, %v1849_v0  ;;  %v3608_v56 = vmul.u32.u64.high 3817748708, %v1849_v0, %v3607_v5 }
 0x144   : > { %v1069_v8 = vpop.f32.mrf.mxu0  ;;  %v1850_v7 = vadd.s32 16, %v1848_v57 }
 0x145   : > { %v1101_v9 = vadd.f32 %v1069_v8, %v922_v17  ;;  %v1247_v11 = vpop.f32.mrf.mxu1 }
 0x146   : > { %v2727_v12 = vpop.f32.mrf.mxu0 }
 0x147   : > { %v3572_v13 = vadd.f32 %v1247_v11, %v1101_v9  ;;  %v2763_v14 = vpop.f32.mrf.mxu1  ;;  %v1854_v11 = vadd.s32 48, %v1848_v57 }
 0x148   : > { %v1072_v3 = vpop.f32.mrf.mxu0 }
 0x149   : > { %v1102_v15 = vadd.f32 %v1072_v3, %v923_v23  ;;  %v1250_v18 = vpop.f32.mrf.mxu1 }
 0x14a   : > { %v2728_v19 = vpop.f32.mrf.mxu0 }
 0x14b   : > { %v3574_v20 = vadd.f32 %v1250_v18, %v1102_v15  ;;  %v2764_v22 = vpop.f32.mrf.mxu1  ;;  %v3614_v3 = vmul.u32.u64.low 3817748708, %v1850_v7  ;;  %v3615_v15 = vmul.u32.u64.high 3817748708, %v1850_v7, %v3614_v3  ;;  %v3617_v19 = vadd.s32 24, %v1848_v57 }
 0x14c   : > { %v1077_v10 = vpop.f32.mrf.mxu0 }
 0x14d   : > { %v1103_v16 = vadd.f32 %v1077_v10, %v924_v29  ;;  %v1255_v24 = vpop.f32.mrf.mxu1  ;;  %v1863_v10 = vshrl.u32 %v3601_v61, 3 }
 0x14e   : > { %v2731_v25 = vpop.f32.mrf.mxu0 }
 0x14f   : > { %v3576_v27 = vadd.f32 %v1255_v24, %v1103_v16  ;;  %v2767_v28 = vpop.f32.mrf.mxu1  ;;  %v3620_v16 = vmul.u32.u64.low 3817748708, %v1854_v11  ;;  %v3621_v24 = vmul.u32.u64.high 3817748708, %v1854_v11, %v3620_v16 }
 0x150   : > { %v1080_v17 = vpop.f32.mrf.mxu0 }
 0x151   : > { %v1104_v21 = vadd.f32 %v1080_v17, %v925_v35  ;;  %v1258_v30 = vpop.f32.mrf.mxu1  ;;  %v1874_v17 = vshrl.u32 %v3608_v56, 3  ;;  %v1929_v44 = vshrl.u32 %v3621_v24, 3 }
 0x152   : > { %v2732_v32 = vpop.f32.mrf.mxu0 }
 0x153   : > { %v3578_v33 = vadd.f32 %v1258_v30, %v1104_v21  ;;  %v2768_v34 = vpop.f32.mrf.mxu1  ;;  %v3629_v30 = vmul.u32.u64.low 3817748708, %v3617_v19  ;;  %v3630_v32 = vmul.u32.u64.high 3817748708, %v3617_v19, %v3629_v30 }
 0x154   : > { %v3580_v23 = vpop.f32.mrf.mxu0 }
 0x155   : > { %v3582_v26 = vpop.f32.mrf.mxu1 }
 0x156   : > { %v2735_v39 = vpop.f32.mrf.mxu0 }
 0x157   : > { %v2771_v40 = vpop.f32.mrf.mxu1  ;;  %v1864_v39 = vmul.u32 9, %v1863_v10 }
 0x158   : > { %v3584_v42 = vpop.f32.mrf.mxu0  ;;  %v3632_v40 = vadd.s32 32, %v1848_v57 }
 0x159   : > { %v3586_v29 = vpop.f32.mrf.mxu1 }
 0x15a   : > { %v2736_v43 = vpop.f32.mrf.mxu0 }
 0x15b   : > { %v2772_v31 = vpop.f32.mrf.mxu1 }
 0x15c   : > { %v3588_v48 = vpop.f32.mrf.mxu0 }
 0x15d   : > { %v3590_v35 = vpop.f32.mrf.mxu1 }
 0x15e   : > { %v2739_v50 = vpop.f32.mrf.mxu0 }
 0x15f   : > { %v2775_v51 = vpop.f32.mrf.mxu1  ;;  %v1875_v50 = vmul.u32 9, %v1874_v17 }
 0x160   : > { %v1096_v36 = vpop.f32.mrf.mxu0  ;;  %v3638_v51 = vadd.s32 56, %v1848_v57 }
 0x161   : > { %v1274_v38 = vpop.f32.mrf.mxu1  ;;  %v1885_v36 = vshrl.u32 %v3615_v15, 3  ;;  %v1876_v5 = vsub.s32 %v1849_v0, %v1875_v50  ;;  %v1896_v15 = vshrl.u32 %v3630_v32, 3  ;;  %v1105_v32 = vadd.f32 %v3580_v23, %v3562_v47 }
 0x162   : > { %v2740_v52 = vpop.f32.mrf.mxu0  ;;  %v3662_v24 = vmul.u32.u64.low 3817748708, %v3648_v45  ;;  %v3663_v0 = vmul.u32.u64.high 3817748708, %v3648_v45, %v3662_v24 }
 0x163   : > { %v2776_v53 = vpop.f32.mrf.mxu1  ;;  %vm1957_vm3 = vcmp.ne.s32.totalorder %v1876_v5, 0  ;;  %vm1966_vm4 = vcmp.lt.s32.totalorder %v1876_v5, 0  ;;  %v1897_v50 = vmul.u32 9, %v1896_v15 }
 0x164   : > { %v3592_v46 = vpop.f32.mrf.mxu0  ;;  %v1865_v53 = vsub.s32 %v1848_v57, %v1864_v39  ;;  %vm3681_vm6 = vmand %vm1966_vm4, %vm1957_vm3 }
 0x165   : > { %v3594_v49 = vpop.f32.mrf.mxu1  ;;  %v1455_v15 = vadd.f32 %v3592_v46, %v3568_v60 }
 0x166   : > { %v2795_v55 = vpop.f32.mrf.mxu0  ;;  %vm1956_vm1 = vcmp.ne.s32.totalorder %v1865_v53, 0  ;;  %vm1965_vm2 = vcmp.lt.s32.totalorder %v1865_v53, 0 }
 0x167   : > { %v2831_v37 = vpop.f32.mrf.mxu1  ;;  %vm3672_vm5 = vmand %vm1965_vm2, %vm1956_vm1 }
 0x168   : > { %v3596_v59 = vpop.f32.mrf.mxu0  ;;  %v3643_v55 = vmul.u32.u64.low 3817748708, %v3632_v40  ;;  %v3644_v37 = vmul.u32.u64.high 3817748708, %v3632_v40, %v3643_v55 }
 0x169   : > { %v3598_v58 = vpop.f32.mrf.mxu1  ;;  %v1456_v39 = vadd.f32 %v3596_v59, %v3570_v6 }
 0x16a   : > { %v2796_v2 = vpop.f32.mrf.mxu0 }
 0x16b   : > { %v2832_v4 = vpop.f32.mrf.mxu1 }
 0x16c   : > { %v3603_v62 = vpop.f32.mrf.mxu0  ;;  %v3646_v4 = vadd.s32 64, %v1848_v57 }
 0x16d   : > { %v3605_v63 = vpop.f32.mrf.mxu1 }
 0x16e   : > { %v2799_v8 = vpop.f32.mrf.mxu0  ;;  %v3658_v16 = vmul.u32.u64.low 3817748708, %v3646_v4  ;;  %v3659_v57 = vmul.u32.u64.high 3817748708, %v3646_v4, %v3658_v16 }
 0x16f   : > { %v2835_v9 = vpop.f32.mrf.mxu1  ;;  %v3653_v56 = vmul.u32.u64.low 3817748708, %v3638_v51  ;;  %v3654_v8 = vmul.u32.u64.high 3817748708, %v3638_v51, %v3653_v56 }
 0x170   : > { %v3610_v12 = vpop.f32.mrf.mxu0  ;;  %v1886_v9 = vmul.u32 9, %v1885_v36 }
 0x171   : > { %v3612_v14 = vpop.f32.mrf.mxu1  ;;  %v1940_v56 = vshrl.u32 %v3654_v8, 3 }
 0x172   : > { %v2800_v18 = vpop.f32.mrf.mxu0  ;;  %v3667_v30 = vsub.s32 %v1850_v7, %v1886_v9 }
 0x173   : > { %v2836_v22 = vpop.f32.mrf.mxu1  ;;  %v1941_v46 = vmul.u32 9, %v1940_v56 }
 0x174   : > { %v3623_v25 = vpop.f32.mrf.mxu0  ;;  %v1930_v22 = vmul.u32 9, %v1929_v44  ;;  %v1907_v44 = vshrl.u32 %v3644_v37, 3  ;;  %vm1958_vm7 = vcmp.ne.s32.totalorder %v3667_v30, 0  ;;  %v1106_v37 = vadd.f32 %v3584_v42, %v3564_v41 }
 0x175   : > { %v3625_v28 = vpop.f32.mrf.mxu1  ;;  %vm1967_vm8 = vcmp.lt.s32.totalorder %v3667_v30, 0  ;;  %v1985_v41 = vadd.s32 9, %v3667_v30  ;;  %v1918_v42 = vshrl.u32 %v3663_v0, 3  ;;  %v1107_v0 = vadd.f32 %v3588_v48, %v3566_v54 }
 0x176   : > { %v2803_v21 = vpop.f32.mrf.mxu0  ;;  %v1908_v8 = vmul.u32 9, %v1907_v44  ;;  %vm3718_vm12 = vmand %vm1967_vm8, %vm1958_vm7  ;;  %v1284_v24 = vadd.f32 %v3586_v29, %v1106_v37 }
 0x177   : > { %v2839_v34 = vpop.f32.mrf.mxu1  ;;  %v1983_v21 = vadd.s32 9, %v1865_v53  ;;  %v1919_v6 = vmul.u32 9, %v1918_v42 }
 0x178   : > { %v3634_v43 = vpop.f32.mrf.mxu0  ;;  %v3736_v29 = vsub.s32 %v3632_v40, %v1908_v8 }
 0x179   : > { %v3636_v31 = vpop.f32.mrf.mxu1  ;;  %v1992_v23 = vsel %vm3672_vm5, %v1983_v21, %v1865_v53 }
 0x17a   : > { %v2804_v38 = vpop.f32.mrf.mxu0  ;;  %vm3707_vm11 = vcmp.lt.s32.totalorder %v1992_v23, 8  ;;  %vm1960_vm3 = vcmp.ne.s32.totalorder %v3736_v29, 0  ;;  %vm1969_vm4 = vcmp.lt.s32.totalorder %v3736_v29, 0 }
 0x17b   : > { %v2840_v52 = vpop.f32.mrf.mxu1  ;;  %v3676_v38 = vsub.s32 %v1854_v11, %v1930_v22  ;;  %v1283_v11 = vadd.f32 %v3582_v26, %v1105_v32  ;;  %v2433_v40 = vsel %vm3707_vm11, 1.0, %v3011_v1 }
 0x17c   : > { %v1441_v2 = vpop.f32.mrf.mxu0  ;;  %v1984_v52 = vadd.s32 9, %v1876_v5 }
 0x17d   : > { %v3650_v61 = vpop.f32.mrf.mxu1  ;;  %vm1962_vm9 = vcmp.ne.s32.totalorder %v3676_v38, 0  ;;  %v1461_v26 = vadd.f32 %v1441_v2, %v1283_v11  ;;  %vm1971_vm10 = vcmp.lt.s32.totalorder %v3676_v38, 0  ;;  %v3712_v60 = vadd.s32 9, %v3676_v38 }
 0x17e   : > { %v2807_v3 = vpop.f32.mrf.mxu0  ;;  %v1993_v53 = vsel %vm3681_vm6, %v1984_v52, %v1876_v5  ;;  %v1951_v5 = vshrl.u32 %v3659_v57, 3  ;;  %vm3754_vm0 = vmand %vm1971_vm10, %vm1962_vm9  ;;  %v1285_v52 = vadd.f32 %v3590_v35, %v1107_v0  ;;  %v1634_v11 = vadd.f32 %v3598_v58, %v1456_v39 }
 0x17f   : > { %v2843_v18 = vpop.f32.mrf.mxu1  ;;  %v3696_v3 = vsub.s32 %v3617_v19, %v1897_v50  ;;  %vm3726_vm13 = vcmp.lt.s32.totalorder %v1993_v53, 8  ;;  %v1639_v54 = vadd.f32 %v3650_v61, %v1461_v26  ;;  %v1457_v35 = vadd.f32 %v3603_v62, %v3572_v13  ;;  %vm3818_vm6 = vmand %vm1969_vm4, %vm1960_vm3 }
 0x180   : > { %v1444_v10 = vpop.f32.mrf.mxu0  ;;  %v2434_v23 = vsel %vm3726_vm13, 1.0, %v3011_v1  ;;  %v1952_v56 = vmul.u32 9, %v1951_v5  ;;  %v3791_v13 = vsub.s32 %v3648_v45, %v1919_v6  ;;  %v1998_v62 = vsel %vm3754_vm0, %v3712_v60, %v3676_v38 }
 0x181   : > { %v3665_v17 = vpop.f32.mrf.mxu1  ;;  %vm1959_vm14 = vcmp.ne.s32.totalorder %v3696_v3, 0  ;;  %vm1968_vm15 = vcmp.lt.s32.totalorder %v3696_v3, 0  ;;  %v1462_v48 = vadd.f32 %v1444_v10, %v1284_v24  ;;  %v3759_v10 = vsub.s32 %v3638_v51, %v1941_v46 }
 0x182   : > { %v2808_v34 = vpop.f32.mrf.mxu0  ;;  %vm3772_vm1 = vmand %vm1968_vm15, %vm1959_vm14  ;;  %v3804_v45 = vsub.s32 %v3646_v4, %v1952_v56  ;;  %v1635_v42 = vadd.f32 %v3605_v63, %v1457_v35  ;;  %v1458_v38 = vadd.f32 %v3610_v12, %v3574_v20  ;;  %vm1961_vm8 = vcmp.ne.s32.totalorder %v3791_v13, 0 }
 0x183   : > { %v2844_v36 = vpop.f32.mrf.mxu1  ;;  %v1633_v34 = vadd.f32 %v3594_v49, %v1455_v15  ;;  %v1994_v49 = vsel %vm3718_vm12, %v1985_v41, %v3667_v30  ;;  %v1986_v30 = vadd.s32 9, %v3696_v3  ;;  %v1640_v15 = vadd.f32 %v3665_v17, %v1462_v48 }
 0x184   : > { %v3679_v55 = vpop.f32.mrf.mxu0  ;;  %vm3780_vm2 = vcmp.lt.s32.totalorder %v1994_v49, 8  ;;  %vm1963_vm5 = vcmp.ne.s32.totalorder %v3759_v10, 0  ;;  %v1987_v41 = vadd.s32 9, %v3736_v29  ;;  %vm1970_vm9 = vcmp.lt.s32.totalorder %v3791_v13, 0 }
 0x185   : > { %v3685_v47 = vpop.f32.mrf.mxu1  ;;  %vm1972_vm10 = vcmp.lt.s32.totalorder %v3759_v10, 0  ;;  %v1988_v32 = vadd.s32 9, %v3791_v13  ;;  %v1459_v39 = vadd.f32 %v3623_v25, %v3576_v27  ;;  %vm3846_vm11 = vmand %vm1970_vm9, %vm1961_vm8  ;;  %vm1964_vm12 = vcmp.ne.s32.totalorder %v3804_v45, 0 }
 0x186   : > { %v2811_v9 = vpop.f32.mrf.mxu0  ;;  %vm1973_vm13 = vcmp.lt.s32.totalorder %v3804_v45, 0  ;;  %vm3862_vm14 = vmand %vm1972_vm10, %vm1963_vm5 }
 0x187   : > { %v2847_v18 = vpop.f32.mrf.mxu1  ;;  %vm3877_vm0 = vmand %vm1973_vm13, %vm1964_vm12 }
 0x188   : > { %v1452_v22 = vpop.f32.mrf.mxu0  ;;  %v1463_v18 = vadd.f32 %v3679_v55, %v1285_v52  ;;  %v1995_v55 = vsel %vm3772_vm1, %v1986_v30, %v3696_v3  ;;  %v2435_v3 = vsel %vm3780_vm2, 1.0, %v3011_v1  ;;  %v1997_v30 = vsel %vm3846_vm11, %v1988_v32, %v3791_v13 }
 0x189   : > { %v1630_v19 = vpop.f32.mrf.mxu1  ;;  %vm3825_vm7 = vcmp.lt.s32.totalorder %v1995_v55, 8  ;;  %v1637_v52 = vadd.f32 %v3625_v28, %v1459_v39  ;;  %vm2007_vm1 = vcmp.lt.s32.totalorder %v1998_v62, 8  ;;  %vm2006_vm2 = vcmp.lt.s32.totalorder %v1997_v30, 8 }
 0x18a   : > { %v2812_v21 = vpop.f32.mrf.mxu0  ;;  %v1641_v63 = vadd.f32 %v3685_v47, %v1463_v18 }
 0x18b   : > { %v2848_v50 = vpop.f32.mrf.mxu1  ;;  %v1996_v21 = vsel %vm3818_vm6, %v1987_v41, %v3736_v29  ;;  %v1990_v29 = vadd.s32 9, %v3759_v10 }
 0x18c   : > { %v1773_v57 = vpop.f32.mrf.mxu0  ;;  %vm2005_vm15 = vcmp.lt.s32.totalorder %v1996_v21, 8 }
 0x18d   : > { %v1811_v59 = vadd.f32 %v1773_v57, %v1633_v34  ;;  %v1797_v36 = vpop.f32.mrf.mxu1  ;;  %v1636_v34 = vadd.f32 %v3612_v14, %v1458_v38  ;;  %v2436_v14 = vsel %vm3825_vm7, 1.0, %v3011_v1  ;;  %v1999_v28 = vsel %vm3862_vm14, %v1990_v29, %v3759_v10 }
 0x18e   : > { %v3763_v44 = vadd.f32 %v1797_v36, %v1639_v54  ;;  %v2867_v7 = vpop.f32.mrf.mxu0  ;;  %v1991_v36 = vadd.s32 9, %v3804_v45  ;;  %vm2008_vm3 = vcmp.lt.s32.totalorder %v1999_v28, 8  ;;  %v2439_v10 = vsel %vm2007_vm1, 1.0, %v3011_v1 }
 0x18f   : > { %1838 = vst [vmem:[%s3742_s28] sm:$0xff] %v1811_v59  ;;  %v2879_v37 = vpop.f32.mrf.mxu1  ;;  %v2028_v58 = vmul.f32 %v2433_v40, %v1811_v59  ;;  %v1460_v7 = vadd.f32 %v3634_v43, %v3578_v33  ;;  %v2437_v33 = vsel %vm2005_vm15, 1.0, %v3011_v1  ;;  %v2440_v41 = vsel %vm2008_vm3, 1.0, %v3011_v1 }
 0x190   : > { %1844 = vst [vmem:[%s3742_s28 + $0x30] sm:$0xff] %v3763_v44  ;;  %v1776_v53 = vpop.f32.mrf.mxu0 }
 0x191   : > { %v1812_v8 = vadd.f32 %v1776_v53, %v1634_v11  ;;  %v1800_v17 = vpop.f32.mrf.mxu1  ;;  %v2052_v60 = vmul.f32 %v2028_v58, %v1811_v59  ;;  %v1638_v53 = vadd.f32 %v3636_v31, %v1460_v7 }
 0x192   : > { %v3800_v26 = vadd.f32 %v1800_v17, %v1640_v15  ;;  %v2868_v22 = vpop.f32.mrf.mxu0  ;;  %v2000_v15 = vsel %vm3877_vm0, %v1991_v36, %v3804_v45 }
 0x193   : > { %1839 = vst [vmem:[%s3742_s28 + $0x8] sm:$0xff] %v1812_v8  ;;  %v2029_v19 = vmul.f32 %v2434_v23, %v1812_v8  ;;  %v2880_v16 = vpop.f32.mrf.mxu1  ;;  %vm2009_vm4 = vcmp.lt.s32.totalorder %v2000_v15, 8 }
 0x194   : > { %1845 = vst [vmem:[%s3742_s28 + $0x38] sm:$0xff] %v3800_v26  ;;  %v1781_v20 = vpop.f32.mrf.mxu0  ;;  %v2035_v16 = vmul.f32 %v2440_v41, %v3800_v26 }
 0x195   : > { %v2037_v46 = vadd.f32 %v2029_v19, %v2028_v58  ;;  %v2053_v2 = vmul.f32 %v2029_v19, %v1812_v8  ;;  %v1813_v5 = vadd.f32 %v1781_v20, %v1635_v42  ;;  %v1805_v24 = vpop.f32.mrf.mxu1  ;;  %v2438_v8 = vsel %vm2006_vm2, 1.0, %v3011_v1 }
 0x196   : > { %v3832_v47 = vadd.f32 %v1805_v24, %v1641_v63  ;;  %v2871_v0 = vpop.f32.mrf.mxu0  ;;  %v2034_v42 = vmul.f32 %v2439_v10, %v3763_v44  ;;  %v2441_v19 = vsel %vm2009_vm4, 1.0, %v3011_v1 }
 0x197   : > { %v2061_v50 = vadd.f32 %v2053_v2, %v2052_v60  ;;  %1840 = vst [vmem:[%s3742_s28 + $0x10] sm:$0xff] %v1813_v5  ;;  %v2030_v54 = vmul.f32 %v2435_v3, %v1813_v5  ;;  %v2883_v57 = vpop.f32.mrf.mxu1 }
 0x198   : > { %1846 = vst [vmem:[%s3742_s28 + $0x40] sm:$0xff] %v3832_v47  ;;  %v1784_v27 = vpop.f32.mrf.mxu0  ;;  %v2058_v63 = vmul.f32 %v2034_v42, %v3763_v44  ;;  %v2036_v20 = vmul.f32 %v2441_v19, %v3832_v47 }
 0x199   : > { %v2038_v49 = vadd.f32 %v2037_v46, %v2030_v54  ;;  %v2054_v6 = vmul.f32 %v2030_v54, %v1813_v5  ;;  %v1814_v59 = vadd.f32 %v1784_v27, %v1636_v34  ;;  %v1808_v40 = vpop.f32.mrf.mxu1  ;;  %v2059_v46 = vmul.f32 %v2035_v16, %v3800_v26 }
 0x19a   : > { %v2872_v61 = vpop.f32.mrf.mxu0  ;;  %v2060_v24 = vmul.f32 %v2036_v20, %v3832_v47 }
 0x19b   : > { %v2062_v23 = vadd.f32 %v2061_v50, %v2054_v6  ;;  %1841 = vst [vmem:[%s3742_s28 + $0x18] sm:$0xff] %v1814_v59  ;;  %v2031_v51 = vmul.f32 %v2436_v14, %v1814_v59  ;;  %v2884_v11 = vpop.f32.mrf.mxu1 }
 0x19c   : > { %v1789_v35 = vpop.f32.mrf.mxu0 }
 0x19d   : > { %v2039_v43 = vadd.f32 %v2038_v49, %v2031_v51  ;;  %v2055_v37 = vmul.f32 %v2031_v51, %v1814_v59  ;;  %v1815_v9 = vadd.f32 %v1789_v35, %v1637_v52 }
 0x19e   : > { %v2875_v18 = vpop.f32.mrf.mxu0 }
 0x19f   : > { %v2063_v13 = vadd.f32 %v2062_v23, %v2055_v37  ;;  %1842 = vst [vmem:[%s3742_s28 + $0x20] sm:$0xff] %v1815_v9  ;;  %v2032_v58 = vmul.f32 %v2437_v33, %v1815_v9 }
 0x1a0   : > { %v1792_v62 = vpop.f32.mrf.mxu0 }
 0x1a1   : > { %v2040_v17 = vadd.f32 %v2039_v43, %v2032_v58  ;;  %v2056_v55 = vmul.f32 %v2032_v58, %v1815_v9  ;;  %v1816_v22 = vadd.f32 %v1792_v62, %v1638_v53 }
 0x1a2   : > { %v2876_v45 = vpop.f32.mrf.mxu0 }
 0x1a3   : > { %v2064_v31 = vadd.f32 %v2063_v13, %v2056_v55  ;;  %1843 = vst [vmem:[%s3742_s28 + $0x28] sm:$0xff] %v1816_v22  ;;  %v2033_v38 = vmul.f32 %v2438_v8, %v1816_v22 }
 0x1a5   : > { %v2041_v3 = vadd.f32 %v2040_v17, %v2033_v38  ;;  %v2057_v4 = vmul.f32 %v2033_v38, %v1816_v22 }
 0x1a7   : > { %v2042_v12 = vadd.f32 %v2041_v3, %v2034_v42  ;;  %v2065_v60 = vadd.f32 %v2064_v31, %v2057_v4 }
 0x1a9   : > { %v2043_v2 = vadd.f32 %v2042_v12, %v2035_v16  ;;  %v2066_v5 = vadd.f32 %v2065_v60, %v2058_v63 }
 0x1ab   : > { %v2044_v0 = vadd.f32 %v2043_v2, %v2036_v20  ;;  %v2067_v1 = vadd.f32 %v2066_v5, %v2059_v46 }
 0x1ad   : > { %v2045_v21 = vrot.slane %v2044_v0, 4  ;;  %v2068_v32 = vadd.f32 %v2067_v1, %v2060_v24 }
 0x1af   : > { %v2046_v34 = vadd.f32 %v2045_v21, %v2044_v0  ;;  %v2069_v39 = vrot.slane %v2068_v32, 4 }
 0x1b1   : > { %v2047_v50 = vrot.slane %v2046_v34, 2  ;;  %v2070_v44 = vadd.f32 %v2069_v39, %v2068_v32 }
 0x1b3   : > { %v2048_v54 = vadd.f32 %v2047_v50, %v2046_v34  ;;  %v2071_v48 = vrot.slane %v2070_v44, 2 }
 0x1b5   : > { %v2049_v57 = vrot.slane %v2048_v54, 1  ;;  %v2072_v29 = vadd.f32 %v2071_v48, %v2070_v44 }
 0x1b7   : > { %v2050_v26 = vadd.f32 %v2049_v57, %v2048_v54  ;;  %v2073_v27 = vrot.slane %v2072_v29, 1 }
 0x1b9   : > { %2051 = vst [vmem:[%s211_s5] sm:$0x1] %v2050_v26  ;;  %v2074_v47 = vadd.f32 %v2073_v27, %v2072_v29 }
 0x1bb   : > { %2075 = vst [vmem:[%s214_s8] sm:$0x1] %v2074_v47 }
 0x1bc PF: > { %s15_s15 = sadd.s32 1, %s3009_s15  }
 0x1bd   : > { %p12_p4 = scmp.ge.s32.totalorder %s15_s15, 4  }
 0x1bf   :  { %14 = sbr.rel (!%p12_p4) target bundleno = 1 (0x1), region = 93 }

// kernel: basic_block_forward.9
= control target key start
LH: loop header
LB: loop body
LE: loop exit
PB: predicated region body
PF: predicated region fallthrough
CT: control target
= control target key end

     0   :  { %s528_s21 = smov 0   ;;  %s649_s0 = inlined_call_operand.vmem [shape: f32[160,128], index: 0, kind: input, shape index: {}]   ;;  %s650_s1 = inlined_call_operand.vmem [shape: f32[160,128], index: 1, kind: input, shape index: {}]   ;;  %s651_s2 = inlined_call_operand.vmem [shape: f32[1,128], index: 2, kind: input, shape index: {}]   ;;  %s652_s3 = inlined_call_operand.vmem [shape: f32[1,128], index: 3, kind: input, shape index: {}]   ;;  %s653_s4 = inlined_call_operand.vmem [shape: f32[1,128], index: 4, kind: input, shape index: {}]   ;;  %s654_s5 = inlined_call_operand.vmem [shape: f32[1,128], index: 5, kind: input, shape index: {}]   ;;  %s655_s6 = inlined_call_operand.vmem [shape: f32[160,128], index: 6, kind: output, shape index: {}]  }
   0x1 LB: > { %s463_s22 = sadd.s32 4294967295, %s491_s21   ;;  %p467_p0 = scmp.ge.s32.totalorder %s491_s21, 1  ;;  %s491_s21 = sphi %s528_s21, %s16_s21  }
   0x2   : > { %p224_p1 = scmp.lt.s32.totalorder %s491_s21, 3 }
   0x4   : > { %p225_p2 = pnand %p467_p0, %p224_p1 }
   0x5   : > { %s259_s23 = smul.u32 (!%p225_p2), 10, %s463_s22 }
   0x6   : > { %228 = sbr.rel (%p225_p2) target bundleno = 38 (0x26), region = 44 }
   0x7   : > { %p260_p3 = scmp.lt.s32.totalorder (!%p225_p2), %s259_s23, 19 }
   0xb   : > { %s657_s23 = smov (!%p260_p3, %s259_s23), 19  ;;  %v541_v0 = vld [vmem:[%s651_s2] ss:$0 sm:$0xff] }
   0xc   : > { %s536_s24 = sshll.u32 %s657_s23, 3  ;;  %v546_v1 = vld [vmem:[%s653_s4] ss:$0 sm:$0xff] }
   0xd   : > { %s552_s7 = scalar_lea.vmem %s649_s0, %s536_s24  ;;  %s558_s10 = scalar_lea.vmem %s650_s1, %s536_s24  ;;  %v563_v2 = vld [vmem:[%s652_s3] ss:$0 sm:$0xff] }
   0xe   : > { %v277_v3 = vld [vmem:[%s552_s7] sm:$0xff]  ;;  %v278_v5 = vld [vmem:[%s552_s7 + $0x8] sm:$0xff]  ;;  %v279_v10 = vld [vmem:[%s552_s7 + $0x10] sm:$0xff]  ;;  %s611_s17 = scalar_lea.vmem %s655_s6, %s536_s24 }
   0xf   : > { %v321_v4 = vld [vmem:[%s558_s10] sm:$0xff]  ;;  %v294_v6 = vmul.f32 %v541_v0, %v277_v3  ;;  %v295_v8 = vmul.f32 %v541_v0, %v278_v5  ;;  %v322_v9 = vld [vmem:[%s558_s10 + $0x8] sm:$0xff]  ;;  %v323_v11 = vld [vmem:[%s558_s10 + $0x10] sm:$0xff]  ;;  %v296_v13 = vmul.f32 %v541_v0, %v279_v10 }
  0x10   : > { %v338_v7 = vmul.f32 %v546_v1, %v321_v4  ;;  %v339_v12 = vmul.f32 %v546_v1, %v322_v9  ;;  %v340_v14 = vmul.f32 %v546_v1, %v323_v11  ;;  %v280_v15 = vld [vmem:[%s552_s7 + $0x18] sm:$0xff]  ;;  %v281_v17 = vld [vmem:[%s552_s7 + $0x20] sm:$0xff]  ;;  %v282_v23 = vld [vmem:[%s552_s7 + $0x28] sm:$0xff] }
  0x11   : > { %v324_v16 = vld [vmem:[%s558_s10 + $0x18] sm:$0xff]  ;;  %v311_v18 = vadd.f32 %v563_v2, %v294_v6  ;;  %v312_v19 = vadd.f32 %v563_v2, %v295_v8  ;;  %v297_v20 = vmul.f32 %v541_v0, %v280_v15  ;;  %v325_v22 = vld [vmem:[%s558_s10 + $0x20] sm:$0xff]  ;;  %v326_v24 = vld [vmem:[%s558_s10 + $0x28] sm:$0xff]  ;;  %v313_v26 = vadd.f32 %v563_v2, %v296_v13 }
  0x12   : > { %v341_v21 = vmul.f32 %v546_v1, %v324_v16  ;;  %v590_v25 = vld [vmem:[%s654_s5] ss:$0 sm:$0xff]  ;;  %v298_v27 = vmul.f32 %v541_v0, %v281_v17  ;;  %v342_v28 = vmul.f32 %v546_v1, %v325_v22  ;;  %v299_v29 = vmul.f32 %v541_v0, %v282_v23  ;;  %v283_v30 = vld [vmem:[%s552_s7 + $0x30] sm:$0xff]  ;;  %v284_v40 = vld [vmem:[%s552_s7 + $0x38] sm:$0xff] }
  0x13   : > { %v327_v31 = vld [vmem:[%s558_s10 + $0x30] sm:$0xff]  ;;  %v348_v32 = vadd.f32 %v338_v7, %v311_v18  ;;  %v349_v33 = vadd.f32 %v339_v12, %v312_v19  ;;  %v314_v34 = vadd.f32 %v563_v2, %v297_v20  ;;  %v343_v35 = vmul.f32 %v546_v1, %v326_v24  ;;  %v328_v49 = vld [vmem:[%s558_s10 + $0x38] sm:$0xff]  ;;  %v285_v50 = vld [vmem:[%s552_s7 + $0x40] sm:$0xff] }
  0x14   : > { %v350_v36 = vadd.f32 %v340_v14, %v313_v26  ;;  %v315_v37 = vadd.f32 %v563_v2, %v298_v27  ;;  %v316_v38 = vadd.f32 %v563_v2, %v299_v29  ;;  %v300_v39 = vmul.f32 %v541_v0, %v283_v30  ;;  %v329_v55 = vld [vmem:[%s558_s10 + $0x40] sm:$0xff]  ;;  %v286_v60 = vld [vmem:[%s552_s7 + $0x48] sm:$0xff] }
  0x15   : > { %v365_v41 = vadd.f32 %v590_v25, %v348_v32  ;;  %v366_v42 = vadd.f32 %v590_v25, %v349_v33  ;;  %v351_v43 = vadd.f32 %v341_v21, %v314_v34  ;;  %v344_v44 = vmul.f32 %v546_v1, %v327_v31  ;;  %v330_v61 = vld [vmem:[%s558_s10 + $0x48] sm:$0xff] }
  0x16   : > { %v367_v45 = vadd.f32 %v590_v25, %v350_v36  ;;  %v352_v46 = vadd.f32 %v342_v28, %v315_v37  ;;  %v353_v47 = vadd.f32 %v343_v35, %v316_v38  ;;  %v317_v48 = vadd.f32 %v563_v2, %v300_v39 }
  0x17   : > { %v375_v51 = vmax.f32 %v365_v41, 0.0  ;;  %v376_v52 = vmax.f32 %v366_v42, 0.0  ;;  %v368_v53 = vadd.f32 %v590_v25, %v351_v43  ;;  %v301_v54 = vmul.f32 %v541_v0, %v284_v40 }
  0x18   : > { %v377_v56 = vmax.f32 %v367_v45, 0.0  ;;  %v369_v57 = vadd.f32 %v590_v25, %v352_v46  ;;  %v370_v58 = vadd.f32 %v590_v25, %v353_v47  ;;  %v354_v59 = vadd.f32 %v344_v44, %v317_v48 }
  0x19   : > { %385 = vst [vmem:[%s611_s17] sm:$0xff] %v375_v51  ;;  %386 = vst [vmem:[%s611_s17 + $0x8] sm:$0xff] %v376_v52  ;;  %v378_v62 = vmax.f32 %v368_v53, 0.0  ;;  %v318_v63 = vadd.f32 %v563_v2, %v301_v54  ;;  %v345_v3 = vmul.f32 %v546_v1, %v328_v49  ;;  %v302_v4 = vmul.f32 %v541_v0, %v285_v50 }
  0x1a   : > { %387 = vst [vmem:[%s611_s17 + $0x10] sm:$0xff] %v377_v56  ;;  %v379_v5 = vmax.f32 %v369_v57, 0.0  ;;  %v380_v6 = vmax.f32 %v370_v58, 0.0  ;;  %v371_v7 = vadd.f32 %v590_v25, %v354_v59  ;;  %v346_v8 = vmul.f32 %v546_v1, %v329_v55 }
  0x1b   : > { %388 = vst [vmem:[%s611_s17 + $0x18] sm:$0xff] %v378_v62  ;;  %v355_v9 = vadd.f32 %v345_v3, %v318_v63  ;;  %v319_v10 = vadd.f32 %v563_v2, %v302_v4  ;;  %v303_v11 = vmul.f32 %v541_v0, %v286_v60  ;;  %v347_v12 = vmul.f32 %v546_v1, %v330_v61 }
  0x1c   : > { %389 = vst [vmem:[%s611_s17 + $0x20] sm:$0xff] %v379_v5  ;;  %390 = vst [vmem:[%s611_s17 + $0x28] sm:$0xff] %v380_v6  ;;  %v381_v13 = vmax.f32 %v371_v7, 0.0 }
  0x1d   : > { %v372_v14 = vadd.f32 %v590_v25, %v355_v9  ;;  %v356_v15 = vadd.f32 %v346_v8, %v319_v10  ;;  %v320_v16 = vadd.f32 %v563_v2, %v303_v11 }
  0x1e   : > { %391 = vst [vmem:[%s611_s17 + $0x30] sm:$0xff] %v381_v13 }
  0x1f   : > { %v382_v17 = vmax.f32 %v372_v14, 0.0  ;;  %v373_v18 = vadd.f32 %v590_v25, %v356_v15  ;;  %v357_v19 = vadd.f32 %v347_v12, %v320_v16 }
  0x21   : > { %392 = vst [vmem:[%s611_s17 + $0x38] sm:$0xff] %v382_v17  ;;  %v383_v20 = vmax.f32 %v373_v18, 0.0  ;;  %v374_v0 = vadd.f32 %v590_v25, %v357_v19 }
  0x23   : > { %393 = vst [vmem:[%s611_s17 + $0x40] sm:$0xff] %v383_v20  ;;  %v384_v1 = vmax.f32 %v374_v0, 0.0 }
  0x25   : > { %394 = vst [vmem:[%s611_s17 + $0x48] sm:$0xff] %v384_v1 }
  0x26 PF: > { %s16_s21 = sadd.s32 1, %s491_s21  }
  0x27   : > { %p13_p4 = scmp.ge.s32.totalorder %s16_s21, 4  }
  0x29   :  { %15 = sbr.rel (!%p13_p4) target bundleno = 1 (0x1), region = 77 }

// kernel: basic_block_forward.7
= control target key start
LH: loop header
LB: loop body
LE: loop exit
PB: predicated region body
PF: predicated region fallthrough
CT: control target
= control target key end

     0   :  { %s3065_s15 = smov 0   ;;  %s4004_s0 = inlined_call_operand.vmem [shape: f32[2,1,110,128], index: 0, kind: input, shape index: {}]   ;;  %s4005_s1 = inlined_call_operand.vmem [shape: bf16[9,128,128], index: 1, kind: input, shape index: {}]   ;;  %s4006_s2 = inlined_call_operand.vmem [shape: f32[2,80,128], index: 2, kind: output, shape index: {0}]   ;;  %s4007_s3 = inlined_call_operand.vmem [shape: f32[2,1,128], index: 3, kind: output, shape index: {1}]   ;;  %s4008_s4 = inlined_call_operand.vmem [shape: f32[2,1,128], index: 4, kind: output, shape index: {2}]  }
   0x1 LB: > { %s2250_s16 = sadd.s32 4294967295, %s3036_s15   ;;  %p2254_p0 = scmp.ge.s32.totalorder %s3036_s15, 1  ;;  %s3036_s15 = sphi %s3065_s15, %s15_s15  }
   0x2   : > { %p167_p1 = scmp.lt.s32.totalorder %s3036_s15, 3 }
   0x4   : > { %p168_p2 = pnand %p2254_p0, %p167_p1 }
   0x5   : > { %p199_p3 = scmp.lt.s32.totalorder (!%p168_p2), %s2250_s16, 1 }
   0x6   : > { %171 = sbr.rel (%p168_p2) target bundleno = 446 (0x1be), region = 28 }
   0xb   : > { %v2958_v0 = vld [vmem:[%s4005_s1 + $0x38] sm:$0xff]   ;;  %v4009_v1 = vmov 0.0   ;;  %v2960_v3 = vld [vmem:[%s4005_s1 + $0x30] sm:$0xff]   ;;  %vm3039_vm0 = vmmov 0   ;;  %v2962_v5 = vld [vmem:[%s4005_s1 + $0x28] sm:$0xff]   ;;  %s4045_s16 = smov (!%p199_p3, %s2250_s16), 1 }
   0xc   : > { %2586 = vmatprep.subr.bf16.mxu0 %v4009_v1  ;;  %2622 = vmatprep.subr.bf16.mxu1 %v4009_v1  ;;  %v2959_v2 = vld [vmem:[%s4005_s1 + $0x78] sm:$0xff]   ;;  %v2961_v4 = vld [vmem:[%s4005_s1 + $0x70] sm:$0xff]   ;;  %v2963_v6 = vld [vmem:[%s4005_s1 + $0x68] sm:$0xff]   ;;  %s2926_s11 = smul.u32 112, %s4045_s16  ;;  %s211_s5 = scalar_lea.vmem %s4007_s3, %s4045_s16 }
   0xd   : > { %2587 = vmatpush3.bf16.msra.mxu0 %v2958_v0  ;;  %2602 = vmatprep.mubr.msk.bf16.mxu0 %vm3039_vm0, %v4009_v1  ;;  %v2964_v7 = vld [vmem:[%s4005_s1 + $0x20] sm:$0xff]   ;;  %v2966_v9 = vld [vmem:[%s4005_s1 + $0x18] sm:$0xff]   ;;  %v2968_v11 = vld [vmem:[%s4005_s1 + $0x10] sm:$0xff]   ;;  %s214_s8 = scalar_lea.vmem %s4008_s4, %s4045_s16 }
   0xe   : > { %2623 = vmatpush3.bf16.msra.mxu1 %v2959_v2  ;;  %2588 = vmatprep.subr.bf16.mxu0 %v4009_v1  ;;  %v2965_v8 = vld [vmem:[%s4005_s1 + $0x60] sm:$0xff]   ;;  %v2967_v10 = vld [vmem:[%s4005_s1 + $0x58] sm:$0xff]   ;;  %v2969_v12 = vld [vmem:[%s4005_s1 + $0x50] sm:$0xff]   ;;  %s3135_s20 = scalar_lea.vmem %s4004_s0, %s2926_s11 }
   0xf   : > { %2624 = vmatprep.subr.bf16.mxu1 %v4009_v1  ;;  %2638 = vmatprep.mubr.msk.bf16.mxu1 %vm3039_vm0, %v4009_v1  ;;  %v2970_v13 = vld [vmem:[%s4005_s1 + $0x8] sm:$0xff]   ;;  %v2972_v15 = vld [vmem:[%s4005_s1] sm:$0xff]   ;;  %v2974_v23 = vld [vmem:[%s4005_s1 + $0xb8] sm:$0xff]  }
  0x10   : > { %v2971_v14 = vld [vmem:[%s4005_s1 + $0x48] sm:$0xff]   ;;  %v226_v16 = vld [vmem:[%s3135_s20] sm:$0xff]  ;;  %v2976_v24 = vld [vmem:[%s4005_s1 + $0xf8] sm:$0xff]  }
  0x11   : > { %2589 = vmatpush3.bf16.msra.mxu0 %v2960_v3  ;;  %v2973_v17 = vld [vmem:[%s4005_s1 + $0x40] sm:$0xff]   ;;  %v227_v18 = vld [vmem:[%s3135_s20 + $0x8] sm:$0xff]  ;;  %v2975_v25 = vld [vmem:[%s4005_s1 + $0xb0] sm:$0xff]  }
  0x12   : > { %2625 = vmatpush3.bf16.msra.mxu1 %v2961_v4  ;;  %2590 = vmatprep.subr.bf16.mxu0 %v4009_v1  ;;  %v408_v19 = vld [vmem:[%s3135_s20 + $0x1] sm:$0xff]  ;;  %v409_v20 = vld [vmem:[%s3135_s20 + $0x9] sm:$0xff]  ;;  %v236_v21 = vpack.c.bf16 %v227_v18, %v226_v16  ;;  %v229_v27 = vld [vmem:[%s3135_s20 + $0x18] sm:$0xff] }
  0x13   : > { %2626 = vmatprep.subr.bf16.mxu1 %v4009_v1  ;;  %v418_v22 = vpack.c.bf16 %v409_v20, %v408_v19  ;;  %v228_v26 = vld [vmem:[%s3135_s20 + $0x10] sm:$0xff]  ;;  %v411_v29 = vld [vmem:[%s3135_s20 + $0x19] sm:$0xff]  ;;  %v2977_v33 = vld [vmem:[%s4005_s1 + $0xa8] sm:$0xff]  }
  0x14   : > { %v410_v28 = vld [vmem:[%s3135_s20 + $0x11] sm:$0xff]  ;;  %v237_v31 = vpack.c.bf16 %v229_v27, %v228_v26  ;;  %v230_v34 = vld [vmem:[%s3135_s20 + $0x20] sm:$0xff]  ;;  %v2980_v35 = vld [vmem:[%s4005_s1 + $0xe8] sm:$0xff]  }
  0x15   : > { %2591 = vmatpush3.bf16.msra.mxu0 %v2962_v5  ;;  %v2978_v30 = vld [vmem:[%s4005_s1 + $0xf0] sm:$0xff]   ;;  %v419_v32 = vpack.c.bf16 %v411_v29, %v410_v28  ;;  %v231_v36 = vld [vmem:[%s3135_s20 + $0x28] sm:$0xff]  ;;  %v2979_v38 = vld [vmem:[%s4005_s1 + $0xa0] sm:$0xff]  }
  0x16   : > { %2627 = vmatpush3.bf16.msra.mxu1 %v2963_v6  ;;  %2592 = vmatprep.subr.bf16.mxu0 %v4009_v1  ;;  %v412_v37 = vld [vmem:[%s3135_s20 + $0x21] sm:$0xff]  ;;  %v413_v39 = vld [vmem:[%s3135_s20 + $0x29] sm:$0xff]  ;;  %v238_v41 = vpack.c.bf16 %v231_v36, %v230_v34  ;;  %v2981_v43 = vld [vmem:[%s4005_s1 + $0x98] sm:$0xff]  }
  0x17   : > { %2628 = vmatprep.subr.bf16.mxu1 %v4009_v1  ;;  %v2982_v40 = vld [vmem:[%s4005_s1 + $0xe0] sm:$0xff]   ;;  %v420_v42 = vpack.c.bf16 %v413_v39, %v412_v37  ;;  %v232_v44 = vld [vmem:[%s3135_s20 + $0x30] sm:$0xff]  ;;  %v2983_v45 = vld [vmem:[%s4005_s1 + $0xd8] sm:$0xff]  }
  0x18   : > { %v233_v46 = vld [vmem:[%s3135_s20 + $0x38] sm:$0xff]  ;;  %v2984_v48 = vld [vmem:[%s4005_s1 + $0x90] sm:$0xff]   ;;  %v2986_v53 = vld [vmem:[%s4005_s1 + $0x88] sm:$0xff]  }
  0x19   : > { %2593 = vmatpush3.bf16.msra.mxu0 %v2964_v7  ;;  %v414_v47 = vld [vmem:[%s3135_s20 + $0x31] sm:$0xff]  ;;  %v415_v49 = vld [vmem:[%s3135_s20 + $0x39] sm:$0xff]  ;;  %v239_v51 = vpack.c.bf16 %v233_v46, %v232_v44  ;;  %v2987_v54 = vld [vmem:[%s4005_s1 + $0xc8] sm:$0xff]  }
  0x1a   : > { %2629 = vmatpush3.bf16.msra.mxu1 %v2965_v8  ;;  %2594 = vmatprep.subr.bf16.mxu0 %v4009_v1  ;;  %v2985_v50 = vld [vmem:[%s4005_s1 + $0xd0] sm:$0xff]   ;;  %v421_v52 = vpack.c.bf16 %v415_v49, %v414_v47  ;;  %v234_v55 = vld [vmem:[%s3135_s20 + $0x40] sm:$0xff]  ;;  %v235_v56 = vld [vmem:[%s3135_s20 + $0x48] sm:$0xff] }
  0x1b   : > { %2630 = vmatprep.subr.bf16.mxu1 %v4009_v1  ;;  %v416_v57 = vld [vmem:[%s3135_s20 + $0x41] sm:$0xff]  ;;  %v417_v58 = vld [vmem:[%s3135_s20 + $0x49] sm:$0xff]  ;;  %v240_v61 = vpack.c.bf16 %v235_v56, %v234_v55  ;;  %v775_v2 = vld [vmem:[%s3135_s20 + $0x12] sm:$0xff] }
  0x1c   : > { %v2988_v59 = vld [vmem:[%s4005_s1 + $0x80] sm:$0xff]   ;;  %v422_v62 = vpack.c.bf16 %v417_v58, %v416_v57  ;;  %v592_v0 = vld [vmem:[%s3135_s20 + $0xa] sm:$0xff]  ;;  %v2990_v5 = vld [vmem:[%s4005_s1 + $0x138] sm:$0xff]  }
  0x1d   : > { %2595 = vmatpush3.bf16.msra.mxu0 %v2966_v9  ;;  %v2989_v60 = vld [vmem:[%s4005_s1 + $0xc0] sm:$0xff]   ;;  %v784_v4 = vpack.c.bf16 %v775_v2, %v592_v0  ;;  %v2992_v6 = vld [vmem:[%s4005_s1 + $0x178] sm:$0xff]   ;;  %v2991_v7 = vld [vmem:[%s4005_s1 + $0x130] sm:$0xff]  }
  0x1e   : > { %2631 = vmatpush3.bf16.msra.mxu1 %v2967_v10  ;;  %2596 = vmatprep.subr.bf16.mxu0 %v4009_v1  ;;  %v591_v63 = vld [vmem:[%s3135_s20 + $0x2] sm:$0xff]  ;;  %v594_v8 = vld [vmem:[%s3135_s20 + $0x1a] sm:$0xff]  ;;  %v2994_v10 = vld [vmem:[%s4005_s1 + $0x170] sm:$0xff]  }
  0x1f   : > { %2632 = vmatprep.subr.bf16.mxu1 %v4009_v1  ;;  %v601_v3 = vpack.c.bf16 %v592_v0, %v591_v63  ;;  %v777_v9 = vld [vmem:[%s3135_s20 + $0x22] sm:$0xff]  ;;  %v3001_v26 = vld [vmem:[%s4005_s1 + $0x150] sm:$0xff]   ;;  %v3008_v44 = vld [vmem:[%s4005_s1 + $0x1f8] sm:$0xff]  }
  0x20   : > { %v2995_v16 = vld [vmem:[%s4005_s1 + $0x120] sm:$0xff]   ;;  %v3002_v29 = vld [vmem:[%s4005_s1 + $0x108] sm:$0xff]   ;;  %v962_v56 = vld [vmem:[%s3135_s20 + $0x33] sm:$0xff] }
  0x21   : > { %2597 = vmatpush3.bf16.msra.mxu0 %v2968_v11  ;;  %v602_v11 = vpack.c.bf16 %v594_v8, %v775_v2  ;;  %v2998_v18 = vld [vmem:[%s4005_s1 + $0x160] sm:$0xff]   ;;  %v957_v37 = vld [vmem:[%s3135_s20 + $0xb] sm:$0xff]  ;;  %v3013_v63 = vld [vmem:[%s4005_s1 + $0x198] sm:$0xff]  }
  0x22   : > { %2633 = vmatpush3.bf16.msra.mxu1 %v2969_v12  ;;  %2598 = vmatprep.subr.bf16.mxu0 %v4009_v1  ;;  %v785_v12 = vpack.c.bf16 %v777_v9, %v594_v8  ;;  %v3005_v34 = vld [vmem:[%s4005_s1 + $0x140] sm:$0xff]   ;;  %v1140_v39 = vld [vmem:[%s3135_s20 + $0xc] sm:$0xff]  ;;  %v3015_v0 = vld [vmem:[%s4005_s1 + $0x1d8] sm:$0xff]  }
  0x23   : > { %2634 = vmatprep.subr.bf16.mxu1 %v4009_v1  ;;  %v959_v46 = vld [vmem:[%s3135_s20 + $0x1b] sm:$0xff]  ;;  %v960_v47 = vld [vmem:[%s3135_s20 + $0x23] sm:$0xff]  ;;  %v961_v55 = vld [vmem:[%s3135_s20 + $0x2b] sm:$0xff] }
  0x24   : > { %v3379_v49 = vld [vmem:[%s3135_s20 + $0x24] sm:$0xff]  ;;  %v3407_v58 = vld [vmem:[%s3135_s20 + $0x2c] sm:$0xff]  ;;  %v963_v2 = vld [vmem:[%s3135_s20 + $0x3b] sm:$0xff] }
  0x25   : > { %2599 = vmatpush3.bf16.msra.mxu0 %v2970_v13  ;;  %v2993_v13 = vld [vmem:[%s4005_s1 + $0x128] sm:$0xff]   ;;  %v3011_v57 = vld [vmem:[%s4005_s1 + $0x1a0] sm:$0xff]  }
  0x26   : > { %2635 = vmatpush3.bf16.msra.mxu1 %v2971_v14  ;;  %2600 = vmatprep.subr.bf16.mxu0 %v4009_v1  ;;  %v2996_v14 = vld [vmem:[%s4005_s1 + $0x168] sm:$0xff]  }
  0x27   : > { %2636 = vmatprep.subr.bf16.mxu1 %v4009_v1 }
  0x29   : > { %2601 = vmatpush3.bf16.msra.mxu0 %v2972_v15  ;;  %v596_v15 = vld [vmem:[%s3135_s20 + $0x2a] sm:$0xff] }
  0x2a   : > { %2637 = vmatpush3.bf16.msra.mxu1 %v2973_v17  ;;  %2658 = vmatprep.subr.bf16.mxu0 %v4009_v1  ;;  %v779_v17 = vld [vmem:[%s3135_s20 + $0x32] sm:$0xff]  ;;  %v603_v19 = vpack.c.bf16 %v596_v15, %v777_v9 }
  0x2b   : > { %2694 = vmatprep.subr.bf16.mxu1 %v4009_v1  ;;  %v786_v20 = vpack.c.bf16 %v779_v17, %v596_v15  ;;  %v3467_v15 = vld [vmem:[%s3135_s20 + $0x54] sm:$0xff] }
  0x2c   : > { %2603 = vmatmul.mubr.bf16.vlgmr.msra.gmra.mxu0 %v236_v21  ;;  %v2997_v21 = vld [vmem:[%s4005_s1 + $0x118] sm:$0xff]  }
  0x2d   : > { %2639 = vmatmul.mubr.bf16.vlgmr.msra.gmra.mxu1 %v418_v22  ;;  %2659 = vmatpush3.bf16.msra.mxu0 %v2974_v23  ;;  %v2999_v22 = vld [vmem:[%s4005_s1 + $0x158] sm:$0xff]  }
  0x2e   : > { %2660 = vmatprep.subr.bf16.mxu0 %v4009_v1  ;;  %2606 = vmatprep.mubr.msk.bf16.mxu0 %vm3039_vm0, %v4009_v1  ;;  %v598_v23 = vld [vmem:[%s3135_s20 + $0x3a] sm:$0xff] }
  0x2f   : > { %2642 = vmatprep.mubr.msk.bf16.mxu1 %vm3039_vm0, %v4009_v1  ;;  %2695 = vmatpush3.bf16.msra.mxu1 %v2976_v24  ;;  %v3000_v24 = vld [vmem:[%s4005_s1 + $0x110] sm:$0xff]   ;;  %v604_v27 = vpack.c.bf16 %v598_v23, %v779_v17  ;;  %v3021_v17 = vld [vmem:[%s4005_s1 + $0x1c0] sm:$0xff]  }
  0x30   : > { %2696 = vmatprep.subr.bf16.mxu1 %v4009_v1 }
  0x31   : > { %2661 = vmatpush3.bf16.msra.mxu0 %v2975_v25  ;;  %v781_v25 = vld [vmem:[%s3135_s20 + $0x42] sm:$0xff] }
  0x32   : > { %2662 = vmatprep.subr.bf16.mxu0 %v4009_v1  ;;  %v787_v28 = vpack.c.bf16 %v781_v25, %v598_v23 }
  0x33   : > { %2697 = vmatpush3.bf16.msra.mxu1 %v2978_v30  ;;  %v3003_v30 = vld [vmem:[%s4005_s1 + $0x148] sm:$0xff]  }
  0x34   : > { %2607 = vmatmul.mubr.bf16.gmra.mxu0 %v237_v31  ;;  %2698 = vmatprep.subr.bf16.mxu1 %v4009_v1  ;;  %v600_v31 = vld [vmem:[%s3135_s20 + $0x4a] sm:$0xff] }
  0x35   : > { %2643 = vmatmul.mubr.bf16.gmra.mxu1 %v419_v32  ;;  %2663 = vmatpush3.bf16.msra.mxu0 %v2977_v33  ;;  %v783_v32 = vld [vmem:[%s3135_s20 + $0x52] sm:$0xff]  ;;  %v3004_v33 = vld [vmem:[%s4005_s1 + $0x100] sm:$0xff]  }
  0x36   : > { %2610 = vmatprep.mubr.msk.bf16.mxu0 %vm3039_vm0, %v4009_v1  ;;  %2646 = vmatprep.mubr.msk.bf16.mxu1 %vm3039_vm0, %v4009_v1  ;;  %v788_v36 = vpack.c.bf16 %v783_v32, %v600_v31  ;;  %v1510_v32 = vld [vmem:[%s3135_s20 + $0x35] sm:$0xff] }
  0x37   : > { %2664 = vmatprep.subr.bf16.mxu0 %v4009_v1  ;;  %2699 = vmatpush3.bf16.msra.mxu1 %v2980_v35  ;;  %v605_v35 = vpack.c.bf16 %v600_v31, %v781_v25  ;;  %v3023_v25 = vld [vmem:[%s4005_s1 + $0x230] sm:$0xff]   ;;  %v3025_v31 = vld [vmem:[%s4005_s1 + $0x220] sm:$0xff]  }
  0x38   : > { %2700 = vmatprep.subr.bf16.mxu1 %v4009_v1 }
  0x39   : > { %2665 = vmatpush3.bf16.msra.mxu0 %v2979_v38  ;;  %v958_v38 = vld [vmem:[%s3135_s20 + $0x13] sm:$0xff] }
  0x3a   : > { %2666 = vmatprep.subr.bf16.mxu0 %v4009_v1 }
  0x3b   : > { %2701 = vmatpush3.bf16.msra.mxu1 %v2982_v40  ;;  %v3358_v40 = vld [vmem:[%s3135_s20 + $0x14] sm:$0xff] }
  0x3c   : > { %2611 = vmatmul.mubr.bf16.gmra.mxu0 %v238_v41  ;;  %2702 = vmatprep.subr.bf16.mxu1 %v4009_v1  ;;  %v967_v41 = vpack.c.bf16 %v958_v38, %v957_v37  ;;  %v3027_v37 = vld [vmem:[%s4005_s1 + $0x210] sm:$0xff]   ;;  %v1512_v38 = vld [vmem:[%s3135_s20 + $0x45] sm:$0xff] }
  0x3d   : > { %2647 = vmatmul.mubr.bf16.gmra.mxu1 %v420_v42  ;;  %2667 = vmatpush3.bf16.msra.mxu0 %v2981_v43  ;;  %v1150_v42 = vpack.c.bf16 %v3358_v40, %v1140_v39  ;;  %v3006_v43 = vld [vmem:[%s4005_s1 + $0x1b8] sm:$0xff]   ;;  %v1513_v39 = vld [vmem:[%s3135_s20 + $0x4d] sm:$0xff] }
  0x3e   : > { %2614 = vmatprep.mubr.msk.bf16.mxu0 %vm3039_vm0, %v4009_v1  ;;  %2650 = vmatprep.mubr.msk.bf16.mxu1 %vm3039_vm0, %v4009_v1 }
  0x3f   : > { %2668 = vmatprep.subr.bf16.mxu0 %v4009_v1  ;;  %2703 = vmatpush3.bf16.msra.mxu1 %v2983_v45  ;;  %v3007_v45 = vld [vmem:[%s4005_s1 + $0x1b0] sm:$0xff]  }
  0x40   : > { %2704 = vmatprep.subr.bf16.mxu1 %v4009_v1 }
  0x41   : > { %2669 = vmatpush3.bf16.msra.mxu0 %v2984_v48  ;;  %v3376_v48 = vld [vmem:[%s3135_s20 + $0x1c] sm:$0xff] }
  0x42   : > { %2670 = vmatprep.subr.bf16.mxu0 %v4009_v1 }
  0x43   : > { %2705 = vmatpush3.bf16.msra.mxu1 %v2985_v50  ;;  %v3010_v50 = vld [vmem:[%s4005_s1 + $0x1f0] sm:$0xff]  }
  0x44   : > { %2615 = vmatmul.mubr.bf16.gmra.mxu0 %v239_v51  ;;  %2706 = vmatprep.subr.bf16.mxu1 %v4009_v1  ;;  %v968_v51 = vpack.c.bf16 %v960_v47, %v959_v46  ;;  %v3029_v46 = vld [vmem:[%s4005_s1 + $0x200] sm:$0xff]  }
  0x45   : > { %2651 = vmatmul.mubr.bf16.gmra.mxu1 %v421_v52  ;;  %2618 = vmatprep.mubr.msk.bf16.mxu0 %vm3039_vm0, %v4009_v1  ;;  %v1151_v52 = vpack.c.bf16 %v3379_v49, %v3376_v48 }
  0x46   : > { %2654 = vmatprep.mubr.msk.bf16.mxu1 %vm3039_vm0, %v4009_v1  ;;  %2671 = vmatpush3.bf16.msra.mxu0 %v2986_v53  ;;  %v3009_v53 = vld [vmem:[%s4005_s1 + $0x1a8] sm:$0xff]  }
  0x47   : > { %2707 = vmatpush3.bf16.msra.mxu1 %v2987_v54  ;;  %2672 = vmatprep.subr.bf16.mxu0 %v4009_v1  ;;  %v3012_v54 = vld [vmem:[%s4005_s1 + $0x1e8] sm:$0xff]  }
  0x48   : > { %2708 = vmatprep.subr.bf16.mxu1 %v4009_v1 }
  0x4a   : > { %2673 = vmatpush3.bf16.msra.mxu0 %v2988_v59  ;;  %v3410_v59 = vld [vmem:[%s3135_s20 + $0x34] sm:$0xff] }
  0x4b   : > { %2709 = vmatpush3.bf16.msra.mxu1 %v2989_v60  ;;  %2730 = vmatprep.subr.bf16.mxu0 %v4009_v1  ;;  %v3014_v60 = vld [vmem:[%s4005_s1 + $0x1e0] sm:$0xff]  }
  0x4c   : > { %2619 = vmatmul.mubr.bf16.gmra.mxu0 %v240_v61  ;;  %2766 = vmatprep.subr.bf16.mxu1 %v4009_v1  ;;  %v969_v61 = vpack.c.bf16 %v962_v56, %v961_v55  ;;  %v1691_v55 = vld [vmem:[%s3135_s20 + $0x26] sm:$0xff]  ;;  %v1692_v56 = vld [vmem:[%s3135_s20 + $0x2e] sm:$0xff] }
  0x4d   : > { %2655 = vmatmul.mubr.bf16.gmra.mxu1 %v422_v62  ;;  %2674 = vmatprep.mubr.msk.bf16.mxu0 %vm3039_vm0, %v4009_v1  ;;  %v1152_v62 = vpack.c.bf16 %v3410_v59, %v3407_v58 }
  0x4e   : > { %2710 = vmatprep.mubr.msk.bf16.mxu1 %vm3039_vm0, %v4009_v1 }
  0x54   : > { %2675 = vmatmul.mubr.bf16.vlgmr.msra.gmra.mxu0 %v601_v3  ;;  %v964_v3 = vld [vmem:[%s3135_s20 + $0x43] sm:$0xff] }
  0x55   : > { %2711 = vmatmul.mubr.bf16.vlgmr.msra.gmra.mxu1 %v784_v4  ;;  %2731 = vmatpush3.bf16.msra.mxu0 %v2990_v5  ;;  %v3016_v4 = vld [vmem:[%s4005_s1 + $0x190] sm:$0xff]   ;;  %v3437_v5 = vld [vmem:[%s3135_s20 + $0x3c] sm:$0xff]  ;;  %v970_v8 = vpack.c.bf16 %v964_v3, %v963_v2 }
  0x56   : > { %2732 = vmatprep.subr.bf16.mxu0 %v4009_v1  ;;  %2678 = vmatprep.mubr.msk.bf16.mxu0 %vm3039_vm0, %v4009_v1 }
  0x57   : > { %2714 = vmatprep.mubr.msk.bf16.mxu1 %vm3039_vm0, %v4009_v1  ;;  %2767 = vmatpush3.bf16.msra.mxu1 %v2992_v6  ;;  %v3440_v6 = vld [vmem:[%s3135_s20 + $0x44] sm:$0xff] }
  0x58   : > { %2768 = vmatprep.subr.bf16.mxu1 %v4009_v1  ;;  %v1153_v9 = vpack.c.bf16 %v3440_v6, %v3437_v5 }
  0x59   : > { %2733 = vmatpush3.bf16.msra.mxu0 %v2991_v7  ;;  %v3017_v7 = vld [vmem:[%s4005_s1 + $0x1d0] sm:$0xff]  }
  0x5a   : > { %2734 = vmatprep.subr.bf16.mxu0 %v4009_v1 }
  0x5b   : > { %2769 = vmatpush3.bf16.msra.mxu1 %v2994_v10  ;;  %v3018_v10 = vld [vmem:[%s4005_s1 + $0x188] sm:$0xff]  }
  0x5c   : > { %2679 = vmatmul.mubr.bf16.gmra.mxu0 %v602_v11  ;;  %2770 = vmatprep.subr.bf16.mxu1 %v4009_v1  ;;  %v3019_v11 = vld [vmem:[%s4005_s1 + $0x1c8] sm:$0xff]  }
  0x5d   : > { %2715 = vmatmul.mubr.bf16.gmra.mxu1 %v785_v12  ;;  %2735 = vmatpush3.bf16.msra.mxu0 %v2993_v13  ;;  %v965_v12 = vld [vmem:[%s3135_s20 + $0x4b] sm:$0xff]  ;;  %v966_v13 = vld [vmem:[%s3135_s20 + $0x53] sm:$0xff] }
  0x5e   : > { %2682 = vmatprep.mubr.msk.bf16.mxu0 %vm3039_vm0, %v4009_v1  ;;  %2718 = vmatprep.mubr.msk.bf16.mxu1 %vm3039_vm0, %v4009_v1 }
  0x5f   : > { %2736 = vmatprep.subr.bf16.mxu0 %v4009_v1  ;;  %2771 = vmatpush3.bf16.msra.mxu1 %v2996_v14  ;;  %v3464_v14 = vld [vmem:[%s3135_s20 + $0x4c] sm:$0xff] }
  0x60   : > { %2772 = vmatprep.subr.bf16.mxu1 %v4009_v1 }
  0x61   : > { %2737 = vmatpush3.bf16.msra.mxu0 %v2995_v16  ;;  %v3020_v16 = vld [vmem:[%s4005_s1 + $0x180] sm:$0xff]  }
  0x62   : > { %2738 = vmatprep.subr.bf16.mxu0 %v4009_v1 }
  0x63   : > { %2773 = vmatpush3.bf16.msra.mxu1 %v2998_v18  ;;  %v971_v18 = vpack.c.bf16 %v966_v13, %v965_v12 }
  0x64   : > { %2683 = vmatmul.mubr.bf16.gmra.mxu0 %v603_v19  ;;  %2774 = vmatprep.subr.bf16.mxu1 %v4009_v1  ;;  %v1154_v19 = vpack.c.bf16 %v3467_v15, %v3464_v14 }
  0x65   : > { %2719 = vmatmul.mubr.bf16.gmra.mxu1 %v786_v20  ;;  %2739 = vmatpush3.bf16.msra.mxu0 %v2997_v21  ;;  %v1506_v20 = vld [vmem:[%s3135_s20 + $0x15] sm:$0xff]  ;;  %v1507_v21 = vld [vmem:[%s3135_s20 + $0x1d] sm:$0xff] }
  0x66   : > { %2686 = vmatprep.mubr.msk.bf16.mxu0 %vm3039_vm0, %v4009_v1  ;;  %2722 = vmatprep.mubr.msk.bf16.mxu1 %vm3039_vm0, %v4009_v1  ;;  %v1516_v23 = vpack.c.bf16 %v1507_v21, %v1506_v20 }
  0x67   : > { %2740 = vmatprep.subr.bf16.mxu0 %v4009_v1  ;;  %2775 = vmatpush3.bf16.msra.mxu1 %v2999_v22  ;;  %v1333_v22 = vpack.c.bf16 %v3376_v48, %v3358_v40  ;;  %v1336_v40 = vpack.c.bf16 %v3464_v14, %v3440_v6 }
  0x68   : > { %2776 = vmatprep.subr.bf16.mxu1 %v4009_v1 }
  0x69   : > { %2741 = vmatpush3.bf16.msra.mxu0 %v3000_v24  ;;  %v3022_v24 = vld [vmem:[%s4005_s1 + $0x238] sm:$0xff]  }
  0x6a   : > { %2742 = vmatprep.subr.bf16.mxu0 %v4009_v1 }
  0x6b   : > { %2777 = vmatpush3.bf16.msra.mxu1 %v3001_v26  ;;  %v1508_v26 = vld [vmem:[%s3135_s20 + $0x25] sm:$0xff] }
  0x6c   : > { %2687 = vmatmul.mubr.bf16.gmra.mxu0 %v604_v27  ;;  %2778 = vmatprep.subr.bf16.mxu1 %v4009_v1  ;;  %v1509_v27 = vld [vmem:[%s3135_s20 + $0x2d] sm:$0xff] }
  0x6d   : > { %2723 = vmatmul.mubr.bf16.gmra.mxu1 %v787_v28  ;;  %2690 = vmatprep.mubr.msk.bf16.mxu0 %vm3039_vm0, %v4009_v1  ;;  %v1334_v28 = vpack.c.bf16 %v3407_v58, %v3379_v49  ;;  %v1689_v49 = vld [vmem:[%s3135_s20 + $0x16] sm:$0xff]  ;;  %v1698_v58 = vld [vmem:[%s3135_s20 + $0x5e] sm:$0xff] }
  0x6e   : > { %2726 = vmatprep.mubr.msk.bf16.mxu1 %vm3039_vm0, %v4009_v1  ;;  %2743 = vmatpush3.bf16.msra.mxu0 %v3002_v29  ;;  %v1517_v29 = vpack.c.bf16 %v1509_v27, %v1508_v26 }
  0x6f   : > { %2779 = vmatpush3.bf16.msra.mxu1 %v3003_v30  ;;  %2744 = vmatprep.subr.bf16.mxu0 %v4009_v1  ;;  %v3024_v30 = vld [vmem:[%s4005_s1 + $0x228] sm:$0xff]  }
  0x70   : > { %2780 = vmatprep.subr.bf16.mxu1 %v4009_v1 }
  0x72   : > { %2745 = vmatpush3.bf16.msra.mxu0 %v3004_v33  ;;  %v1511_v33 = vld [vmem:[%s3135_s20 + $0x3d] sm:$0xff] }
  0x73   : > { %2781 = vmatpush3.bf16.msra.mxu1 %v3005_v34  ;;  %2802 = vmatprep.subr.bf16.mxu0 %v4009_v1  ;;  %v1335_v34 = vpack.c.bf16 %v3437_v5, %v3410_v59  ;;  %v1700_v59 = vpack.c.bf16 %v1692_v56, %v1691_v55 }
  0x74   : > { %2691 = vmatmul.mubr.bf16.gmra.mxu0 %v605_v35  ;;  %2838 = vmatprep.subr.bf16.mxu1 %v4009_v1  ;;  %v1518_v35 = vpack.c.bf16 %v1511_v33, %v1510_v32 }
  0x75   : > { %2727 = vmatmul.mubr.bf16.gmra.mxu1 %v788_v36  ;;  %2746 = vmatprep.mubr.msk.bf16.mxu0 %vm3039_vm0, %v4009_v1  ;;  %v3026_v36 = vld [vmem:[%s4005_s1 + $0x218] sm:$0xff]  }
  0x76   : > { %2782 = vmatprep.mubr.msk.bf16.mxu1 %vm3039_vm0, %v4009_v1 }
  0x7c   : > { %2747 = vmatmul.mubr.bf16.vlgmr.msra.gmra.mxu0 %v967_v41  ;;  %v1519_v41 = vpack.c.bf16 %v1513_v39, %v1512_v38 }
  0x7d   : > { %2783 = vmatmul.mubr.bf16.vlgmr.msra.gmra.mxu1 %v1150_v42  ;;  %2803 = vmatpush3.bf16.msra.mxu0 %v3006_v43  ;;  %v3028_v42 = vld [vmem:[%s4005_s1 + $0x208] sm:$0xff]   ;;  %v1332_v43 = vld [vmem:[%s3135_s20 + $0x5c] sm:$0xff] }
  0x7e   : > { %2804 = vmatprep.subr.bf16.mxu0 %v4009_v1  ;;  %2750 = vmatprep.mubr.msk.bf16.mxu0 %vm3039_vm0, %v4009_v1  ;;  %v1337_v47 = vpack.c.bf16 %v1332_v43, %v3467_v15 }
  0x7f   : > { %2786 = vmatprep.mubr.msk.bf16.mxu1 %vm3039_vm0, %v4009_v1  ;;  %2839 = vmatpush3.bf16.msra.mxu1 %v3008_v44  ;;  %v1514_v44 = vld [vmem:[%s3135_s20 + $0x55] sm:$0xff] }
  0x80   : > { %2840 = vmatprep.subr.bf16.mxu1 %v4009_v1 }
  0x81   : > { %2805 = vmatpush3.bf16.msra.mxu0 %v3007_v45  ;;  %v1515_v45 = vld [vmem:[%s3135_s20 + $0x5d] sm:$0xff] }
  0x82   : > { %2806 = vmatprep.subr.bf16.mxu0 %v4009_v1  ;;  %v1520_v48 = vpack.c.bf16 %v1515_v45, %v1514_v44 }
  0x83   : > { %2841 = vmatpush3.bf16.msra.mxu1 %v3010_v50  ;;  %v1690_v50 = vld [vmem:[%s3135_s20 + $0x1e] sm:$0xff] }
  0x84   : > { %2751 = vmatmul.mubr.bf16.gmra.mxu0 %v968_v51  ;;  %2842 = vmatprep.subr.bf16.mxu1 %v4009_v1  ;;  %v1695_v51 = vld [vmem:[%s3135_s20 + $0x46] sm:$0xff] }
  0x85   : > { %2787 = vmatmul.mubr.bf16.gmra.mxu1 %v1151_v52  ;;  %2807 = vmatpush3.bf16.msra.mxu0 %v3009_v53  ;;  %v1696_v52 = vld [vmem:[%s3135_s20 + $0x4e] sm:$0xff]  ;;  %v1699_v53 = vpack.c.bf16 %v1690_v50, %v1689_v49 }
  0x86   : > { %2754 = vmatprep.mubr.msk.bf16.mxu0 %vm3039_vm0, %v4009_v1  ;;  %2790 = vmatprep.mubr.msk.bf16.mxu1 %vm3039_vm0, %v4009_v1 }
  0x87   : > { %2808 = vmatprep.subr.bf16.mxu0 %v4009_v1  ;;  %2843 = vmatpush3.bf16.msra.mxu1 %v3012_v54  ;;  %v1702_v54 = vpack.c.bf16 %v1696_v52, %v1695_v51 }
  0x88   : > { %2844 = vmatprep.subr.bf16.mxu1 %v4009_v1 }
  0x89   : > { %2809 = vmatpush3.bf16.msra.mxu0 %v3011_v57  ;;  %v1697_v57 = vld [vmem:[%s3135_s20 + $0x56] sm:$0xff] }
  0x8a   : > { %2810 = vmatprep.subr.bf16.mxu0 %v4009_v1 }
  0x8b   : > { %2845 = vmatpush3.bf16.msra.mxu1 %v3014_v60  ;;  %v1703_v60 = vpack.c.bf16 %v1698_v58, %v1697_v57 }
  0x8c   : > { %2755 = vmatmul.mubr.bf16.gmra.mxu0 %v969_v61  ;;  %2846 = vmatprep.subr.bf16.mxu1 %v4009_v1  ;;  %v1693_v61 = vld [vmem:[%s3135_s20 + $0x36] sm:$0xff] }
  0x8d   : > { %2791 = vmatmul.mubr.bf16.gmra.mxu1 %v1152_v62  ;;  %2811 = vmatpush3.bf16.msra.mxu0 %v3013_v63  ;;  %v1694_v62 = vld [vmem:[%s3135_s20 + $0x3e] sm:$0xff]  ;;  %s2927_s20 = smul.u32 80, %s4045_s16 }
  0x8e   : > { %2758 = vmatprep.mubr.msk.bf16.mxu0 %vm3039_vm0, %v4009_v1  ;;  %2794 = vmatprep.mubr.msk.bf16.mxu1 %vm3039_vm0, %v4009_v1  ;;  %v1701_v63 = vpack.c.bf16 %v1694_v62, %v1693_v61 }
  0x8f   : > { %2812 = vmatprep.subr.bf16.mxu0 %v4009_v1  ;;  %2847 = vmatpush3.bf16.msra.mxu1 %v3015_v0  ;;  %s3810_s28 = scalar_lea.vmem %s4006_s2, %s2927_s20 }
  0x90   : > { %2848 = vmatprep.subr.bf16.mxu1 %v4009_v1 }
  0x91   : > { %2813 = vmatpush3.bf16.msra.mxu0 %v3016_v4 }
  0x92   : > { %2814 = vmatprep.subr.bf16.mxu0 %v4009_v1 }
  0x93   : > { %2849 = vmatpush3.bf16.msra.mxu1 %v3017_v7 }
  0x94   : > { %2759 = vmatmul.mubr.bf16.gmra.mxu0 %v970_v8  ;;  %2850 = vmatprep.subr.bf16.mxu1 %v4009_v1 }
  0x95   : > { %2795 = vmatmul.mubr.bf16.gmra.mxu1 %v1153_v9  ;;  %2762 = vmatprep.mubr.msk.bf16.mxu0 %vm3039_vm0, %v4009_v1 }
  0x96   : > { %2798 = vmatprep.mubr.msk.bf16.mxu1 %vm3039_vm0, %v4009_v1  ;;  %2815 = vmatpush3.bf16.msra.mxu0 %v3018_v10 }
  0x97   : > { %2851 = vmatpush3.bf16.msra.mxu1 %v3019_v11  ;;  %2816 = vmatprep.subr.bf16.mxu0 %v4009_v1 }
  0x98   : > { %2852 = vmatprep.subr.bf16.mxu1 %v4009_v1 }
  0x9a   : > { %2817 = vmatpush3.bf16.msra.mxu0 %v3020_v16 }
  0x9b   : > { %2853 = vmatpush3.bf16.msra.mxu1 %v3021_v17  ;;  %2874 = vmatprep.subr.bf16.mxu0 %v4009_v1 }
  0x9c   : > { %2763 = vmatmul.mubr.bf16.gmra.mxu0 %v971_v18  ;;  %2910 = vmatprep.subr.bf16.mxu1 %v4009_v1 }
  0x9d   : > { %2799 = vmatmul.mubr.bf16.gmra.mxu1 %v1154_v19  ;;  %2818 = vmatprep.mubr.msk.bf16.mxu0 %vm3039_vm0, %v4009_v1 }
  0x9e   : > { %2854 = vmatprep.mubr.msk.bf16.mxu1 %vm3039_vm0, %v4009_v1 }
  0xa4   : > { %2819 = vmatmul.mubr.bf16.vlgmr.msra.gmra.mxu0 %v1333_v22 }
  0xa5   : > { %2855 = vmatmul.mubr.bf16.vlgmr.msra.gmra.mxu1 %v1516_v23  ;;  %2875 = vmatpush3.bf16.msra.mxu0 %v3022_v24 }
  0xa6   : > { %2876 = vmatprep.subr.bf16.mxu0 %v4009_v1  ;;  %2822 = vmatprep.mubr.msk.bf16.mxu0 %vm3039_vm0, %v4009_v1 }
  0xa7   : > { %2858 = vmatprep.mubr.msk.bf16.mxu1 %vm3039_vm0, %v4009_v1  ;;  %2918 = vmatpush3.bf16.msra.mxu1 %v3022_v24 }
  0xa8   : > { %2911 = vmatprep.subr.bf16.mxu1 %v4009_v1 }
  0xa9   : > { %2877 = vmatpush3.bf16.msra.mxu0 %v3023_v25 }
  0xaa   : > { %2878 = vmatprep.subr.bf16.mxu0 %v4009_v1 }
  0xab   : > { %2919 = vmatpush3.bf16.msra.mxu1 %v3023_v25 }
  0xac   : > { %2823 = vmatmul.mubr.bf16.gmra.mxu0 %v1334_v28  ;;  %2912 = vmatprep.subr.bf16.mxu1 %v4009_v1 }
  0xad   : > { %2859 = vmatmul.mubr.bf16.gmra.mxu1 %v1517_v29  ;;  %2879 = vmatpush3.bf16.msra.mxu0 %v3024_v30 }
  0xae   : > { %2826 = vmatprep.mubr.msk.bf16.mxu0 %vm3039_vm0, %v4009_v1  ;;  %2862 = vmatprep.mubr.msk.bf16.mxu1 %vm3039_vm0, %v4009_v1 }
  0xaf   : > { %2880 = vmatprep.subr.bf16.mxu0 %v4009_v1  ;;  %2920 = vmatpush3.bf16.msra.mxu1 %v3024_v30 }
  0xb0   : > { %2913 = vmatprep.subr.bf16.mxu1 %v4009_v1 }
  0xb1   : > { %2881 = vmatpush3.bf16.msra.mxu0 %v3025_v31 }
  0xb2   : > { %2882 = vmatprep.subr.bf16.mxu0 %v4009_v1 }
  0xb3   : > { %2921 = vmatpush3.bf16.msra.mxu1 %v3025_v31 }
  0xb4   : > { %2827 = vmatmul.mubr.bf16.gmra.mxu0 %v1335_v34  ;;  %2914 = vmatprep.subr.bf16.mxu1 %v4009_v1 }
  0xb5   : > { %2863 = vmatmul.mubr.bf16.gmra.mxu1 %v1518_v35  ;;  %2883 = vmatpush3.bf16.msra.mxu0 %v3026_v36 }
  0xb6   : > { %2830 = vmatprep.mubr.msk.bf16.mxu0 %vm3039_vm0, %v4009_v1  ;;  %2866 = vmatprep.mubr.msk.bf16.mxu1 %vm3039_vm0, %v4009_v1 }
  0xb7   : > { %2922 = vmatpush3.bf16.msra.mxu1 %v3026_v36  ;;  %2884 = vmatprep.subr.bf16.mxu0 %v4009_v1 }
  0xb8   : > { %2915 = vmatprep.subr.bf16.mxu1 %v4009_v1 }
  0xb9   : > { %2885 = vmatpush3.bf16.msra.mxu0 %v3027_v37 }
  0xba   : > { %2886 = vmatprep.subr.bf16.mxu0 %v4009_v1 }
  0xbb   : > { %2923 = vmatpush3.bf16.msra.mxu1 %v3027_v37 }
  0xbc   : > { %2831 = vmatmul.mubr.bf16.gmra.mxu0 %v1336_v40  ;;  %2916 = vmatprep.subr.bf16.mxu1 %v4009_v1 }
  0xbd   : > { %2867 = vmatmul.mubr.bf16.gmra.mxu1 %v1519_v41  ;;  %2834 = vmatprep.mubr.msk.bf16.mxu0 %vm3039_vm0, %v4009_v1 }
  0xbe   : > { %2870 = vmatprep.mubr.msk.bf16.mxu1 %vm3039_vm0, %v4009_v1  ;;  %2887 = vmatpush3.bf16.msra.mxu0 %v3028_v42 }
  0xbf   : > { %2924 = vmatpush3.bf16.msra.mxu1 %v3028_v42  ;;  %2888 = vmatprep.subr.bf16.mxu0 %v4009_v1 }
  0xc0   : > { %2917 = vmatprep.subr.bf16.mxu1 %v4009_v1 }
  0xc2   : > { %2889 = vmatpush3.bf16.msra.mxu0 %v3029_v46 }
  0xc3   : > { %2925 = vmatpush3.bf16.msra.mxu1 %v3029_v46 }
  0xc4   : > { %2835 = vmatmul.mubr.bf16.gmra.mxu0 %v1337_v47 }
  0xc5   : > { %2871 = vmatmul.mubr.bf16.gmra.mxu1 %v1520_v48  ;;  %2890 = vmatprep.mubr.msk.bf16.mxu0 %vm3039_vm0, %v4009_v1 }
  0xc6   : > { %2902 = vmatprep.mubr.msk.bf16.mxu1 %vm3039_vm0, %v4009_v1 }
  0xcc   : > { %2891 = vmatmul.mubr.bf16.vlgmr.msra.gmra.mxu0 %v1699_v53 }
  0xcd   : > { %2903 = vmatmul.mubr.bf16.vlgmr.msra.gmra.mxu1 %v1702_v54  ;;  %2894 = vmatprep.mubr.msk.bf16.mxu0 %vm3039_vm0, %v4009_v1 }
  0xce   : > { %2906 = vmatprep.mubr.msk.bf16.mxu1 %vm3039_vm0, %v4009_v1 }
  0xd4   : > { %2895 = vmatmul.mubr.bf16.gmra.mxu0 %v1700_v59 }
  0xd5   : > { %2907 = vmatmul.mubr.bf16.gmra.mxu1 %v1703_v60  ;;  %2898 = vmatprep.mubr.msk.bf16.mxu0 %vm3039_vm0, %v4009_v1 }
  0xdc   : > { %2899 = vmatmul.mubr.bf16.gmra.mxu0 %v1701_v63 }
  0xec   : > { %v349_v0 = vpop.f32.mrf.mxu0 }
  0xed   : > { %v532_v2 = vpop.f32.mrf.mxu1 }
  0xee   : > { %v571_v3 = vadd.f32 %v532_v2, %v349_v0  ;;  %v2604_v4 = vpop.f32.mrf.mxu0 }
  0xef   : > { %v2640_v5 = vpop.f32.mrf.mxu1 }
  0xf0   : > { %v352_v6 = vpop.f32.mrf.mxu0 }
  0xf1   : > { %v535_v7 = vpop.f32.mrf.mxu1 }
  0xf2   : > { %v572_v8 = vadd.f32 %v535_v7, %v352_v6  ;;  %v2605_v9 = vpop.f32.mrf.mxu0 }
  0xf3   : > { %v2641_v10 = vpop.f32.mrf.mxu1 }
  0xf4   : > { %v357_v11 = vpop.f32.mrf.mxu0 }
  0xf5   : > { %v540_v12 = vpop.f32.mrf.mxu1 }
  0xf6   : > { %v573_v13 = vadd.f32 %v540_v12, %v357_v11  ;;  %v2608_v14 = vpop.f32.mrf.mxu0 }
  0xf7   : > { %v2644_v15 = vpop.f32.mrf.mxu1 }
  0xf8   : > { %v360_v16 = vpop.f32.mrf.mxu0 }
  0xf9   : > { %v543_v17 = vpop.f32.mrf.mxu1 }
  0xfa   : > { %v574_v18 = vadd.f32 %v543_v17, %v360_v16  ;;  %v2609_v19 = vpop.f32.mrf.mxu0 }
  0xfb   : > { %v2645_v20 = vpop.f32.mrf.mxu1 }
  0xfc   : > { %v365_v21 = vpop.f32.mrf.mxu0 }
  0xfd   : > { %v548_v22 = vpop.f32.mrf.mxu1 }
  0xfe   : > { %v575_v23 = vadd.f32 %v548_v22, %v365_v21  ;;  %v2612_v24 = vpop.f32.mrf.mxu0 }
  0xff   : > { %v2648_v25 = vpop.f32.mrf.mxu1 }
 0x100   : > { %v368_v26 = vpop.f32.mrf.mxu0 }
 0x101   : > { %v551_v27 = vpop.f32.mrf.mxu1 }
 0x102   : > { %v576_v28 = vadd.f32 %v551_v27, %v368_v26  ;;  %v2613_v29 = vpop.f32.mrf.mxu0 }
 0x103   : > { %v2649_v30 = vpop.f32.mrf.mxu1 }
 0x104   : > { %v373_v31 = vpop.f32.mrf.mxu0 }
 0x105   : > { %v556_v32 = vpop.f32.mrf.mxu1 }
 0x106   : > { %v577_v33 = vadd.f32 %v556_v32, %v373_v31  ;;  %v2616_v34 = vpop.f32.mrf.mxu0 }
 0x107   : > { %v2652_v35 = vpop.f32.mrf.mxu1 }
 0x108   : > { %v376_v36 = vpop.f32.mrf.mxu0 }
 0x109   : > { %v559_v37 = vpop.f32.mrf.mxu1 }
 0x10a   : > { %v578_v38 = vadd.f32 %v559_v37, %v376_v36  ;;  %v2617_v39 = vpop.f32.mrf.mxu0 }
 0x10b   : > { %v2653_v40 = vpop.f32.mrf.mxu1 }
 0x10c   : > { %v381_v41 = vpop.f32.mrf.mxu0 }
 0x10d   : > { %v564_v42 = vpop.f32.mrf.mxu1 }
 0x10e   : > { %v579_v43 = vadd.f32 %v564_v42, %v381_v41  ;;  %v2620_v44 = vpop.f32.mrf.mxu0 }
 0x10f   : > { %v2656_v45 = vpop.f32.mrf.mxu1 }
 0x110   : > { %v384_v46 = vpop.f32.mrf.mxu0 }
 0x111   : > { %v567_v47 = vpop.f32.mrf.mxu1 }
 0x112   : > { %v580_v48 = vadd.f32 %v567_v47, %v384_v46  ;;  %v2621_v49 = vpop.f32.mrf.mxu0 }
 0x113   : > { %v2657_v50 = vpop.f32.mrf.mxu1 }
 0x114   : > { %v715_v51 = vpop.f32.mrf.mxu0 }
 0x115   : > { %v754_v52 = vadd.f32 %v715_v51, %v571_v3  ;;  %v898_v53 = vpop.f32.mrf.mxu1 }
 0x116   : > { %v2676_v54 = vpop.f32.mrf.mxu0 }
 0x117   : > { %v937_v55 = vadd.f32 %v898_v53, %v754_v52  ;;  %v2712_v56 = vpop.f32.mrf.mxu1 }
 0x118   : > { %v718_v57 = vpop.f32.mrf.mxu0 }
 0x119   : > { %v755_v58 = vadd.f32 %v718_v57, %v572_v8  ;;  %v901_v59 = vpop.f32.mrf.mxu1 }
 0x11a   : > { %v2677_v60 = vpop.f32.mrf.mxu0 }
 0x11b   : > { %v938_v61 = vadd.f32 %v901_v59, %v755_v58  ;;  %v2713_v62 = vpop.f32.mrf.mxu1 }
 0x11c   : > { %v723_v63 = vpop.f32.mrf.mxu0 }
 0x11d   : > { %v756_v0 = vadd.f32 %v723_v63, %v573_v13  ;;  %v906_v2 = vpop.f32.mrf.mxu1 }
 0x11e   : > { %v2680_v4 = vpop.f32.mrf.mxu0 }
 0x11f   : > { %v939_v5 = vadd.f32 %v906_v2, %v756_v0  ;;  %v2716_v6 = vpop.f32.mrf.mxu1 }
 0x120   : > { %v726_v7 = vpop.f32.mrf.mxu0 }
 0x121   : > { %v757_v9 = vadd.f32 %v726_v7, %v574_v18  ;;  %v909_v10 = vpop.f32.mrf.mxu1 }
 0x122   : > { %v2681_v3 = vpop.f32.mrf.mxu0 }
 0x123   : > { %v940_v11 = vadd.f32 %v909_v10, %v757_v9  ;;  %v2717_v12 = vpop.f32.mrf.mxu1 }
 0x124   : > { %v731_v14 = vpop.f32.mrf.mxu0 }
 0x125   : > { %v758_v15 = vadd.f32 %v731_v14, %v575_v23  ;;  %v914_v16 = vpop.f32.mrf.mxu1 }
 0x126   : > { %v2684_v8 = vpop.f32.mrf.mxu0 }
 0x127   : > { %v941_v17 = vadd.f32 %v914_v16, %v758_v15  ;;  %v2720_v19 = vpop.f32.mrf.mxu1 }
 0x128   : > { %v734_v20 = vpop.f32.mrf.mxu0 }
 0x129   : > { %v759_v21 = vadd.f32 %v734_v20, %v576_v28  ;;  %v917_v22 = vpop.f32.mrf.mxu1 }
 0x12a   : > { %v2685_v13 = vpop.f32.mrf.mxu0 }
 0x12b   : > { %v942_v24 = vadd.f32 %v917_v22, %v759_v21  ;;  %v2721_v25 = vpop.f32.mrf.mxu1 }
 0x12c   : > { %v739_v26 = vpop.f32.mrf.mxu0 }
 0x12d   : > { %v760_v27 = vadd.f32 %v739_v26, %v577_v33  ;;  %v922_v29 = vpop.f32.mrf.mxu1 }
 0x12e   : > { %v2688_v18 = vpop.f32.mrf.mxu0 }
 0x12f   : > { %v3579_v30 = vadd.f32 %v922_v29, %v760_v27  ;;  %v2724_v31 = vpop.f32.mrf.mxu1 }
 0x130   : > { %v742_v32 = vpop.f32.mrf.mxu0 }
 0x131   : > { %v761_v34 = vadd.f32 %v742_v32, %v578_v38  ;;  %v925_v23 = vpop.f32.mrf.mxu1 }
 0x132   : > { %v2689_v35 = vpop.f32.mrf.mxu0 }
 0x133   : > { %v3581_v36 = vadd.f32 %v925_v23, %v761_v34  ;;  %v2725_v37 = vpop.f32.mrf.mxu1 }
 0x134   : > { %v747_v39 = vpop.f32.mrf.mxu0  ;;  %v1892_v37 = vlaneseq }
 0x135   : > { %v762_v28 = vadd.f32 %v747_v39, %v579_v43  ;;  %v930_v40 = vpop.f32.mrf.mxu1 }
 0x136   : > { %v2692_v41 = vpop.f32.mrf.mxu0 }
 0x137   : > { %v3583_v42 = vadd.f32 %v930_v40, %v762_v28  ;;  %v2728_v44 = vpop.f32.mrf.mxu1 }
 0x138   : > { %v750_v33 = vpop.f32.mrf.mxu0  ;;  %v3615_v44 = vshrl.u32 %v1892_v37, 7 }
 0x139   : > { %v763_v45 = vadd.f32 %v750_v33, %v580_v48  ;;  %v933_v46 = vpop.f32.mrf.mxu1 }
 0x13a   : > { %v2693_v47 = vpop.f32.mrf.mxu0 }
 0x13b   : > { %v3585_v49 = vadd.f32 %v933_v46, %v763_v45  ;;  %v2729_v50 = vpop.f32.mrf.mxu1 }
 0x13c   : > { %v1081_v38 = vpop.f32.mrf.mxu0  ;;  %v1899_v50 = vadd.s32 48, %v3615_v44 }
 0x13d   : > { %v1120_v51 = vadd.f32 %v1081_v38, %v937_v55  ;;  %v1264_v52 = vpop.f32.mrf.mxu1 }
 0x13e   : > { %v2748_v53 = vpop.f32.mrf.mxu0 }
 0x13f   : > { %v3587_v54 = vadd.f32 %v1264_v52, %v1120_v51  ;;  %v2784_v56 = vpop.f32.mrf.mxu1  ;;  %v3625_v51 = vmul.u32.u64.low 3435973837, %v3615_v44  ;;  %v3626_v52 = vmul.u32.u64.high 3435973837, %v3615_v44, %v3625_v51 }
 0x140   : > { %v1084_v43 = vpop.f32.mrf.mxu0  ;;  %v1894_v56 = vadd.s32 8, %v3615_v44 }
 0x141   : > { %v1121_v57 = vadd.f32 %v1084_v43, %v938_v61  ;;  %v1267_v58 = vpop.f32.mrf.mxu1 }
 0x142   : > { %v2749_v59 = vpop.f32.mrf.mxu0 }
 0x143   : > { %v3589_v60 = vadd.f32 %v1267_v58, %v1121_v57  ;;  %v2785_v62 = vpop.f32.mrf.mxu1  ;;  %v3631_v58 = vmul.u32.u64.low 3435973837, %v1899_v50  ;;  %v3632_v59 = vmul.u32.u64.high 3435973837, %v1899_v50, %v3631_v58 }
 0x144   : > { %v1089_v48 = vpop.f32.mrf.mxu0 }
 0x145   : > { %v1122_v63 = vadd.f32 %v1089_v48, %v939_v5  ;;  %v1272_v0 = vpop.f32.mrf.mxu1  ;;  %v1895_v48 = vadd.s32 16, %v3615_v44 }
 0x146   : > { %v2752_v2 = vpop.f32.mrf.mxu0 }
 0x147   : > { %v3591_v4 = vadd.f32 %v1272_v0, %v1122_v63  ;;  %v2788_v6 = vpop.f32.mrf.mxu1  ;;  %v3639_v0 = vmul.u32.u64.low 3435973837, %v1894_v56  ;;  %v3640_v2 = vmul.u32.u64.high 3435973837, %v1894_v56, %v3639_v0 }
 0x148   : > { %v1092_v55 = vpop.f32.mrf.mxu0 }
 0x149   : > { %v1123_v7 = vadd.f32 %v1092_v55, %v940_v11  ;;  %v1275_v9 = vpop.f32.mrf.mxu1 }
 0x14a   : > { %v2753_v10 = vpop.f32.mrf.mxu0 }
 0x14b   : > { %v3593_v3 = vadd.f32 %v1275_v9, %v1123_v7  ;;  %v2789_v12 = vpop.f32.mrf.mxu1  ;;  %v1909_v9 = vshrl.u32 %v3626_v52, 3 }
 0x14c   : > { %v1097_v61 = vpop.f32.mrf.mxu0  ;;  %v3645_v10 = vmul.u32.u64.low 3435973837, %v1895_v48  ;;  %v3646_v12 = vmul.u32.u64.high 3435973837, %v1895_v48, %v3645_v10 }
 0x14d   : > { %v1124_v14 = vadd.f32 %v1097_v61, %v941_v17  ;;  %v1280_v15 = vpop.f32.mrf.mxu1 }
 0x14e   : > { %v2756_v16 = vpop.f32.mrf.mxu0 }
 0x14f   : > { %v3595_v8 = vadd.f32 %v1280_v15, %v1124_v14  ;;  %v2792_v19 = vpop.f32.mrf.mxu1  ;;  %v3651_v14 = vadd.s32 24, %v3615_v44 }
 0x150   : > { %v1100_v5 = vpop.f32.mrf.mxu0  ;;  %v1975_v19 = vshrl.u32 %v3632_v59, 3 }
 0x151   : > { %v1125_v20 = vadd.f32 %v1100_v5, %v942_v24  ;;  %v1283_v21 = vpop.f32.mrf.mxu1 }
 0x152   : > { %v2757_v22 = vpop.f32.mrf.mxu0 }
 0x153   : > { %v3597_v13 = vadd.f32 %v1283_v21, %v1125_v20  ;;  %v2793_v25 = vpop.f32.mrf.mxu1  ;;  %v1910_v20 = vmul.u32 10, %v1909_v9  ;;  %v3657_v21 = vadd.s32 56, %v3615_v44  ;;  %v3689_v9 = vadd.s32 40, %v3615_v44 }
 0x154   : > { %v3599_v11 = vpop.f32.mrf.mxu0  ;;  %v1920_v25 = vshrl.u32 %v3640_v2, 3 }
 0x155   : > { %v3601_v26 = vpop.f32.mrf.mxu1 }
 0x156   : > { %v2760_v27 = vpop.f32.mrf.mxu0  ;;  %v1921_v52 = vmul.u32 10, %v1920_v25 }
 0x157   : > { %v2796_v29 = vpop.f32.mrf.mxu1 }
 0x158   : > { %v3603_v18 = vpop.f32.mrf.mxu0  ;;  %v3663_v27 = vmul.u32.u64.low 3435973837, %v3651_v14  ;;  %v3664_v29 = vmul.u32.u64.high 3435973837, %v3651_v14, %v3663_v27 }
 0x159   : > { %v3605_v17 = vpop.f32.mrf.mxu1 }
 0x15a   : > { %v2761_v31 = vpop.f32.mrf.mxu0 }
 0x15b   : > { %v2797_v32 = vpop.f32.mrf.mxu1 }
 0x15c   : > { %v3607_v34 = vpop.f32.mrf.mxu0 }
 0x15d   : > { %v3609_v24 = vpop.f32.mrf.mxu1 }
 0x15e   : > { %v2764_v23 = vpop.f32.mrf.mxu0 }
 0x15f   : > { %v2800_v35 = vpop.f32.mrf.mxu1  ;;  %v1976_v23 = vmul.u32 10, %v1975_v19 }
 0x160   : > { %v3611_v39 = vpop.f32.mrf.mxu0  ;;  %v3667_v35 = vadd.s32 32, %v3615_v44 }
 0x161   : > { %v3613_v28 = vpop.f32.mrf.mxu1  ;;  %v3682_v59 = vsub.s32 %v1899_v50, %v1976_v23  ;;  %v1942_v50 = vshrl.u32 %v3664_v29, 3 }
 0x162   : > { %v2765_v40 = vpop.f32.mrf.mxu0  ;;  %v3685_v0 = vmul.u32.u64.low 3435973837, %v3667_v35  ;;  %v3686_v2 = vmul.u32.u64.high 3435973837, %v3667_v35, %v3685_v0 }
 0x163   : > { %v2801_v41 = vpop.f32.mrf.mxu1  ;;  %v1911_v40 = vsub.s32 %v3615_v44, %v1910_v20  ;;  %vm2019_vm4 = vcmp.ne.s32.totalorder %v3682_v59, 0  ;;  %v1943_v29 = vmul.u32 10, %v1942_v50  ;;  %vm2029_vm7 = vcmp.lt.s32.totalorder %v3682_v59, 0 }
 0x164   : > { %v3617_v33 = vpop.f32.mrf.mxu0  ;;  %v3726_v50 = vadd.s32 10, %v3682_v59  ;;  %vm3742_vm12 = vmand %vm2029_vm7, %vm2019_vm4 }
 0x165   : > { %v3619_v45 = vpop.f32.mrf.mxu1  ;;  %vm2013_vm1 = vcmp.ne.s32.totalorder %v1911_v40, 0  ;;  %vm2023_vm2 = vcmp.lt.s32.totalorder %v1911_v40, 0  ;;  %v2043_v20 = vadd.s32 10, %v1911_v40 }
 0x166   : > { %v2820_v46 = vpop.f32.mrf.mxu0  ;;  %vm3698_vm3 = vmand %vm2023_vm2, %vm2013_vm1 }
 0x167   : > { %v2856_v47 = vpop.f32.mrf.mxu1  ;;  %v3673_v41 = vmul.u32.u64.low 3435973837, %v3657_v21  ;;  %v3674_v46 = vmul.u32.u64.high 3435973837, %v3657_v21, %v3673_v41 }
 0x168   : > { %v3622_v38 = vpop.f32.mrf.mxu0  ;;  %v1931_v47 = vshrl.u32 %v3646_v12, 3  ;;  %v1922_v12 = vsub.s32 %v1894_v56, %v1921_v52  ;;  %v3708_v56 = vmul.u32.u64.low 3435973837, %v3689_v9  ;;  %v3709_v41 = vmul.u32.u64.high 3435973837, %v3689_v9, %v3708_v56 }
 0x169   : > { %v3628_v53 = vpop.f32.mrf.mxu1  ;;  %v1126_v52 = vadd.f32 %v3599_v11, %v3579_v30 }
 0x16a   : > { %v2821_v43 = vpop.f32.mrf.mxu0  ;;  %vm2014_vm5 = vcmp.ne.s32.totalorder %v1922_v12, 0  ;;  %vm2024_vm6 = vcmp.lt.s32.totalorder %v1922_v12, 0  ;;  %v2044_v0 = vadd.s32 10, %v1922_v12 }
 0x16b   : > { %v2857_v57 = vpop.f32.mrf.mxu1  ;;  %v3680_v43 = vadd.s32 64, %v3615_v44  ;;  %vm3728_vm8 = vmand %vm2024_vm6, %vm2014_vm5  ;;  %v1309_v27 = vadd.f32 %v3601_v26, %v1126_v52 }
 0x16c   : > { %v3634_v62 = vpop.f32.mrf.mxu0 }
 0x16d   : > { %v3637_v63 = vpop.f32.mrf.mxu1 }
 0x16e   : > { %v2824_v6 = vpop.f32.mrf.mxu0 }
 0x16f   : > { %v2860_v55 = vpop.f32.mrf.mxu1 }
 0x170   : > { %v3642_v7 = vpop.f32.mrf.mxu0  ;;  %v1932_v55 = vmul.u32 10, %v1931_v47 }
 0x171   : > { %v3648_v61 = vpop.f32.mrf.mxu1 }
 0x172   : > { %v2825_v15 = vpop.f32.mrf.mxu0  ;;  %v3705_v23 = vsub.s32 %v1895_v48, %v1932_v55  ;;  %v3720_v48 = vadd.s32 72, %v3615_v44  ;;  %v1953_v55 = vshrl.u32 %v3686_v2, 3 }
 0x173   : > { %v2861_v16 = vpop.f32.mrf.mxu1 }
 0x174   : > { %v3654_v5 = vpop.f32.mrf.mxu0  ;;  %v3694_v15 = vmul.u32.u64.low 3435973837, %v3680_v43  ;;  %v3695_v16 = vmul.u32.u64.high 3435973837, %v3680_v43, %v3694_v15  ;;  %vm2015_vm9 = vcmp.ne.s32.totalorder %v3705_v23, 0  ;;  %vm2025_vm10 = vcmp.lt.s32.totalorder %v3705_v23, 0 }
 0x175   : > { %v3659_v22 = vpop.f32.mrf.mxu1  ;;  %vm3766_vm13 = vmand %vm2025_vm10, %vm2015_vm9 }
 0x176   : > { %v2828_v31 = vpop.f32.mrf.mxu0 }
 0x177   : > { %v2864_v32 = vpop.f32.mrf.mxu1 }
 0x178   : > { %v3669_v37 = vpop.f32.mrf.mxu0  ;;  %v1986_v32 = vshrl.u32 %v3674_v46, 3  ;;  %v2053_v46 = vsel %vm3698_vm3, %v2043_v20, %v1911_v40  ;;  %v1997_v20 = vshrl.u32 %v3695_v16, 3  ;;  %v2054_v16 = vsel %vm3728_vm8, %v2044_v0, %v1922_v12 }
 0x179   : > { %v3677_v51 = vpop.f32.mrf.mxu1  ;;  %vm3736_vm11 = vcmp.lt.s32.totalorder %v2053_v46, 8  ;;  %vm3791_vm0 = vcmp.lt.s32.totalorder %v2054_v16, 8  ;;  %v1487_v40 = vadd.f32 %v3622_v38, %v3589_v60 }
 0x17a   : > { %v2829_v57 = vpop.f32.mrf.mxu0  ;;  %v1987_v11 = vmul.u32 10, %v1986_v32  ;;  %v1127_v32 = vadd.f32 %v3603_v18, %v3581_v36  ;;  %v1954_v36 = vmul.u32 10, %v1953_v55  ;;  %v1128_v55 = vadd.f32 %v3607_v34, %v3583_v42 }
 0x17b   : > { %v2865_v58 = vpop.f32.mrf.mxu1 }
 0x17c   : > { %v1471_v6 = vpop.f32.mrf.mxu0  ;;  %v1310_v0 = vadd.f32 %v3605_v17, %v1127_v32 }
 0x17d   : > { %v3691_v10 = vpop.f32.mrf.mxu1  ;;  %v1492_v18 = vadd.f32 %v1471_v6, %v1309_v27  ;;  %v1998_v6 = vmul.u32 10, %v1997_v20  ;;  %v3803_v27 = vsub.s32 %v3667_v35, %v1954_v36  ;;  %v1670_v36 = vadd.f32 %v3628_v53, %v1487_v40 }
 0x17e   : > { %v2832_v19 = vpop.f32.mrf.mxu0 }
 0x17f   : > { %v2868_v25 = vpop.f32.mrf.mxu1  ;;  %v2045_v19 = vadd.s32 10, %v3705_v23  ;;  %v1675_v42 = vadd.f32 %v3691_v10, %v1492_v18  ;;  %v3831_v32 = vsub.s32 %v3680_v43, %v1998_v6  ;;  %v1488_v43 = vadd.f32 %v3634_v62, %v3591_v4 }
 0x180   : > { %v3702_v31 = vpop.f32.mrf.mxu0  ;;  %v3749_v25 = vsub.s32 %v3651_v14, %v1943_v29  ;;  %v4021_v29 = vmov 0.0   ;;  %vm2017_vm5 = vcmp.ne.s32.totalorder %v3803_v27, 0  ;;  %vm2027_vm6 = vcmp.lt.s32.totalorder %v3803_v27, 0 }
 0x181   : > { %v3711_v47 = vpop.f32.mrf.mxu1  ;;  %v2457_v52 = vsel %vm3736_vm11, 1.0, %v4021_v29  ;;  %v1493_v34 = vadd.f32 %v3702_v31, %v1310_v0  ;;  %v2458_v31 = vsel %vm3791_vm0, 1.0, %v4021_v29  ;;  %vm2021_vm7 = vcmp.ne.s32.totalorder %v3831_v32, 0  ;;  %vm3877_vm9 = vmand %vm2027_vm6, %vm2017_vm5 }
 0x182   : > { %v2833_v57 = vpop.f32.mrf.mxu0  ;;  %vm2016_vm14 = vcmp.ne.s32.totalorder %v3749_v25, 0  ;;  %vm2026_vm15 = vcmp.lt.s32.totalorder %v3749_v25, 0  ;;  %v2046_v17 = vadd.s32 10, %v3749_v25 }
 0x183   : > { %v2869_v58 = vpop.f32.mrf.mxu1  ;;  %v3755_v57 = vmul.u32.u64.low 3435973837, %v3720_v48  ;;  %v3756_v46 = vmul.u32.u64.high 3435973837, %v3720_v48, %v3755_v57  ;;  %vm3819_vm1 = vmand %vm2026_vm15, %vm2016_vm14  ;;  %vm2031_vm14 = vcmp.lt.s32.totalorder %v3831_v32, 0 }
 0x184   : > { %v3723_v15 = vpop.f32.mrf.mxu0  ;;  %v1486_v58 = vadd.f32 %v3617_v33, %v3587_v54  ;;  %v3778_v54 = vsub.s32 %v3657_v21, %v1987_v11  ;;  %v1964_v33 = vshrl.u32 %v3709_v41, 3  ;;  %v2055_v41 = vsel %vm3766_vm13, %v2045_v19, %v3705_v23 }
 0x185   : > { %v3734_v44 = vpop.f32.mrf.mxu1  ;;  %vm3826_vm2 = vcmp.lt.s32.totalorder %v2055_v41, 8  ;;  %v1129_v57 = vadd.f32 %v3611_v39, %v3585_v49  ;;  %v2008_v26 = vshrl.u32 %v3756_v46, 3  ;;  %v2056_v49 = vsel %vm3819_vm1, %v2046_v17, %v3749_v25 }
 0x186   : > { %v2836_v56 = vpop.f32.mrf.mxu0  ;;  %v1669_v11 = vadd.f32 %v3619_v45, %v1486_v58  ;;  %v3813_v45 = vadd.s32 10, %v3778_v54  ;;  %v1965_v38 = vmul.u32 10, %v1964_v33  ;;  %vm2020_vm3 = vcmp.ne.s32.totalorder %v3778_v54, 0 }
 0x187   : > { %v2872_v1 = vpop.f32.mrf.mxu1  ;;  %v1311_v56 = vadd.f32 %v3609_v24, %v1128_v55  ;;  %vm2030_vm4 = vcmp.lt.s32.totalorder %v3778_v54, 0  ;;  %v1676_v24 = vadd.f32 %v3711_v47, %v1493_v34  ;;  %v2459_v25 = vsel %vm3826_vm2, 1.0, %v4021_v29 }
 0x188   : > { %v3770_v14 = vpop.f32.mrf.mxu0  ;;  %v2059_v1 = vsel %vm3742_vm12, %v3726_v50, %v3682_v59  ;;  %v3855_v4 = vsub.s32 %v3689_v9, %v1965_v38  ;;  %v1312_v47 = vadd.f32 %v3613_v28, %v1129_v57  ;;  %v2009_v0 = vmul.u32 10, %v2008_v26  ;;  %vm3920_vm15 = vmand %vm2030_vm4, %vm2020_vm3 }
 0x189   : > { %v3781_v12 = vpop.f32.mrf.mxu1  ;;  %v1494_v39 = vadd.f32 %v3723_v15, %v1311_v56  ;;  %v2047_v55 = vadd.s32 10, %v3803_v27  ;;  %v1671_v9 = vadd.f32 %v3637_v63, %v1488_v43  ;;  %vm3869_vm8 = vcmp.lt.s32.totalorder %v2056_v49, 8  ;;  %vm3940_vm3 = vmand %vm2031_vm14, %vm2021_vm7 }
 0x18a   : > { %v2837_v21 = vpop.f32.mrf.mxu0  ;;  %vm2018_vm10 = vcmp.ne.s32.totalorder %v3855_v4, 0  ;;  %vm2028_vm11 = vcmp.lt.s32.totalorder %v3855_v4, 0  ;;  %v2048_v60 = vadd.s32 10, %v3855_v4  ;;  %vm3950_vm4 = vcmp.lt.s32.totalorder %v2059_v1, 8 }
 0x18b   : > { %v2873_v20 = vpop.f32.mrf.mxu1  ;;  %v1677_v63 = vadd.f32 %v3734_v44, %v1494_v39  ;;  %v3890_v44 = vsub.s32 %v3720_v48, %v2009_v0  ;;  %vm3904_vm13 = vmand %vm2028_vm11, %vm2018_vm10  ;;  %v1491_v39 = vadd.f32 %v3669_v37, %v3597_v13  ;;  %v2060_v13 = vsel %vm3920_vm15, %v3813_v45, %v3778_v54 }
 0x18c   : > { %v1813_v23 = vpop.f32.mrf.mxu0  ;;  %v2058_v49 = vsel %vm3904_vm13, %v2048_v60, %v3855_v4  ;;  %vm2070_vm6 = vcmp.lt.s32.totalorder %v2060_v13, 8 }
 0x18d   : > { %v1852_v35 = vadd.f32 %v1813_v23, %v1669_v11  ;;  %v1837_v10 = vpop.f32.mrf.mxu1  ;;  %v1495_v11 = vadd.f32 %v3770_v14, %v1312_v47  ;;  %v2057_v14 = vsel %vm3877_vm9, %v2047_v55, %v3803_v27  ;;  %vm2022_vm1 = vcmp.ne.s32.totalorder %v3890_v44, 0 }
 0x18e   : > { %v3836_v58 = vadd.f32 %v1837_v10, %v1675_v42  ;;  %v2892_v16 = vpop.f32.mrf.mxu0  ;;  %vm3924_vm0 = vcmp.lt.s32.totalorder %v2057_v14, 8  ;;  %vm2032_vm2 = vcmp.lt.s32.totalorder %v3890_v44, 0  ;;  %v2052_v37 = vadd.s32 10, %v3890_v44 }
 0x18f   : > { %1882 = vst [vmem:[%s3810_s28] sm:$0xff] %v1852_v35  ;;  %v2904_v18 = vpop.f32.mrf.mxu1  ;;  %v2093_v53 = vmul.f32 %v2457_v52, %v1852_v35  ;;  %v1489_v52 = vadd.f32 %v3642_v7, %v3593_v3  ;;  %v1678_v27 = vadd.f32 %v3781_v12, %v1495_v11  ;;  %v2461_v2 = vsel %vm3924_vm0, 1.0, %v4021_v29  ;;  %vm3967_vm12 = vmand %vm2032_vm2, %vm2022_vm1 }
 0x190   : > { %1888 = vst [vmem:[%s3810_s28 + $0x30] sm:$0xff] %v3836_v58  ;;  %v1816_v46 = vpop.f32.mrf.mxu0  ;;  %vm2068_vm5 = vcmp.lt.s32.totalorder %v2058_v49, 8  ;;  %v1674_v47 = vadd.f32 %v3677_v51, %v1491_v39  ;;  %v2463_v55 = vsel %vm3950_vm4, 1.0, %v4021_v29  ;;  %v2464_v41 = vsel %vm2070_vm6, 1.0, %v4021_v29 }
 0x191   : > { %v1853_v62 = vadd.f32 %v1816_v46, %v1670_v36  ;;  %v1840_v33 = vpop.f32.mrf.mxu1  ;;  %v2119_v7 = vmul.f32 %v2093_v53, %v1852_v35  ;;  %v1672_v38 = vadd.f32 %v3648_v61, %v1489_v52  ;;  %v1490_v35 = vadd.f32 %v3654_v5, %v3595_v8 }
 0x192   : > { %v3862_v15 = vadd.f32 %v1840_v33, %v1676_v24  ;;  %v2893_v6 = vpop.f32.mrf.mxu0  ;;  %v2051_v8 = vadd.s32 10, %v3831_v32  ;;  %v2460_v5 = vsel %vm3869_vm8, 1.0, %v4021_v29 }
 0x193   : > { %1883 = vst [vmem:[%s3810_s28 + $0x8] sm:$0xff] %v1853_v62  ;;  %v2094_v21 = vmul.f32 %v2458_v31, %v1853_v62  ;;  %v2905_v30 = vpop.f32.mrf.mxu1  ;;  %v1673_v24 = vadd.f32 %v3659_v22, %v1490_v35 }
 0x194   : > { %1889 = vst [vmem:[%s3810_s28 + $0x38] sm:$0xff] %v3862_v15  ;;  %v1821_v3 = vpop.f32.mrf.mxu0  ;;  %v2061_v54 = vsel %vm3940_vm3, %v2051_v8, %v3831_v32 }
 0x195   : > { %v2103_v40 = vadd.f32 %v2094_v21, %v2093_v53  ;;  %v2120_v20 = vmul.f32 %v2094_v21, %v1853_v62  ;;  %v1854_v17 = vadd.f32 %v1821_v3, %v1671_v9  ;;  %v1845_v42 = vpop.f32.mrf.mxu1  ;;  %v2062_v9 = vsel %vm3967_vm12, %v2052_v37, %v3890_v44 }
 0x196   : > { %v3887_v34 = vadd.f32 %v1845_v42, %v1677_v63  ;;  %v2896_v23 = vpop.f32.mrf.mxu0  ;;  %v2462_v21 = vsel %vm2068_vm5, 1.0, %v4021_v29  ;;  %vm2071_vm7 = vcmp.lt.s32.totalorder %v2061_v54, 8  ;;  %v2099_v63 = vmul.f32 %v2463_v55, %v3836_v58 }
 0x197   : > { %v2129_v10 = vadd.f32 %v2120_v20, %v2119_v7  ;;  %1884 = vst [vmem:[%s3810_s28 + $0x10] sm:$0xff] %v1854_v17  ;;  %v2095_v31 = vmul.f32 %v2459_v25, %v1854_v17  ;;  %v2908_v19 = vpop.f32.mrf.mxu1  ;;  %vm2072_vm8 = vcmp.lt.s32.totalorder %v2062_v9, 8  ;;  %v2465_v7 = vsel %vm2071_vm7, 1.0, %v4021_v29 }
 0x198   : > { %1890 = vst [vmem:[%s3810_s28 + $0x40] sm:$0xff] %v3887_v34  ;;  %v1824_v61 = vpop.f32.mrf.mxu0  ;;  %v2466_v42 = vsel %vm2072_vm8, 1.0, %v4021_v29  ;;  %v2125_v23 = vmul.f32 %v2099_v63, %v3836_v58  ;;  %v2101_v44 = vmul.f32 %v2465_v7, %v3887_v34 }
 0x199   : > { %v2104_v12 = vadd.f32 %v2103_v40, %v2095_v31  ;;  %v2121_v57 = vmul.f32 %v2095_v31, %v1854_v17  ;;  %v1855_v16 = vadd.f32 %v1824_v61, %v1672_v38  ;;  %v1848_v26 = vpop.f32.mrf.mxu1  ;;  %v2100_v40 = vmul.f32 %v2464_v41, %v3862_v15 }
 0x19a   : > { %v1861_v43 = vadd.f32 %v1848_v26, %v1678_v27  ;;  %v2897_v18 = vpop.f32.mrf.mxu0  ;;  %v2127_v19 = vmul.f32 %v2101_v44, %v3887_v34 }
 0x19b   : > { %v2130_v46 = vadd.f32 %v2129_v10, %v2121_v57  ;;  %1885 = vst [vmem:[%s3810_s28 + $0x18] sm:$0xff] %v1855_v16  ;;  %v2096_v62 = vmul.f32 %v2460_v5, %v1855_v16  ;;  %v2909_v33 = vpop.f32.mrf.mxu1  ;;  %v2126_v38 = vmul.f32 %v2100_v40, %v3862_v15 }
 0x19c   : > { %1891 = vst [vmem:[%s3810_s28 + $0x48] sm:$0xff] %v1861_v43  ;;  %v1829_v4 = vpop.f32.mrf.mxu0  ;;  %v2102_v35 = vmul.f32 %v2466_v42, %v1861_v43 }
 0x19d   : > { %v2105_v25 = vadd.f32 %v2104_v12, %v2096_v62  ;;  %v2122_v59 = vmul.f32 %v2096_v62, %v1855_v16  ;;  %v1856_v1 = vadd.f32 %v1829_v4, %v1673_v24 }
 0x19e   : > { %v2900_v45 = vpop.f32.mrf.mxu0  ;;  %v2128_v8 = vmul.f32 %v2102_v35, %v1861_v43 }
 0x19f   : > { %v2131_v6 = vadd.f32 %v2130_v46, %v2122_v59  ;;  %1886 = vst [vmem:[%s3810_s28 + $0x20] sm:$0xff] %v1856_v1  ;;  %v2097_v0 = vmul.f32 %v2461_v2, %v1856_v1 }
 0x1a0   : > { %v1832_v52 = vpop.f32.mrf.mxu0 }
 0x1a1   : > { %v2106_v32 = vadd.f32 %v2105_v25, %v2097_v0  ;;  %v2123_v30 = vmul.f32 %v2097_v0, %v1856_v1  ;;  %v1857_v51 = vadd.f32 %v1832_v52, %v1674_v47 }
 0x1a2   : > { %v2901_v28 = vpop.f32.mrf.mxu0 }
 0x1a3   : > { %v2132_v11 = vadd.f32 %v2131_v6, %v2123_v30  ;;  %1887 = vst [vmem:[%s3810_s28 + $0x28] sm:$0xff] %v1857_v51  ;;  %v2098_v3 = vmul.f32 %v2462_v21, %v1857_v51 }
 0x1a5   : > { %v2107_v20 = vadd.f32 %v2106_v32, %v2098_v3  ;;  %v2124_v17 = vmul.f32 %v2098_v3, %v1857_v51 }
 0x1a7   : > { %v2108_v14 = vadd.f32 %v2107_v20, %v2099_v63  ;;  %v2133_v60 = vadd.f32 %v2132_v11, %v2124_v17 }
 0x1a9   : > { %v2109_v10 = vadd.f32 %v2108_v14, %v2100_v40  ;;  %v2134_v31 = vadd.f32 %v2133_v60, %v2125_v23 }
 0x1ab   : > { %v2110_v48 = vadd.f32 %v2109_v10, %v2101_v44  ;;  %v2135_v27 = vadd.f32 %v2134_v31, %v2126_v38 }
 0x1ad   : > { %v2111_v61 = vadd.f32 %v2110_v48, %v2102_v35  ;;  %v2136_v29 = vadd.f32 %v2135_v27, %v2127_v19 }
 0x1af   : > { %v2112_v5 = vrot.slane %v2111_v61, 4  ;;  %v2137_v58 = vadd.f32 %v2136_v29, %v2128_v8 }
 0x1b1   : > { %v2113_v56 = vadd.f32 %v2112_v5, %v2111_v61  ;;  %v2138_v12 = vrot.slane %v2137_v58, 4 }
 0x1b3   : > { %v2114_v57 = vrot.slane %v2113_v56, 2  ;;  %v2139_v16 = vadd.f32 %v2138_v12, %v2137_v58 }
 0x1b5   : > { %v2115_v26 = vadd.f32 %v2114_v57, %v2113_v56  ;;  %v2140_v15 = vrot.slane %v2139_v16, 2 }
 0x1b7   : > { %v2116_v36 = vrot.slane %v2115_v26, 1  ;;  %v2141_v18 = vadd.f32 %v2140_v15, %v2139_v16 }
 0x1b9   : > { %v2117_v34 = vadd.f32 %v2116_v36, %v2115_v26  ;;  %v2142_v49 = vrot.slane %v2141_v18, 1 }
 0x1bb   : > { %2118 = vst [vmem:[%s211_s5] sm:$0x1] %v2117_v34  ;;  %v2143_v43 = vadd.f32 %v2142_v49, %v2141_v18 }
 0x1bd   : > { %2144 = vst [vmem:[%s214_s8] sm:$0x1] %v2143_v43 }
 0x1be PF: > { %s15_s15 = sadd.s32 1, %s3036_s15  }
 0x1bf   : > { %p12_p4 = scmp.ge.s32.totalorder %s15_s15, 4  }
 0x1c1   :  { %14 = sbr.rel (!%p12_p4) target bundleno = 1 (0x1), region = 90 }

</bundles_post_ra>
